<compile_context>
chip_gen: v7x
topology: tpu7x:2x2x1
jax: 0.10.0
libtpu: 0.0.40
codegen_flags: <defaults>
</compile_context>

<pallas_src>
import functools
import math

import jax
import jax.numpy as jnp
from jax.experimental import pallas as pl
from jax.experimental.pallas import tpu as pltpu


_VMEM_LIMIT = 48 * 1024 * 1024   # within v7x's 64 MiB physical VMEM


def _round_up(x, m):
    return ((x + m - 1) // m) * m


def _row_tile(m, target=256):
    return target if m >= target else _round_up(m, 8)


def _cparams(n_parallel):
    return pltpu.CompilerParams(
        dimension_semantics=("parallel",) * n_parallel,
        vmem_limit_bytes=_VMEM_LIMIT)


def _row(v):
    return v.reshape(1, -1).astype(jnp.float32)


def _ln(x, g, b, eps):
    mean = jnp.mean(x, axis=-1, keepdims=True)
    var = jnp.mean((x - mean) ** 2, axis=-1, keepdims=True)
    return (x - mean) * jax.lax.rsqrt(var + eps) * g + b


# ------------------------- row-tiled matmul + bias ---------------------------

def _matmul_bias_kernel(x_ref, w_ref, b_ref, o_ref, *, act):
    acc = jnp.dot(x_ref[...].astype(jnp.bfloat16), w_ref[...],
                  preferred_element_type=jnp.float32)
    acc = acc + b_ref[...]
    if act == "silu":
        acc = acc * jax.nn.sigmoid(acc)
    o_ref[...] = acc.astype(o_ref.dtype)


def matmul_bias_act(x, w, b, act="none"):
    """y = act(x @ w + b); x (M, K) f32, w (K, N), b (N,). Row-tiled bf16 MXU."""
    M, K = x.shape
    N = w.shape[1]
    tm = _row_tile(M)
    Mp = _round_up(M, tm)
    xp = jnp.pad(x, ((0, Mp - M), (0, 0))) if Mp != M else x
    out = pl.pallas_call(
        functools.partial(_matmul_bias_kernel, act=act),
        out_shape=jax.ShapeDtypeStruct((Mp, N), jnp.float32),
        grid=(Mp // tm,),
        in_specs=[pl.BlockSpec((tm, K), lambda i: (i, 0)),
                  pl.BlockSpec((K, N), lambda i: (0, 0)),
                  pl.BlockSpec((1, N), lambda i: (0, 0))],
        out_specs=pl.BlockSpec((tm, N), lambda i: (i, 0)),
        compiler_params=_cparams(1),
    )(xp.astype(jnp.float32), w.astype(jnp.bfloat16), _row(b))
    return out[:M] if Mp != M else out


# --------------------------- fused FFN (+final LN) ----------------------------

def _ffn_kernel(x_ref, g_ref, b_ref, w1_ref, b1_ref, w2_ref, b2_ref,
                fg_ref, fb_ref, o_ref, *, eps, scale, final_ln):
    x = x_ref[...]
    h = _ln(x, g_ref[...], b_ref[...], eps)
    h1 = jnp.dot(h.astype(jnp.bfloat16), w1_ref[...],
                 preferred_element_type=jnp.float32) + b1_ref[...]
    h1 = h1 * jax.nn.sigmoid(h1)                        # SiLU
    h2 = jnp.dot(h1.astype(jnp.bfloat16), w2_ref[...],
                 preferred_element_type=jnp.float32) + b2_ref[...]
    y = x + scale * h2
    if final_ln:
        y = _ln(y, fg_ref[...], fb_ref[...], eps)
    o_ref[...] = y


def ffn_fused(x2d, p, scale=0.5, final_ln=None):
    """x + scale * FFN(LN(x)), optionally followed by a fused final LayerNorm."""
    M, D = x2d.shape
    F = p["w1"].shape[0]
    tm = _row_tile(M)
    Mp = _round_up(M, tm)
    xp = jnp.pad(x2d, ((0, Mp - M), (0, 0))) if Mp != M else x2d
    if final_ln is None:
        fg = jnp.ones((D,), jnp.float32)
        fb = jnp.zeros((D,), jnp.float32)
    else:
        fg, fb = final_ln
    vec = lambda n: pl.BlockSpec((1, n), lambda i: (0, 0))
    out = pl.pallas_call(
        functools.partial(_ffn_kernel, eps=1e-5, scale=scale,
                          final_ln=final_ln is not None),
        out_shape=jax.ShapeDtypeStruct((Mp, D), jnp.float32),
        grid=(Mp // tm,),
        in_specs=[pl.BlockSpec((tm, D), lambda i: (i, 0)),
                  vec(D), vec(D),
                  pl.BlockSpec((D, F), lambda i: (0, 0)), vec(F),
                  pl.BlockSpec((F, D), lambda i: (0, 0)), vec(D),
                  vec(D), vec(D)],
        out_specs=pl.BlockSpec((tm, D), lambda i: (i, 0)),
        compiler_params=_cparams(1),
    )(xp, _row(p["ln_g"]), _row(p["ln_b"]),
      p["w1"].T.astype(jnp.bfloat16), _row(p["b1"]),
      p["w2"].T.astype(jnp.bfloat16), _row(p["b2"]),
      _row(fg), _row(fb))
    return out[:M] if Mp != M else out


# --------------------- fused LN + MHA + out-proj + residual -------------------

def _mha_kernel(x_ref, m_ref, g_ref, b_ref, wqkv_ref, bqkv_ref, wo_ref, bo_ref,
                o_ref, *, H, eps):
    x = x_ref[0]                                     # (L, D)
    L, D = x.shape
    Dh = D // H
    h = _ln(x, g_ref[...], b_ref[...], eps)
    qkv = jnp.dot(h.astype(jnp.bfloat16), wqkv_ref[...],
                  preferred_element_type=jnp.float32) + bqkv_ref[...]   # (L, 3D)
    m = m_ref[0]                                     # (1, L) additive key mask
    wo = wo_ref[...]                                 # (D, D) f32
    scale = 1.0 / math.sqrt(Dh)
    o = jnp.zeros((L, D), jnp.float32)
    for hd in range(H):
        q = qkv[:, hd * Dh:(hd + 1) * Dh].astype(jnp.bfloat16)
        k = qkv[:, D + hd * Dh:D + (hd + 1) * Dh].astype(jnp.bfloat16)
        v = qkv[:, 2 * D + hd * Dh:2 * D + (hd + 1) * Dh].astype(jnp.bfloat16)
        s = jax.lax.dot_general(q, k, (((1,), (1,)), ((), ())),
                                preferred_element_type=jnp.float32) * scale + m
        s = s - jnp.max(s, axis=-1, keepdims=True)
        p = jnp.exp(s)
        p = p * pl.reciprocal(jnp.sum(p, axis=-1, keepdims=True), approx=True)
        ho = jnp.dot(p.astype(jnp.bfloat16), v,
                     preferred_element_type=jnp.float32)                # (L, Dh)
        # fold the output projection per head: att @ Wo == sum_h att_h @ Wo_h
        wo_h = wo[hd * Dh:(hd + 1) * Dh, :].astype(jnp.bfloat16)
        o = o + jnp.dot(ho.astype(jnp.bfloat16), wo_h,
                        preferred_element_type=jnp.float32)
    o_ref[0] = x + o + bo_ref[...]


def mha_fused(x, mask_add, p, num_heads):
    """x + MHA(LN(x)); x: (B, L, D); mask_add: (B, 1, L) additive key mask."""
    B, L, D = x.shape
    vec = lambda n: pl.BlockSpec((1, n), lambda b: (0, 0))
    xspec = pl.BlockSpec((1, L, D), lambda b: (b, 0, 0))
    return pl.pallas_call(
        functools.partial(_mha_kernel, H=num_heads, eps=1e-5),
        out_shape=jax.ShapeDtypeStruct((B, L, D), jnp.float32),
        grid=(B,),
        in_specs=[xspec,
                  pl.BlockSpec((1, 1, L), lambda b: (b, 0, 0)),
                  vec(D), vec(D),
                  pl.BlockSpec((D, 3 * D), lambda b: (0, 0)), vec(3 * D),
                  pl.BlockSpec((D, D), lambda b: (0, 0)), vec(D)],
        out_specs=xspec,
        compiler_params=_cparams(1),
    )(x, mask_add,
      _row(p["ln_g"]), _row(p["ln_b"]),
      p["in_w"].T.astype(jnp.bfloat16), _row(p["in_b"]),
      p["out_w"].T.astype(jnp.float32), _row(p["out_b"]))


# -------------- fused conv module (LN+pw1+GLU+dwconv+GN+SiLU+pw2) -------------

def _conv_kernel(x_ref, g_ref, b_ref, w1_ref, b1_ref, dw_ref, db_ref,
                 gg_ref, gb_ref, w2_ref, b2_ref, o_ref, *, K, eps):
    x = x_ref[0]                                     # (L, D) channels-last
    L, D = x.shape
    h = _ln(x, g_ref[...], b_ref[...], eps)
    h1 = jnp.dot(h.astype(jnp.bfloat16), w1_ref[...],
                 preferred_element_type=jnp.float32) + b1_ref[...]      # (L, 2D)
    glu = h1[:, :D] * jax.nn.sigmoid(h1[:, D:])      # GLU over the channel dim
    pad = (K - 1) // 2
    zeros = jnp.zeros((pad, D), jnp.float32)
    gp = jnp.concatenate([zeros, glu, zeros], axis=0)                   # (L+2*pad, D)
    dw = dw_ref[...]                                 # (K, D): one lane-dense row/tap
    acc = jnp.zeros((L, D), jnp.float32)
    for k in range(K):                               # depthwise conv: sublane shifts
        acc = acc + dw[k:k + 1, :] * gp[k:k + L, :]
    acc = acc + db_ref[...]
    # GroupNorm with num_groups == num_channels: per-channel stats over time.
    mu = jnp.mean(acc, axis=0, keepdims=True)
    va = jnp.mean((acc - mu) ** 2, axis=0, keepdims=True)
    z = (acc - mu) * jax.lax.rsqrt(va + eps) * gg_ref[...] + gb_ref[...]
    z = z * jax.nn.sigmoid(z)                        # SiLU
    out = jnp.dot(z.astype(jnp.bfloat16), w2_ref[...],
                  preferred_element_type=jnp.float32) + b2_ref[...]
    o_ref[0] = x + out


def conv_fused(x, p):
    """x + ConvModule(x); x: (B, L, D) channels-last."""
    B, L, D = x.shape
    K = p["dw_w"].shape[1]
    # TODO(synk): depthwise padding assumes an odd kernel size (spec uses 5);
    # an even K in PyTorch would shorten the sequence by one frame.
    vec = lambda n: pl.BlockSpec((1, n), lambda b: (0, 0))
    xspec = pl.BlockSpec((1, L, D), lambda b: (b, 0, 0))
    return pl.pallas_call(
        functools.partial(_conv_kernel, K=K, eps=1e-5),
        out_shape=jax.ShapeDtypeStruct((B, L, D), jnp.float32),
        grid=(B,),
        in_specs=[xspec,
                  vec(D), vec(D),
                  pl.BlockSpec((D, 2 * D), lambda b: (0, 0)), vec(2 * D),
                  pl.BlockSpec((K, D), lambda b: (0, 0)), vec(D),
                  vec(D), vec(D),
                  pl.BlockSpec((D, D), lambda b: (0, 0)), vec(D)],
        out_specs=xspec,
        compiler_params=_cparams(1),
    )(x,
      _row(p["ln_g"]), _row(p["ln_b"]),
      p["pw1_w"].T.astype(jnp.bfloat16), _row(p["pw1_b"]),
      p["dw_w"].T.astype(jnp.float32), _row(p["dw_b"]),
      _row(p["gn_g"]), _row(p["gn_b"]),
      p["pw2_w"].T.astype(jnp.bfloat16), _row(p["pw2_b"]))


# ------------------------------ model (JAX glue) ------------------------------

def conformer_layer(x, lengths, p, num_heads=8):
    B, L, D = x.shape
    mask_add = jnp.where(jnp.arange(L)[None, :] < lengths[:, None],
                         0.0, -1e9).astype(jnp.float32).reshape(B, 1, L)
    h = ffn_fused(x.reshape(B * L, D), p["ffn1"], scale=0.5).reshape(B, L, D)
    h = mha_fused(h, mask_add, p["attn"], num_heads)
    h = conv_fused(h, p["conv"])
    h = ffn_fused(h.reshape(B * L, D), p["ffn2"], scale=0.5,
                  final_ln=(p["final_ln_g"], p["final_ln_b"]))
    return h.reshape(B, L, D)


def conformer_model(x_bcl, ssl_bcl, step, lengths, params, num_heads=8):
    B, _, L = x_bcl.shape
    # NCL -> channels-last, hoisted out of the per-layer loop.
    x_flat = jnp.transpose(x_bcl, (0, 2, 1)).reshape(B * L, -1)
    ssl_flat = jnp.transpose(ssl_bcl, (0, 2, 1)).reshape(B * L, -1)
    for p in params["layers"]:
        lat = matmul_bias_act(x_flat, p["lat_w"].T, p["lat_b"])      # (B*L, D)
        ss = matmul_bias_act(ssl_flat, p["ssl_w"].T, p["ssl_b"])     # (B*L, D)
        st = matmul_bias_act(step, p["step_w"].T, p["step_b"])       # (B, D)
        D = lat.shape[1]
        h = (lat + ss).reshape(B, L, D) + st[:, None, :]
        h = conformer_layer(h, lengths, p["conf"], num_heads)
        x_flat = h.reshape(B * L, D)
    y = matmul_bias_act(x_flat, params["out_w"].T, params["out_b"])  # (B*L, lat)
    return jnp.transpose(y.reshape(B, L, -1), (0, 2, 1))             # (B, lat, L)


# ------------------------------ parameter init --------------------------------

class KeyGen:
    def __init__(self, key):
        self.key = key

    def __call__(self):
        self.key, sub = jax.random.split(self.key)
        return sub


def _w(kg, shape, scale=0.02):
    return scale * jax.random.normal(kg(), shape, dtype=jnp.float32)


def init_ffn(kg, d, ffn_dim):
    return dict(ln_g=jnp.ones((d,), jnp.float32), ln_b=jnp.zeros((d,), jnp.float32),
                w1=_w(kg, (ffn_dim, d)), b1=_w(kg, (ffn_dim,)),
                w2=_w(kg, (d, ffn_dim)), b2=_w(kg, (d,)))


def init_conformer_block(kg, d, ffn_dim, ksize):
    ones = jnp.ones((d,), jnp.float32)
    zeros = jnp.zeros((d,), jnp.float32)
    return dict(
        ffn1=init_ffn(kg, d, ffn_dim),
        attn=dict(ln_g=ones, ln_b=zeros,
                  in_w=_w(kg, (3 * d, d)), in_b=_w(kg, (3 * d,)),
                  out_w=_w(kg, (d, d)), out_b=_w(kg, (d,))),
        conv=dict(ln_g=ones, ln_b=zeros,
                  pw1_w=_w(kg, (2 * d, d)), pw1_b=_w(kg, (2 * d,)),
                  dw_w=_w(kg, (d, ksize)), dw_b=_w(kg, (d,)),
                  gn_g=ones, gn_b=zeros,
                  pw2_w=_w(kg, (d, d)), pw2_b=_w(kg, (d,))),
        ffn2=init_ffn(kg, d, ffn_dim),
        final_ln_g=ones, final_ln_b=zeros,
    )


def init_model(kg, d_model, n_layers, latent_dim, ssl_dim, step_dim,
               ffn_dim=1024, ksize=5):
    layers = []
    lat_in = latent_dim
    for _ in range(n_layers):
        layers.append(dict(
            lat_w=_w(kg, (d_model, lat_in)), lat_b=_w(kg, (d_model,)),
            ssl_w=_w(kg, (d_model, ssl_dim)), ssl_b=_w(kg, (d_model,)),
            step_w=_w(kg, (d_model, step_dim)), step_b=_w(kg, (d_model,)),
            conf=init_conformer_block(kg, d_model, ffn_dim, ksize),
        ))
        lat_in = d_model
    return dict(layers=layers,
                out_w=_w(kg, (latent_dim, d_model)),
                out_b=_w(kg, (latent_dim,)))


# ----------------------------------- main --------------------------------------

if __name__ == "__main__":
    # TODO(synk): dropout layers are treated as identity (inference mode).
    B, L = 2, 16
    d_model = 32
    n_layers = 2
    latent_dim, ssl_dim, step_dim = 64, 768, 512

    key = jax.random.PRNGKey(0)
    k1, k2, k3, kp = jax.random.split(key, 4)
    x = jax.random.normal(k1, (B, latent_dim, L), dtype=jnp.float32)
    ssl = jax.random.normal(k2, (B, ssl_dim, L), dtype=jnp.float32)
    diffusion_step = jax.random.normal(k3, (B, step_dim), dtype=jnp.float32)
    lengths = jnp.array([L, L - 4], dtype=jnp.int32)

    params = init_model(KeyGen(kp), d_model, n_layers,
                        latent_dim, ssl_dim, step_dim)

    fwd = jax.jit(lambda a, b, c, d: conformer_model(a, b, c, d, params))
    out = jax.block_until_ready(fwd(x, ssl, diffusion_step, lengths))

    assert out.shape == (B, latent_dim, L), out.shape
    assert bool(jnp.all(jnp.isfinite(out)))
    print("KERNEL_OK")
</pallas_src>

<mosaic_0001>
module attributes {stable_mosaic.version = 11 : i64} {
  func.func @_matmul_bias_kernel(%arg0: i32, %arg1: memref<8x512xf32, #tpu.memory_space<vmem>>, %arg2: memref<512x32xbf16, #tpu.memory_space<vmem>>, %arg3: memref<1x32xf32, #tpu.memory_space<vmem>>, %arg4: memref<8x32xf32, #tpu.memory_space<vmem>>) attributes {dimension_semantics = [#tpu.dimension_semantics<parallel>], iteration_bounds = array<i64: 1>, scalar_prefetch = 0 : i64, scratch_operands = 0 : i64, tpu.core_type = #tpu.core_type<tc>, window_params = [{transform_indices = @transform_0, window_bounds = array<i64: 8, 512>}, {pipeline_mode = #tpu.pipeline_mode<synchronous>, transform_indices = @transform_1, window_bounds = array<i64: 512, 32>}, {pipeline_mode = #tpu.pipeline_mode<synchronous>, transform_indices = @transform_2, window_bounds = array<i64: 1, 32>}, {transform_indices = @transform_3, window_bounds = array<i64: 8, 32>}]} {
    %c0 = arith.constant 0 : index
    %c0_0 = arith.constant 0 : index
    %0 = vector.load %arg1[%c0, %c0_0] : memref<8x512xf32, #tpu.memory_space<vmem>>, vector<8x512xf32>
    %1 = arith.truncf %0 : vector<8x512xf32> to vector<8x512xbf16>
    %c0_1 = arith.constant 0 : index
    %c0_2 = arith.constant 0 : index
    %2 = vector.load %arg2[%c0_1, %c0_2] : memref<512x32xbf16, #tpu.memory_space<vmem>>, vector<512x32xbf16>
    %cst = arith.constant dense<0.000000e+00> : vector<8x32xf32>
    %3 = tpu.matmul %1, %2, %cst {dimension_numbers = #tpu.dot_dimension_numbers<[1], [0], [0], [1], [0, 0, 1, 1], [], []>} : vector<8x512xbf16>, vector<512x32xbf16>, vector<8x32xf32> -> vector<8x32xf32>
    %c0_3 = arith.constant 0 : index
    %c0_4 = arith.constant 0 : index
    %4 = vector.load %arg3[%c0_3, %c0_4] : memref<1x32xf32, #tpu.memory_space<vmem>>, vector<1x32xf32>
    %5 = vector.broadcast %4 : vector<1x32xf32> to vector<8x32xf32>
    %6 = arith.addf %3, %5 : vector<8x32xf32>
    %c0_5 = arith.constant 0 : index
    %c0_6 = arith.constant 0 : index
    %7 = vector.load %arg4[%c0_5, %c0_6] : memref<8x32xf32, #tpu.memory_space<vmem>>, vector<8x32xf32>
    tpu.vector_store %arg4[%c0_5, %c0_6], %6 {strides = array<i32>} : memref<8x32xf32, #tpu.memory_space<vmem>>, vector<8x32xf32>,
    return
  }
  func.func @transform_0(%arg0: i32) -> (i32, i32) {
    %c0_i32 = arith.constant 0 : i32
    %c0_i32_0 = arith.constant 0 : i32
    return %arg0, %c0_i32 : i32, i32
  }
  func.func @transform_1(%arg0: i32) -> (i32, i32) {
    %c0_i32 = arith.constant 0 : i32
    %c0_i32_0 = arith.constant 0 : i32
    %c0_i32_1 = arith.constant 0 : i32
    return %c0_i32, %c0_i32_0 : i32, i32
  }
  func.func @transform_2(%arg0: i32) -> (i32, i32) {
    %c0_i32 = arith.constant 0 : i32
    %c0_i32_0 = arith.constant 0 : i32
    %c0_i32_1 = arith.constant 0 : i32
    return %c0_i32, %c0_i32_0 : i32, i32
  }
  func.func @transform_3(%arg0: i32) -> (i32, i32) {
    %c0_i32 = arith.constant 0 : i32
    %c0_i32_0 = arith.constant 0 : i32
    return %arg0, %c0_i32 : i32, i32
  }
}

module attributes {stable_mosaic.version = 11 : i64} {
  func.func @_matmul_bias_kernel(%arg0: i32, %arg1: memref<32x64xf32, #tpu.memory_space<vmem>>, %arg2: memref<64x32xbf16, #tpu.memory_space<vmem>>, %arg3: memref<1x32xf32, #tpu.memory_space<vmem>>, %arg4: memref<32x32xf32, #tpu.memory_space<vmem>>) attributes {dimension_semantics = [#tpu.dimension_semantics<parallel>], iteration_bounds = array<i64: 1>, scalar_prefetch = 0 : i64, scratch_operands = 0 : i64, tpu.core_type = #tpu.core_type<tc>, window_params = [{transform_indices = @transform_0, window_bounds = array<i64: 32, 64>}, {pipeline_mode = #tpu.pipeline_mode<synchronous>, transform_indices = @transform_1, window_bounds = array<i64: 64, 32>}, {pipeline_mode = #tpu.pipeline_mode<synchronous>, transform_indices = @transform_2, window_bounds = array<i64: 1, 32>}, {transform_indices = @transform_3, window_bounds = array<i64: 32, 32>}]} {
    %c0 = arith.constant 0 : index
    %c0_0 = arith.constant 0 : index
    %0 = vector.load %arg1[%c0, %c0_0] : memref<32x64xf32, #tpu.memory_space<vmem>>, vector<32x64xf32>
    %1 = arith.truncf %0 : vector<32x64xf32> to vector<32x64xbf16>
    %c0_1 = arith.constant 0 : index
    %c0_2 = arith.constant 0 : index
    %2 = vector.load %arg2[%c0_1, %c0_2] : memref<64x32xbf16, #tpu.memory_space<vmem>>, vector<64x32xbf16>
    %cst = arith.constant dense<0.000000e+00> : vector<32x32xf32>
    %3 = tpu.matmul %1, %2, %cst {dimension_numbers = #tpu.dot_dimension_numbers<[1], [0], [0], [1], [0, 0, 1, 1], [], []>} : vector<32x64xbf16>, vector<64x32xbf16>, vector<32x32xf32> -> vector<32x32xf32>
    %c0_3 = arith.constant 0 : index
    %c0_4 = arith.constant 0 : index
    %4 = vector.load %arg3[%c0_3, %c0_4] : memref<1x32xf32, #tpu.memory_space<vmem>>, vector<1x32xf32>
    %5 = vector.broadcast %4 : vector<1x32xf32> to vector<32x32xf32>
    %6 = arith.addf %3, %5 : vector<32x32xf32>
    %c0_5 = arith.constant 0 : index
    %c0_6 = arith.constant 0 : index
    %7 = vector.load %arg4[%c0_5, %c0_6] : memref<32x32xf32, #tpu.memory_space<vmem>>, vector<32x32xf32>
    tpu.vector_store %arg4[%c0_5, %c0_6], %6 {strides = array<i32>} : memref<32x32xf32, #tpu.memory_space<vmem>>, vector<32x32xf32>,
    return
  }
  func.func @transform_0(%arg0: i32) -> (i32, i32) {
    %c0_i32 = arith.constant 0 : i32
    %c0_i32_0 = arith.constant 0 : i32
    return %arg0, %c0_i32 : i32, i32
  }
  func.func @transform_1(%arg0: i32) -> (i32, i32) {
    %c0_i32 = arith.constant 0 : i32
    %c0_i32_0 = arith.constant 0 : i32
    %c0_i32_1 = arith.constant 0 : i32
    return %c0_i32, %c0_i32_0 : i32, i32
  }
  func.func @transform_2(%arg0: i32) -> (i32, i32) {
    %c0_i32 = arith.constant 0 : i32
    %c0_i32_0 = arith.constant 0 : i32
    %c0_i32_1 = arith.constant 0 : i32
    return %c0_i32, %c0_i32_0 : i32, i32
  }
  func.func @transform_3(%arg0: i32) -> (i32, i32) {
    %c0_i32 = arith.constant 0 : i32
    %c0_i32_0 = arith.constant 0 : i32
    return %arg0, %c0_i32 : i32, i32
  }
}

module attributes {stable_mosaic.version = 11 : i64} {
  func.func @_matmul_bias_kernel(%arg0: i32, %arg1: memref<32x768xf32, #tpu.memory_space<vmem>>, %arg2: memref<768x32xbf16, #tpu.memory_space<vmem>>, %arg3: memref<1x32xf32, #tpu.memory_space<vmem>>, %arg4: memref<32x32xf32, #tpu.memory_space<vmem>>) attributes {dimension_semantics = [#tpu.dimension_semantics<parallel>], iteration_bounds = array<i64: 1>, scalar_prefetch = 0 : i64, scratch_operands = 0 : i64, tpu.core_type = #tpu.core_type<tc>, window_params = [{transform_indices = @transform_0, window_bounds = array<i64: 32, 768>}, {pipeline_mode = #tpu.pipeline_mode<synchronous>, transform_indices = @transform_1, window_bounds = array<i64: 768, 32>}, {pipeline_mode = #tpu.pipeline_mode<synchronous>, transform_indices = @transform_2, window_bounds = array<i64: 1, 32>}, {transform_indices = @transform_3, window_bounds = array<i64: 32, 32>}]} {
    %c0 = arith.constant 0 : index
    %c0_0 = arith.constant 0 : index
    %0 = vector.load %arg1[%c0, %c0_0] : memref<32x768xf32, #tpu.memory_space<vmem>>, vector<32x768xf32>
    %1 = arith.truncf %0 : vector<32x768xf32> to vector<32x768xbf16>
    %c0_1 = arith.constant 0 : index
    %c0_2 = arith.constant 0 : index
    %2 = vector.load %arg2[%c0_1, %c0_2] : memref<768x32xbf16, #tpu.memory_space<vmem>>, vector<768x32xbf16>
    %cst = arith.constant dense<0.000000e+00> : vector<32x32xf32>
    %3 = tpu.matmul %1, %2, %cst {dimension_numbers = #tpu.dot_dimension_numbers<[1], [0], [0], [1], [0, 0, 1, 1], [], []>} : vector<32x768xbf16>, vector<768x32xbf16>, vector<32x32xf32> -> vector<32x32xf32>
    %c0_3 = arith.constant 0 : index
    %c0_4 = arith.constant 0 : index
    %4 = vector.load %arg3[%c0_3, %c0_4] : memref<1x32xf32, #tpu.memory_space<vmem>>, vector<1x32xf32>
    %5 = vector.broadcast %4 : vector<1x32xf32> to vector<32x32xf32>
    %6 = arith.addf %3, %5 : vector<32x32xf32>
    %c0_5 = arith.constant 0 : index
    %c0_6 = arith.constant 0 : index
    %7 = vector.load %arg4[%c0_5, %c0_6] : memref<32x32xf32, #tpu.memory_space<vmem>>, vector<32x32xf32>
    tpu.vector_store %arg4[%c0_5, %c0_6], %6 {strides = array<i32>} : memref<32x32xf32, #tpu.memory_space<vmem>>, vector<32x32xf32>,
    return
  }
  func.func @transform_0(%arg0: i32) -> (i32, i32) {
    %c0_i32 = arith.constant 0 : i32
    %c0_i32_0 = arith.constant 0 : i32
    return %arg0, %c0_i32 : i32, i32
  }
  func.func @transform_1(%arg0: i32) -> (i32, i32) {
    %c0_i32 = arith.constant 0 : i32
    %c0_i32_0 = arith.constant 0 : i32
    %c0_i32_1 = arith.constant 0 : i32
    return %c0_i32, %c0_i32_0 : i32, i32
  }
  func.func @transform_2(%arg0: i32) -> (i32, i32) {
    %c0_i32 = arith.constant 0 : i32
    %c0_i32_0 = arith.constant 0 : i32
    %c0_i32_1 = arith.constant 0 : i32
    return %c0_i32, %c0_i32_0 : i32, i32
  }
  func.func @transform_3(%arg0: i32) -> (i32, i32) {
    %c0_i32 = arith.constant 0 : i32
    %c0_i32_0 = arith.constant 0 : i32
    return %arg0, %c0_i32 : i32, i32
  }
}

module attributes {stable_mosaic.version = 11 : i64} {
  func.func @_ffn_kernel(%arg0: i32, %arg1: memref<32x32xf32, #tpu.memory_space<vmem>>, %arg2: memref<1x32xf32, #tpu.memory_space<vmem>>, %arg3: memref<1x32xf32, #tpu.memory_space<vmem>>, %arg4: memref<32x1024xbf16, #tpu.memory_space<vmem>>, %arg5: memref<1x1024xf32, #tpu.memory_space<vmem>>, %arg6: memref<1024x32xbf16, #tpu.memory_space<vmem>>, %arg7: memref<1x32xf32, #tpu.memory_space<vmem>>, %arg8: memref<1x32xf32, #tpu.memory_space<vmem>>, %arg9: memref<1x32xf32, #tpu.memory_space<vmem>>, %arg10: memref<32x32xf32, #tpu.memory_space<vmem>>) attributes {dimension_semantics = [#tpu.dimension_semantics<parallel>], iteration_bounds = array<i64: 1>, scalar_prefetch = 0 : i64, scratch_operands = 0 : i64, tpu.core_type = #tpu.core_type<tc>, window_params = [{transform_indices = @transform_0, window_bounds = array<i64: 32, 32>}, {pipeline_mode = #tpu.pipeline_mode<synchronous>, transform_indices = @transform_1, window_bounds = array<i64: 1, 32>}, {pipeline_mode = #tpu.pipeline_mode<synchronous>, transform_indices = @transform_2, window_bounds = array<i64: 1, 32>}, {pipeline_mode = #tpu.pipeline_mode<synchronous>, transform_indices = @transform_3, window_bounds = array<i64: 32, 1024>}, {pipeline_mode = #tpu.pipeline_mode<synchronous>, transform_indices = @transform_4, window_bounds = array<i64: 1, 1024>}, {pipeline_mode = #tpu.pipeline_mode<synchronous>, transform_indices = @transform_5, window_bounds = array<i64: 1024, 32>}, {pipeline_mode = #tpu.pipeline_mode<synchronous>, transform_indices = @transform_6, window_bounds = array<i64: 1, 32>}, {pipeline_mode = #tpu.pipeline_mode<synchronous>, transform_indices = @transform_7, window_bounds = array<i64: 1, 32>}, {pipeline_mode = #tpu.pipeline_mode<synchronous>, transform_indices = @transform_8, window_bounds = array<i64: 1, 32>}, {transform_indices = @transform_9, window_bounds = array<i64: 32, 32>}]} {
    %c0 = arith.constant 0 : index
    %c0_0 = arith.constant 0 : index
    %0 = vector.load %arg1[%c0, %c0_0] : memref<32x32xf32, #tpu.memory_space<vmem>>, vector<32x32xf32>
    %c0_1 = arith.constant 0 : index
    %c0_2 = arith.constant 0 : index
    %1 = vector.load %arg2[%c0_1, %c0_2] : memref<1x32xf32, #tpu.memory_space<vmem>>, vector<1x32xf32>
    %c0_3 = arith.constant 0 : index
    %c0_4 = arith.constant 0 : index
    %2 = vector.load %arg3[%c0_3, %c0_4] : memref<1x32xf32, #tpu.memory_space<vmem>>, vector<1x32xf32>
    %cst = arith.constant dense<0.000000e+00> : vector<32xf32>
    %3 = vector.multi_reduction <add>, %0, %cst [1] : vector<32x32xf32> to vector<32xf32>
    %4 = vector.shape_cast %3 : vector<32xf32> to vector<32x1xf32>
    %cst_5 = arith.constant 3.200000e+01 : f32
    %5 = vector.broadcast %cst_5 : f32 to vector<32x1xf32>
    %6 = arith.divf %4, %5 : vector<32x1xf32>
    %7 = vector.broadcast %6 : vector<32x1xf32> to vector<32x32xf32>
    %8 = arith.subf %0, %7 : vector<32x32xf32>
    %9 = arith.mulf %8, %8 : vector<32x32xf32>
    %cst_6 = arith.constant dense<0.000000e+00> : vector<32xf32>
    %10 = vector.multi_reduction <add>, %9, %cst_6 [1] : vector<32x32xf32> to vector<32xf32>
    %11 = vector.shape_cast %10 : vector<32xf32> to vector<32x1xf32>
    %cst_7 = arith.constant 3.200000e+01 : f32
    %12 = vector.broadcast %cst_7 : f32 to vector<32x1xf32>
    %13 = arith.divf %11, %12 : vector<32x1xf32>
    %14 = vector.broadcast %6 : vector<32x1xf32> to vector<32x32xf32>
    %15 = arith.subf %0, %14 : vector<32x32xf32>
    %cst_8 = arith.constant 9.99999974E-6 : f32
    %16 = vector.broadcast %cst_8 : f32 to vector<32x1xf32>
    %17 = arith.addf %13, %16 : vector<32x1xf32>
    %18 = math.rsqrt %17 : vector<32x1xf32>
    %19 = vector.broadcast %18 : vector<32x1xf32> to vector<32x32xf32>
    %20 = arith.mulf %15, %19 : vector<32x32xf32>
    %21 = vector.broadcast %1 : vector<1x32xf32> to vector<32x32xf32>
    %22 = arith.mulf %20, %21 : vector<32x32xf32>
    %23 = vector.broadcast %2 : vector<1x32xf32> to vector<32x32xf32>
    %24 = arith.addf %22, %23 : vector<32x32xf32>
    %25 = arith.truncf %24 : vector<32x32xf32> to vector<32x32xbf16>
    %c0_9 = arith.constant 0 : index
    %c0_10 = arith.constant 0 : index
    %26 = vector.load %arg4[%c0_9, %c0_10] : memref<32x1024xbf16, #tpu.memory_space<vmem>>, vector<32x1024xbf16>
    %cst_11 = arith.constant dense<0.000000e+00> : vector<32x1024xf32>
    %27 = tpu.matmul %25, %26, %cst_11 {dimension_numbers = #tpu.dot_dimension_numbers<[1], [0], [0], [1], [0, 0, 1, 1], [], []>} : vector<32x32xbf16>, vector<32x1024xbf16>, vector<32x1024xf32> -> vector<32x1024xf32>
    %c0_12 = arith.constant 0 : index
    %c0_13 = arith.constant 0 : index
    %28 = vector.load %arg5[%c0_12, %c0_13] : memref<1x1024xf32, #tpu.memory_space<vmem>>, vector<1x1024xf32>
    %29 = vector.broadcast %28 : vector<1x1024xf32> to vector<32x1024xf32>
    %30 = arith.addf %27, %29 : vector<32x1024xf32>
    %31 = arith.negf %30 : vector<32x1024xf32>
    %32 = math.exp %31 : vector<32x1024xf32>
    %cst_14 = arith.constant 1.000000e+00 : f32
    %33 = vector.broadcast %cst_14 : f32 to vector<32x1024xf32>
    %34 = arith.addf %33, %32 : vector<32x1024xf32>
    %35 = arith.divf %33, %34 : vector<32x1024xf32>
    %36 = arith.mulf %30, %35 : vector<32x1024xf32>
    %37 = arith.truncf %36 : vector<32x1024xf32> to vector<32x1024xbf16>
    %c0_15 = arith.constant 0 : index
    %c0_16 = arith.constant 0 : index
    %38 = vector.load %arg6[%c0_15, %c0_16] : memref<1024x32xbf16, #tpu.memory_space<vmem>>, vector<1024x32xbf16>
    %cst_17 = arith.constant dense<0.000000e+00> : vector<32x32xf32>
    %39 = tpu.matmul %37, %38, %cst_17 {dimension_numbers = #tpu.dot_dimension_numbers<[1], [0], [0], [1], [0, 0, 1, 1], [], []>} : vector<32x1024xbf16>, vector<1024x32xbf16>, vector<32x32xf32> -> vector<32x32xf32>
    %c0_18 = arith.constant 0 : index
    %c0_19 = arith.constant 0 : index
    %40 = vector.load %arg7[%c0_18, %c0_19] : memref<1x32xf32, #tpu.memory_space<vmem>>, vector<1x32xf32>
    %41 = vector.broadcast %40 : vector<1x32xf32> to vector<32x32xf32>
    %42 = arith.addf %39, %41 : vector<32x32xf32>
    %cst_20 = arith.constant 5.000000e-01 : f32
    %43 = vector.broadcast %cst_20 : f32 to vector<32x32xf32>
    %44 = arith.mulf %43, %42 : vector<32x32xf32>
    %45 = arith.addf %0, %44 : vector<32x32xf32>
    %c0_21 = arith.constant 0 : index
    %c0_22 = arith.constant 0 : index
    %46 = vector.load %arg10[%c0_21, %c0_22] : memref<32x32xf32, #tpu.memory_space<vmem>>, vector<32x32xf32>
    tpu.vector_store %arg10[%c0_21, %c0_22], %45 {strides = array<i32>} : memref<32x32xf32, #tpu.memory_space<vmem>>, vector<32x32xf32>,
    return
  }
  func.func @transform_0(%arg0: i32) -> (i32, i32) {
    %c0_i32 = arith.constant 0 : i32
    %c0_i32_0 = arith.constant 0 : i32
    return %arg0, %c0_i32 : i32, i32
  }
  func.func @transform_1(%arg0: i32) -> (i32, i32) {
    %c0_i32 = arith.constant 0 : i32
    %c0_i32_0 = arith.constant 0 : i32
    %c0_i32_1 = arith.constant 0 : i32
    return %c0_i32, %c0_i32_0 : i32, i32
  }
  func.func @transform_2(%arg0: i32) -> (i32, i32) {
    %c0_i32 = arith.constant 0 : i32
    %c0_i32_0 = arith.constant 0 : i32
    %c0_i32_1 = arith.constant 0 : i32
    return %c0_i32, %c0_i32_0 : i32, i32
  }
  func.func @transform_3(%arg0: i32) -> (i32, i32) {
    %c0_i32 = arith.constant 0 : i32
    %c0_i32_0 = arith.constant 0 : i32
    %c0_i32_1 = arith.constant 0 : i32
    return %c0_i32, %c0_i32_0 : i32, i32
  }
  func.func @transform_4(%arg0: i32) -> (i32, i32) {
    %c0_i32 = arith.constant 0 : i32
    %c0_i32_0 = arith.constant 0 : i32
    %c0_i32_1 = arith.constant 0 : i32
    return %c0_i32, %c0_i32_0 : i32, i32
  }
  func.func @transform_5(%arg0: i32) -> (i32, i32) {
    %c0_i32 = arith.constant 0 : i32
    %c0_i32_0 = arith.constant 0 : i32
    %c0_i32_1 = arith.constant 0 : i32
    return %c0_i32, %c0_i32_0 : i32, i32
  }
  func.func @transform_6(%arg0: i32) -> (i32, i32) {
    %c0_i32 = arith.constant 0 : i32
    %c0_i32_0 = arith.constant 0 : i32
    %c0_i32_1 = arith.constant 0 : i32
    return %c0_i32, %c0_i32_0 : i32, i32
  }
  func.func @transform_7(%arg0: i32) -> (i32, i32) {
    %c0_i32 = arith.constant 0 : i32
    %c0_i32_0 = arith.constant 0 : i32
    %c0_i32_1 = arith.constant 0 : i32
    return %c0_i32, %c0_i32_0 : i32, i32
  }
  func.func @transform_8(%arg0: i32) -> (i32, i32) {
    %c0_i32 = arith.constant 0 : i32
    %c0_i32_0 = arith.constant 0 : i32
    %c0_i32_1 = arith.constant 0 : i32
    return %c0_i32, %c0_i32_0 : i32, i32
  }
  func.func @transform_9(%arg0: i32) -> (i32, i32) {
    %c0_i32 = arith.constant 0 : i32
    %c0_i32_0 = arith.constant 0 : i32
    return %arg0, %c0_i32 : i32, i32
  }
}

module attributes {stable_mosaic.version = 11 : i64} {
  func.func @_mha_kernel(%arg0: i32, %arg1: memref<1x16x32xf32, #tpu.memory_space<vmem>>, %arg2: memref<1x1x16xf32, #tpu.memory_space<vmem>>, %arg3: memref<1x32xf32, #tpu.memory_space<vmem>>, %arg4: memref<1x32xf32, #tpu.memory_space<vmem>>, %arg5: memref<32x96xbf16, #tpu.memory_space<vmem>>, %arg6: memref<1x96xf32, #tpu.memory_space<vmem>>, %arg7: memref<32x32xf32, #tpu.memory_space<vmem>>, %arg8: memref<1x32xf32, #tpu.memory_space<vmem>>, %arg9: memref<1x16x32xf32, #tpu.memory_space<vmem>>) attributes {dimension_semantics = [#tpu.dimension_semantics<parallel>], iteration_bounds = array<i64: 2>, scalar_prefetch = 0 : i64, scratch_operands = 0 : i64, tpu.core_type = #tpu.core_type<tc>, window_params = [{transform_indices = @transform_0, window_bounds = array<i64: 1, 16, 32>}, {transform_indices = @transform_1, window_bounds = array<i64: 1, 1, 16>}, {pipeline_mode = #tpu.pipeline_mode<synchronous>, transform_indices = @transform_2, window_bounds = array<i64: 1, 32>}, {pipeline_mode = #tpu.pipeline_mode<synchronous>, transform_indices = @transform_3, window_bounds = array<i64: 1, 32>}, {pipeline_mode = #tpu.pipeline_mode<synchronous>, transform_indices = @transform_4, window_bounds = array<i64: 32, 96>}, {pipeline_mode = #tpu.pipeline_mode<synchronous>, transform_indices = @transform_5, window_bounds = array<i64: 1, 96>}, {pipeline_mode = #tpu.pipeline_mode<synchronous>, transform_indices = @transform_6, window_bounds = array<i64: 32, 32>}, {pipeline_mode = #tpu.pipeline_mode<synchronous>, transform_indices = @transform_7, window_bounds = array<i64: 1, 32>}, {transform_indices = @transform_8, window_bounds = array<i64: 1, 16, 32>}]} {
    %c0 = arith.constant 0 : index
    %c0_0 = arith.constant 0 : index
    %c0_1 = arith.constant 0 : index
    %0 = vector.load %arg1[%c0, %c0_0, %c0_1] : memref<1x16x32xf32, #tpu.memory_space<vmem>>, vector<1x16x32xf32>
    %1 = vector.shape_cast %0 : vector<1x16x32xf32> to vector<16x32xf32>
    %c0_2 = arith.constant 0 : index
    %c0_3 = arith.constant 0 : index
    %2 = vector.load %arg3[%c0_2, %c0_3] : memref<1x32xf32, #tpu.memory_space<vmem>>, vector<1x32xf32>
    %c0_4 = arith.constant 0 : index
    %c0_5 = arith.constant 0 : index
    %3 = vector.load %arg4[%c0_4, %c0_5] : memref<1x32xf32, #tpu.memory_space<vmem>>, vector<1x32xf32>
    %cst = arith.constant dense<0.000000e+00> : vector<16xf32>
    %4 = vector.multi_reduction <add>, %1, %cst [1] : vector<16x32xf32> to vector<16xf32>
    %5 = vector.shape_cast %4 : vector<16xf32> to vector<16x1xf32>
    %cst_6 = arith.constant 3.200000e+01 : f32
    %6 = vector.broadcast %cst_6 : f32 to vector<16x1xf32>
    %7 = arith.divf %5, %6 : vector<16x1xf32>
    %8 = vector.broadcast %7 : vector<16x1xf32> to vector<16x32xf32>
    %9 = arith.subf %1, %8 : vector<16x32xf32>
    %10 = arith.mulf %9, %9 : vector<16x32xf32>
    %cst_7 = arith.constant dense<0.000000e+00> : vector<16xf32>
    %11 = vector.multi_reduction <add>, %10, %cst_7 [1] : vector<16x32xf32> to vector<16xf32>
    %12 = vector.shape_cast %11 : vector<16xf32> to vector<16x1xf32>
    %cst_8 = arith.constant 3.200000e+01 : f32
    %13 = vector.broadcast %cst_8 : f32 to vector<16x1xf32>
    %14 = arith.divf %12, %13 : vector<16x1xf32>
    %15 = vector.broadcast %7 : vector<16x1xf32> to vector<16x32xf32>
    %16 = arith.subf %1, %15 : vector<16x32xf32>
    %cst_9 = arith.constant 9.99999974E-6 : f32
    %17 = vector.broadcast %cst_9 : f32 to vector<16x1xf32>
    %18 = arith.addf %14, %17 : vector<16x1xf32>
    %19 = math.rsqrt %18 : vector<16x1xf32>
    %20 = vector.broadcast %19 : vector<16x1xf32> to vector<16x32xf32>
    %21 = arith.mulf %16, %20 : vector<16x32xf32>
    %22 = vector.broadcast %2 : vector<1x32xf32> to vector<16x32xf32>
    %23 = arith.mulf %21, %22 : vector<16x32xf32>
    %24 = vector.broadcast %3 : vector<1x32xf32> to vector<16x32xf32>
    %25 = arith.addf %23, %24 : vector<16x32xf32>
    %26 = arith.truncf %25 : vector<16x32xf32> to vector<16x32xbf16>
    %c0_10 = arith.constant 0 : index
    %c0_11 = arith.constant 0 : index
    %27 = vector.load %arg5[%c0_10, %c0_11] : memref<32x96xbf16, #tpu.memory_space<vmem>>, vector<32x96xbf16>
    %cst_12 = arith.constant dense<0.000000e+00> : vector<16x96xf32>
    %28 = tpu.matmul %26, %27, %cst_12 {dimension_numbers = #tpu.dot_dimension_numbers<[1], [0], [0], [1], [0, 0, 1, 1], [], []>} : vector<16x32xbf16>, vector<32x96xbf16>, vector<16x96xf32> -> vector<16x96xf32>
    %c0_13 = arith.constant 0 : index
    %c0_14 = arith.constant 0 : index
    %29 = vector.load %arg6[%c0_13, %c0_14] : memref<1x96xf32, #tpu.memory_space<vmem>>, vector<1x96xf32>
    %30 = vector.broadcast %29 : vector<1x96xf32> to vector<16x96xf32>
    %31 = arith.addf %28, %30 : vector<16x96xf32>
    %c0_15 = arith.constant 0 : index
    %c0_16 = arith.constant 0 : index
    %c0_17 = arith.constant 0 : index
    %32 = vector.load %arg2[%c0_15, %c0_16, %c0_17] : memref<1x1x16xf32, #tpu.memory_space<vmem>>, vector<1x1x16xf32>
    %33 = vector.shape_cast %32 : vector<1x1x16xf32> to vector<1x16xf32>
    %c0_18 = arith.constant 0 : index
    %c0_19 = arith.constant 0 : index
    %34 = vector.load %arg7[%c0_18, %c0_19] : memref<32x32xf32, #tpu.memory_space<vmem>>, vector<32x32xf32>
    %cst_20 = arith.constant 0.000000e+00 : f32
    %35 = vector.broadcast %cst_20 : f32 to vector<16x32xf32>
    %36 = vector.extract_strided_slice %31 {offsets = [0, 0], sizes = [16, 4], strides = [1, 1]} : vector<16x96xf32> to vector<16x4xf32>
    %37 = arith.truncf %36 : vector<16x4xf32> to vector<16x4xbf16>
    %38 = vector.extract_strided_slice %31 {offsets = [0, 32], sizes = [16, 4], strides = [1, 1]} : vector<16x96xf32> to vector<16x4xf32>
    %39 = arith.truncf %38 : vector<16x4xf32> to vector<16x4xbf16>
    %40 = vector.extract_strided_slice %31 {offsets = [0, 64], sizes = [16, 4], strides = [1, 1]} : vector<16x96xf32> to vector<16x4xf32>
    %41 = arith.truncf %40 : vector<16x4xf32> to vector<16x4xbf16>
    %cst_21 = arith.constant dense<0.000000e+00> : vector<16x16xf32>
    %42 = tpu.matmul %37, %39, %cst_21 {dimension_numbers = #tpu.dot_dimension_numbers<[1], [1], [0], [0], [0, 0, 1, 0], [], []>} : vector<16x4xbf16>, vector<16x4xbf16>, vector<16x16xf32> -> vector<16x16xf32>
    %cst_22 = arith.constant 5.000000e-01 : f32
    %43 = vector.broadcast %cst_22 : f32 to vector<16x16xf32>
    %44 = arith.mulf %42, %43 : vector<16x16xf32>
    %45 = vector.broadcast %33 : vector<1x16xf32> to vector<16x16xf32>
    %46 = arith.addf %44, %45 : vector<16x16xf32>
    %cst_23 = arith.constant dense<0xFF800000> : vector<16xf32>
    %47 = vector.multi_reduction <maximumf>, %46, %cst_23 [1] : vector<16x16xf32> to vector<16xf32>
    %48 = vector.shape_cast %47 : vector<16xf32> to vector<16x1xf32>
    %49 = vector.broadcast %48 : vector<16x1xf32> to vector<16x16xf32>
    %50 = arith.subf %46, %49 : vector<16x16xf32>
    %51 = math.exp %50 : vector<16x16xf32>
    %cst_24 = arith.constant dense<0.000000e+00> : vector<16xf32>
    %52 = vector.multi_reduction <add>, %51, %cst_24 [1] : vector<16x16xf32> to vector<16xf32>
    %53 = vector.shape_cast %52 : vector<16xf32> to vector<16x1xf32>
    %54 = tpu.reciprocal %53 {approx = true} : vector<16x1xf32> -> vector<16x1xf32>
    %55 = vector.broadcast %54 : vector<16x1xf32> to vector<16x16xf32>
    %56 = arith.mulf %51, %55 : vector<16x16xf32>
    %57 = arith.truncf %56 : vector<16x16xf32> to vector<16x16xbf16>
    %cst_25 = arith.constant dense<0.000000e+00> : vector<16x4xf32>
    %58 = tpu.matmul %57, %41, %cst_25 {dimension_numbers = #tpu.dot_dimension_numbers<[1], [0], [0], [1], [0, 0, 1, 1], [], []>} : vector<16x16xbf16>, vector<16x4xbf16>, vector<16x4xf32> -> vector<16x4xf32>
    %59 = vector.extract_strided_slice %34 {offsets = [0, 0], sizes = [4, 32], strides = [1, 1]} : vector<32x32xf32> to vector<4x32xf32>
    %60 = arith.truncf %59 : vector<4x32xf32> to vector<4x32xbf16>
    %61 = arith.truncf %58 : vector<16x4xf32> to vector<16x4xbf16>
    %cst_26 = arith.constant dense<0.000000e+00> : vector<16x32xf32>
    %62 = tpu.matmul %61, %60, %cst_26 {dimension_numbers = #tpu.dot_dimension_numbers<[1], [0], [0], [1], [0, 0, 1, 1], [], []>} : vector<16x4xbf16>, vector<4x32xbf16>, vector<16x32xf32> -> vector<16x32xf32>
    %63 = arith.addf %35, %62 : vector<16x32xf32>
    %64 = vector.extract_strided_slice %31 {offsets = [0, 4], sizes = [16, 4], strides = [1, 1]} : vector<16x96xf32> to vector<16x4xf32>
    %65 = arith.truncf %64 : vector<16x4xf32> to vector<16x4xbf16>
    %66 = vector.extract_strided_slice %31 {offsets = [0, 36], sizes = [16, 4], strides = [1, 1]} : vector<16x96xf32> to vector<16x4xf32>
    %67 = arith.truncf %66 : vector<16x4xf32> to vector<16x4xbf16>
    %68 = vector.extract_strided_slice %31 {offsets = [0, 68], sizes = [16, 4], strides = [1, 1]} : vector<16x96xf32> to vector<16x4xf32>
    %69 = arith.truncf %68 : vector<16x4xf32> to vector<16x4xbf16>
    %cst_27 = arith.constant dense<0.000000e+00> : vector<16x16xf32>
    %70 = tpu.matmul %65, %67, %cst_27 {dimension_numbers = #tpu.dot_dimension_numbers<[1], [1], [0], [0], [0, 0, 1, 0], [], []>} : vector<16x4xbf16>, vector<16x4xbf16>, vector<16x16xf32> -> vector<16x16xf32>
    %cst_28 = arith.constant 5.000000e-01 : f32
    %71 = vector.broadcast %cst_28 : f32 to vector<16x16xf32>
    %72 = arith.mulf %70, %71 : vector<16x16xf32>
    %73 = vector.broadcast %33 : vector<1x16xf32> to vector<16x16xf32>
    %74 = arith.addf %72, %73 : vector<16x16xf32>
    %cst_29 = arith.constant dense<0xFF800000> : vector<16xf32>
    %75 = vector.multi_reduction <maximumf>, %74, %cst_29 [1] : vector<16x16xf32> to vector<16xf32>
    %76 = vector.shape_cast %75 : vector<16xf32> to vector<16x1xf32>
    %77 = vector.broadcast %76 : vector<16x1xf32> to vector<16x16xf32>
    %78 = arith.subf %74, %77 : vector<16x16xf32>
    %79 = math.exp %78 : vector<16x16xf32>
    %cst_30 = arith.constant dense<0.000000e+00> : vector<16xf32>
    %80 = vector.multi_reduction <add>, %79, %cst_30 [1] : vector<16x16xf32> to vector<16xf32>
    %81 = vector.shape_cast %80 : vector<16xf32> to vector<16x1xf32>
    %82 = tpu.reciprocal %81 {approx = true} : vector<16x1xf32> -> vector<16x1xf32>
    %83 = vector.broadcast %82 : vector<16x1xf32> to vector<16x16xf32>
    %84 = arith.mulf %79, %83 : vector<16x16xf32>
    %85 = arith.truncf %84 : vector<16x16xf32> to vector<16x16xbf16>
    %cst_31 = arith.constant dense<0.000000e+00> : vector<16x4xf32>
    %86 = tpu.matmul %85, %69, %cst_31 {dimension_numbers = #tpu.dot_dimension_numbers<[1], [0], [0], [1], [0, 0, 1, 1], [], []>} : vector<16x16xbf16>, vector<16x4xbf16>, vector<16x4xf32> -> vector<16x4xf32>
    %87 = vector.extract_strided_slice %34 {offsets = [4, 0], sizes = [4, 32], strides = [1, 1]} : vector<32x32xf32> to vector<4x32xf32>
    %88 = arith.truncf %87 : vector<4x32xf32> to vector<4x32xbf16>
    %89 = arith.truncf %86 : vector<16x4xf32> to vector<16x4xbf16>
    %cst_32 = arith.constant dense<0.000000e+00> : vector<16x32xf32>
    %90 = tpu.matmul %89, %88, %cst_32 {dimension_numbers = #tpu.dot_dimension_numbers<[1], [0], [0], [1], [0, 0, 1, 1], [], []>} : vector<16x4xbf16>, vector<4x32xbf16>, vector<16x32xf32> -> vector<16x32xf32>
    %91 = arith.addf %63, %90 : vector<16x32xf32>
    %92 = vector.extract_strided_slice %31 {offsets = [0, 8], sizes = [16, 4], strides = [1, 1]} : vector<16x96xf32> to vector<16x4xf32>
    %93 = arith.truncf %92 : vector<16x4xf32> to vector<16x4xbf16>
    %94 = vector.extract_strided_slice %31 {offsets = [0, 40], sizes = [16, 4], strides = [1, 1]} : vector<16x96xf32> to vector<16x4xf32>
    %95 = arith.truncf %94 : vector<16x4xf32> to vector<16x4xbf16>
    %96 = vector.extract_strided_slice %31 {offsets = [0, 72], sizes = [16, 4], strides = [1, 1]} : vector<16x96xf32> to vector<16x4xf32>
    %97 = arith.truncf %96 : vector<16x4xf32> to vector<16x4xbf16>
    %cst_33 = arith.constant dense<0.000000e+00> : vector<16x16xf32>
    %98 = tpu.matmul %93, %95, %cst_33 {dimension_numbers = #tpu.dot_dimension_numbers<[1], [1], [0], [0], [0, 0, 1, 0], [], []>} : vector<16x4xbf16>, vector<16x4xbf16>, vector<16x16xf32> -> vector<16x16xf32>
    %cst_34 = arith.constant 5.000000e-01 : f32
    %99 = vector.broadcast %cst_34 : f32 to vector<16x16xf32>
    %100 = arith.mulf %98, %99 : vector<16x16xf32>
    %101 = vector.broadcast %33 : vector<1x16xf32> to vector<16x16xf32>
    %102 = arith.addf %100, %101 : vector<16x16xf32>
    %cst_35 = arith.constant dense<0xFF800000> : vector<16xf32>
    %103 = vector.multi_reduction <maximumf>, %102, %cst_35 [1] : vector<16x16xf32> to vector<16xf32>
    %104 = vector.shape_cast %103 : vector<16xf32> to vector<16x1xf32>
    %105 = vector.broadcast %104 : vector<16x1xf32> to vector<16x16xf32>
    %106 = arith.subf %102, %105 : vector<16x16xf32>
    %107 = math.exp %106 : vector<16x16xf32>
    %cst_36 = arith.constant dense<0.000000e+00> : vector<16xf32>
    %108 = vector.multi_reduction <add>, %107, %cst_36 [1] : vector<16x16xf32> to vector<16xf32>
    %109 = vector.shape_cast %108 : vector<16xf32> to vector<16x1xf32>
    %110 = tpu.reciprocal %109 {approx = true} : vector<16x1xf32> -> vector<16x1xf32>
    %111 = vector.broadcast %110 : vector<16x1xf32> to vector<16x16xf32>
    %112 = arith.mulf %107, %111 : vector<16x16xf32>
    %113 = arith.truncf %112 : vector<16x16xf32> to vector<16x16xbf16>
    %cst_37 = arith.constant dense<0.000000e+00> : vector<16x4xf32>
    %114 = tpu.matmul %113, %97, %cst_37 {dimension_numbers = #tpu.dot_dimension_numbers<[1], [0], [0], [1], [0, 0, 1, 1], [], []>} : vector<16x16xbf16>, vector<16x4xbf16>, vector<16x4xf32> -> vector<16x4xf32>
    %115 = vector.extract_strided_slice %34 {offsets = [8, 0], sizes = [4, 32], strides = [1, 1]} : vector<32x32xf32> to vector<4x32xf32>
    %116 = arith.truncf %115 : vector<4x32xf32> to vector<4x32xbf16>
    %117 = arith.truncf %114 : vector<16x4xf32> to vector<16x4xbf16>
    %cst_38 = arith.constant dense<0.000000e+00> : vector<16x32xf32>
    %118 = tpu.matmul %117, %116, %cst_38 {dimension_numbers = #tpu.dot_dimension_numbers<[1], [0], [0], [1], [0, 0, 1, 1], [], []>} : vector<16x4xbf16>, vector<4x32xbf16>, vector<16x32xf32> -> vector<16x32xf32>
    %119 = arith.addf %91, %118 : vector<16x32xf32>
    %120 = vector.extract_strided_slice %31 {offsets = [0, 12], sizes = [16, 4], strides = [1, 1]} : vector<16x96xf32> to vector<16x4xf32>
    %121 = arith.truncf %120 : vector<16x4xf32> to vector<16x4xbf16>
    %122 = vector.extract_strided_slice %31 {offsets = [0, 44], sizes = [16, 4], strides = [1, 1]} : vector<16x96xf32> to vector<16x4xf32>
    %123 = arith.truncf %122 : vector<16x4xf32> to vector<16x4xbf16>
    %124 = vector.extract_strided_slice %31 {offsets = [0, 76], sizes = [16, 4], strides = [1, 1]} : vector<16x96xf32> to vector<16x4xf32>
    %125 = arith.truncf %124 : vector<16x4xf32> to vector<16x4xbf16>
    %cst_39 = arith.constant dense<0.000000e+00> : vector<16x16xf32>
    %126 = tpu.matmul %121, %123, %cst_39 {dimension_numbers = #tpu.dot_dimension_numbers<[1], [1], [0], [0], [0, 0, 1, 0], [], []>} : vector<16x4xbf16>, vector<16x4xbf16>, vector<16x16xf32> -> vector<16x16xf32>
    %cst_40 = arith.constant 5.000000e-01 : f32
    %127 = vector.broadcast %cst_40 : f32 to vector<16x16xf32>
    %128 = arith.mulf %126, %127 : vector<16x16xf32>
    %129 = vector.broadcast %33 : vector<1x16xf32> to vector<16x16xf32>
    %130 = arith.addf %128, %129 : vector<16x16xf32>
    %cst_41 = arith.constant dense<0xFF800000> : vector<16xf32>
    %131 = vector.multi_reduction <maximumf>, %130, %cst_41 [1] : vector<16x16xf32> to vector<16xf32>
    %132 = vector.shape_cast %131 : vector<16xf32> to vector<16x1xf32>
    %133 = vector.broadcast %132 : vector<16x1xf32> to vector<16x16xf32>
    %134 = arith.subf %130, %133 : vector<16x16xf32>
    %135 = math.exp %134 : vector<16x16xf32>
    %cst_42 = arith.constant dense<0.000000e+00> : vector<16xf32>
    %136 = vector.multi_reduction <add>, %135, %cst_42 [1] : vector<16x16xf32> to vector<16xf32>
    %137 = vector.shape_cast %136 : vector<16xf32> to vector<16x1xf32>
    %138 = tpu.reciprocal %137 {approx = true} : vector<16x1xf32> -> vector<16x1xf32>
    %139 = vector.broadcast %138 : vector<16x1xf32> to vector<16x16xf32>
    %140 = arith.mulf %135, %139 : vector<16x16xf32>
    %141 = arith.truncf %140 : vector<16x16xf32> to vector<16x16xbf16>
    %cst_43 = arith.constant dense<0.000000e+00> : vector<16x4xf32>
    %142 = tpu.matmul %141, %125, %cst_43 {dimension_numbers = #tpu.dot_dimension_numbers<[1], [0], [0], [1], [0, 0, 1, 1], [], []>} : vector<16x16xbf16>, vector<16x4xbf16>, vector<16x4xf32> -> vector<16x4xf32>
    %143 = vector.extract_strided_slice %34 {offsets = [12, 0], sizes = [4, 32], strides = [1, 1]} : vector<32x32xf32> to vector<4x32xf32>
    %144 = arith.truncf %143 : vector<4x32xf32> to vector<4x32xbf16>
    %145 = arith.truncf %142 : vector<16x4xf32> to vector<16x4xbf16>
    %cst_44 = arith.constant dense<0.000000e+00> : vector<16x32xf32>
    %146 = tpu.matmul %145, %144, %cst_44 {dimension_numbers = #tpu.dot_dimension_numbers<[1], [0], [0], [1], [0, 0, 1, 1], [], []>} : vector<16x4xbf16>, vector<4x32xbf16>, vector<16x32xf32> -> vector<16x32xf32>
    %147 = arith.addf %119, %146 : vector<16x32xf32>
    %148 = vector.extract_strided_slice %31 {offsets = [0, 16], sizes = [16, 4], strides = [1, 1]} : vector<16x96xf32> to vector<16x4xf32>
    %149 = arith.truncf %148 : vector<16x4xf32> to vector<16x4xbf16>
    %150 = vector.extract_strided_slice %31 {offsets = [0, 48], sizes = [16, 4], strides = [1, 1]} : vector<16x96xf32> to vector<16x4xf32>
    %151 = arith.truncf %150 : vector<16x4xf32> to vector<16x4xbf16>
    %152 = vector.extract_strided_slice %31 {offsets = [0, 80], sizes = [16, 4], strides = [1, 1]} : vector<16x96xf32> to vector<16x4xf32>
    %153 = arith.truncf %152 : vector<16x4xf32> to vector<16x4xbf16>
    %cst_45 = arith.constant dense<0.000000e+00> : vector<16x16xf32>
    %154 = tpu.matmul %149, %151, %cst_45 {dimension_numbers = #tpu.dot_dimension_numbers<[1], [1], [0], [0], [0, 0, 1, 0], [], []>} : vector<16x4xbf16>, vector<16x4xbf16>, vector<16x16xf32> -> vector<16x16xf32>
    %cst_46 = arith.constant 5.000000e-01 : f32
    %155 = vector.broadcast %cst_46 : f32 to vector<16x16xf32>
    %156 = arith.mulf %154, %155 : vector<16x16xf32>
    %157 = vector.broadcast %33 : vector<1x16xf32> to vector<16x16xf32>
    %158 = arith.addf %156, %157 : vector<16x16xf32>
    %cst_47 = arith.constant dense<0xFF800000> : vector<16xf32>
    %159 = vector.multi_reduction <maximumf>, %158, %cst_47 [1] : vector<16x16xf32> to vector<16xf32>
    %160 = vector.shape_cast %159 : vector<16xf32> to vector<16x1xf32>
    %161 = vector.broadcast %160 : vector<16x1xf32> to vector<16x16xf32>
    %162 = arith.subf %158, %161 : vector<16x16xf32>
    %163 = math.exp %162 : vector<16x16xf32>
    %cst_48 = arith.constant dense<0.000000e+00> : vector<16xf32>
    %164 = vector.multi_reduction <add>, %163, %cst_48 [1] : vector<16x16xf32> to vector<16xf32>
    %165 = vector.shape_cast %164 : vector<16xf32> to vector<16x1xf32>
    %166 = tpu.reciprocal %165 {approx = true} : vector<16x1xf32> -> vector<16x1xf32>
    %167 = vector.broadcast %166 : vector<16x1xf32> to vector<16x16xf32>
    %168 = arith.mulf %163, %167 : vector<16x16xf32>
    %169 = arith.truncf %168 : vector<16x16xf32> to vector<16x16xbf16>
    %cst_49 = arith.constant dense<0.000000e+00> : vector<16x4xf32>
    %170 = tpu.matmul %169, %153, %cst_49 {dimension_numbers = #tpu.dot_dimension_numbers<[1], [0], [0], [1], [0, 0, 1, 1], [], []>} : vector<16x16xbf16>, vector<16x4xbf16>, vector<16x4xf32> -> vector<16x4xf32>
    %171 = vector.extract_strided_slice %34 {offsets = [16, 0], sizes = [4, 32], strides = [1, 1]} : vector<32x32xf32> to vector<4x32xf32>
    %172 = arith.truncf %171 : vector<4x32xf32> to vector<4x32xbf16>
    %173 = arith.truncf %170 : vector<16x4xf32> to vector<16x4xbf16>
    %cst_50 = arith.constant dense<0.000000e+00> : vector<16x32xf32>
    %174 = tpu.matmul %173, %172, %cst_50 {dimension_numbers = #tpu.dot_dimension_numbers<[1], [0], [0], [1], [0, 0, 1, 1], [], []>} : vector<16x4xbf16>, vector<4x32xbf16>, vector<16x32xf32> -> vector<16x32xf32>
    %175 = arith.addf %147, %174 : vector<16x32xf32>
    %176 = vector.extract_strided_slice %31 {offsets = [0, 20], sizes = [16, 4], strides = [1, 1]} : vector<16x96xf32> to vector<16x4xf32>
    %177 = arith.truncf %176 : vector<16x4xf32> to vector<16x4xbf16>
    %178 = vector.extract_strided_slice %31 {offsets = [0, 52], sizes = [16, 4], strides = [1, 1]} : vector<16x96xf32> to vector<16x4xf32>
    %179 = arith.truncf %178 : vector<16x4xf32> to vector<16x4xbf16>
    %180 = vector.extract_strided_slice %31 {offsets = [0, 84], sizes = [16, 4], strides = [1, 1]} : vector<16x96xf32> to vector<16x4xf32>
    %181 = arith.truncf %180 : vector<16x4xf32> to vector<16x4xbf16>
    %cst_51 = arith.constant dense<0.000000e+00> : vector<16x16xf32>
    %182 = tpu.matmul %177, %179, %cst_51 {dimension_numbers = #tpu.dot_dimension_numbers<[1], [1], [0], [0], [0, 0, 1, 0], [], []>} : vector<16x4xbf16>, vector<16x4xbf16>, vector<16x16xf32> -> vector<16x16xf32>
    %cst_52 = arith.constant 5.000000e-01 : f32
    %183 = vector.broadcast %cst_52 : f32 to vector<16x16xf32>
    %184 = arith.mulf %182, %183 : vector<16x16xf32>
    %185 = vector.broadcast %33 : vector<1x16xf32> to vector<16x16xf32>
    %186 = arith.addf %184, %185 : vector<16x16xf32>
    %cst_53 = arith.constant dense<0xFF800000> : vector<16xf32>
    %187 = vector.multi_reduction <maximumf>, %186, %cst_53 [1] : vector<16x16xf32> to vector<16xf32>
    %188 = vector.shape_cast %187 : vector<16xf32> to vector<16x1xf32>
    %189 = vector.broadcast %188 : vector<16x1xf32> to vector<16x16xf32>
    %190 = arith.subf %186, %189 : vector<16x16xf32>
    %191 = math.exp %190 : vector<16x16xf32>
    %cst_54 = arith.constant dense<0.000000e+00> : vector<16xf32>
    %192 = vector.multi_reduction <add>, %191, %cst_54 [1] : vector<16x16xf32> to vector<16xf32>
    %193 = vector.shape_cast %192 : vector<16xf32> to vector<16x1xf32>
    %194 = tpu.reciprocal %193 {approx = true} : vector<16x1xf32> -> vector<16x1xf32>
    %195 = vector.broadcast %194 : vector<16x1xf32> to vector<16x16xf32>
    %196 = arith.mulf %191, %195 : vector<16x16xf32>
    %197 = arith.truncf %196 : vector<16x16xf32> to vector<16x16xbf16>
    %cst_55 = arith.constant dense<0.000000e+00> : vector<16x4xf32>
    %198 = tpu.matmul %197, %181, %cst_55 {dimension_numbers = #tpu.dot_dimension_numbers<[1], [0], [0], [1], [0, 0, 1, 1], [], []>} : vector<16x16xbf16>, vector<16x4xbf16>, vector<16x4xf32> -> vector<16x4xf32>
    %199 = vector.extract_strided_slice %34 {offsets = [20, 0], sizes = [4, 32], strides = [1, 1]} : vector<32x32xf32> to vector<4x32xf32>
    %200 = arith.truncf %199 : vector<4x32xf32> to vector<4x32xbf16>
    %201 = arith.truncf %198 : vector<16x4xf32> to vector<16x4xbf16>
    %cst_56 = arith.constant dense<0.000000e+00> : vector<16x32xf32>
    %202 = tpu.matmul %201, %200, %cst_56 {dimension_numbers = #tpu.dot_dimension_numbers<[1], [0], [0], [1], [0, 0, 1, 1], [], []>} : vector<16x4xbf16>, vector<4x32xbf16>, vector<16x32xf32> -> vector<16x32xf32>
    %203 = arith.addf %175, %202 : vector<16x32xf32>
    %204 = vector.extract_strided_slice %31 {offsets = [0, 24], sizes = [16, 4], strides = [1, 1]} : vector<16x96xf32> to vector<16x4xf32>
    %205 = arith.truncf %204 : vector<16x4xf32> to vector<16x4xbf16>
    %206 = vector.extract_strided_slice %31 {offsets = [0, 56], sizes = [16, 4], strides = [1, 1]} : vector<16x96xf32> to vector<16x4xf32>
    %207 = arith.truncf %206 : vector<16x4xf32> to vector<16x4xbf16>
    %208 = vector.extract_strided_slice %31 {offsets = [0, 88], sizes = [16, 4], strides = [1, 1]} : vector<16x96xf32> to vector<16x4xf32>
    %209 = arith.truncf %208 : vector<16x4xf32> to vector<16x4xbf16>
    %cst_57 = arith.constant dense<0.000000e+00> : vector<16x16xf32>
    %210 = tpu.matmul %205, %207, %cst_57 {dimension_numbers = #tpu.dot_dimension_numbers<[1], [1], [0], [0], [0, 0, 1, 0], [], []>} : vector<16x4xbf16>, vector<16x4xbf16>, vector<16x16xf32> -> vector<16x16xf32>
    %cst_58 = arith.constant 5.000000e-01 : f32
    %211 = vector.broadcast %cst_58 : f32 to vector<16x16xf32>
    %212 = arith.mulf %210, %211 : vector<16x16xf32>
    %213 = vector.broadcast %33 : vector<1x16xf32> to vector<16x16xf32>
    %214 = arith.addf %212, %213 : vector<16x16xf32>
    %cst_59 = arith.constant dense<0xFF800000> : vector<16xf32>
    %215 = vector.multi_reduction <maximumf>, %214, %cst_59 [1] : vector<16x16xf32> to vector<16xf32>
    %216 = vector.shape_cast %215 : vector<16xf32> to vector<16x1xf32>
    %217 = vector.broadcast %216 : vector<16x1xf32> to vector<16x16xf32>
    %218 = arith.subf %214, %217 : vector<16x16xf32>
    %219 = math.exp %218 : vector<16x16xf32>
    %cst_60 = arith.constant dense<0.000000e+00> : vector<16xf32>
    %220 = vector.multi_reduction <add>, %219, %cst_60 [1] : vector<16x16xf32> to vector<16xf32>
    %221 = vector.shape_cast %220 : vector<16xf32> to vector<16x1xf32>
    %222 = tpu.reciprocal %221 {approx = true} : vector<16x1xf32> -> vector<16x1xf32>
    %223 = vector.broadcast %222 : vector<16x1xf32> to vector<16x16xf32>
    %224 = arith.mulf %219, %223 : vector<16x16xf32>
    %225 = arith.truncf %224 : vector<16x16xf32> to vector<16x16xbf16>
    %cst_61 = arith.constant dense<0.000000e+00> : vector<16x4xf32>
    %226 = tpu.matmul %225, %209, %cst_61 {dimension_numbers = #tpu.dot_dimension_numbers<[1], [0], [0], [1], [0, 0, 1, 1], [], []>} : vector<16x16xbf16>, vector<16x4xbf16>, vector<16x4xf32> -> vector<16x4xf32>
    %227 = vector.extract_strided_slice %34 {offsets = [24, 0], sizes = [4, 32], strides = [1, 1]} : vector<32x32xf32> to vector<4x32xf32>
    %228 = arith.truncf %227 : vector<4x32xf32> to vector<4x32xbf16>
    %229 = arith.truncf %226 : vector<16x4xf32> to vector<16x4xbf16>
    %cst_62 = arith.constant dense<0.000000e+00> : vector<16x32xf32>
    %230 = tpu.matmul %229, %228, %cst_62 {dimension_numbers = #tpu.dot_dimension_numbers<[1], [0], [0], [1], [0, 0, 1, 1], [], []>} : vector<16x4xbf16>, vector<4x32xbf16>, vector<16x32xf32> -> vector<16x32xf32>
    %231 = arith.addf %203, %230 : vector<16x32xf32>
    %232 = vector.extract_strided_slice %31 {offsets = [0, 28], sizes = [16, 4], strides = [1, 1]} : vector<16x96xf32> to vector<16x4xf32>
    %233 = arith.truncf %232 : vector<16x4xf32> to vector<16x4xbf16>
    %234 = vector.extract_strided_slice %31 {offsets = [0, 60], sizes = [16, 4], strides = [1, 1]} : vector<16x96xf32> to vector<16x4xf32>
    %235 = arith.truncf %234 : vector<16x4xf32> to vector<16x4xbf16>
    %236 = vector.extract_strided_slice %31 {offsets = [0, 92], sizes = [16, 4], strides = [1, 1]} : vector<16x96xf32> to vector<16x4xf32>
    %237 = arith.truncf %236 : vector<16x4xf32> to vector<16x4xbf16>
    %cst_63 = arith.constant dense<0.000000e+00> : vector<16x16xf32>
    %238 = tpu.matmul %233, %235, %cst_63 {dimension_numbers = #tpu.dot_dimension_numbers<[1], [1], [0], [0], [0, 0, 1, 0], [], []>} : vector<16x4xbf16>, vector<16x4xbf16>, vector<16x16xf32> -> vector<16x16xf32>
    %cst_64 = arith.constant 5.000000e-01 : f32
    %239 = vector.broadcast %cst_64 : f32 to vector<16x16xf32>
    %240 = arith.mulf %238, %239 : vector<16x16xf32>
    %241 = vector.broadcast %33 : vector<1x16xf32> to vector<16x16xf32>
    %242 = arith.addf %240, %241 : vector<16x16xf32>
    %cst_65 = arith.constant dense<0xFF800000> : vector<16xf32>
    %243 = vector.multi_reduction <maximumf>, %242, %cst_65 [1] : vector<16x16xf32> to vector<16xf32>
    %244 = vector.shape_cast %243 : vector<16xf32> to vector<16x1xf32>
    %245 = vector.broadcast %244 : vector<16x1xf32> to vector<16x16xf32>
    %246 = arith.subf %242, %245 : vector<16x16xf32>
    %247 = math.exp %246 : vector<16x16xf32>
    %cst_66 = arith.constant dense<0.000000e+00> : vector<16xf32>
    %248 = vector.multi_reduction <add>, %247, %cst_66 [1] : vector<16x16xf32> to vector<16xf32>
    %249 = vector.shape_cast %248 : vector<16xf32> to vector<16x1xf32>
    %250 = tpu.reciprocal %249 {approx = true} : vector<16x1xf32> -> vector<16x1xf32>
    %251 = vector.broadcast %250 : vector<16x1xf32> to vector<16x16xf32>
    %252 = arith.mulf %247, %251 : vector<16x16xf32>
    %253 = arith.truncf %252 : vector<16x16xf32> to vector<16x16xbf16>
    %cst_67 = arith.constant dense<0.000000e+00> : vector<16x4xf32>
    %254 = tpu.matmul %253, %237, %cst_67 {dimension_numbers = #tpu.dot_dimension_numbers<[1], [0], [0], [1], [0, 0, 1, 1], [], []>} : vector<16x16xbf16>, vector<16x4xbf16>, vector<16x4xf32> -> vector<16x4xf32>
    %255 = vector.extract_strided_slice %34 {offsets = [28, 0], sizes = [4, 32], strides = [1, 1]} : vector<32x32xf32> to vector<4x32xf32>
    %256 = arith.truncf %255 : vector<4x32xf32> to vector<4x32xbf16>
    %257 = arith.truncf %254 : vector<16x4xf32> to vector<16x4xbf16>
    %cst_68 = arith.constant dense<0.000000e+00> : vector<16x32xf32>
    %258 = tpu.matmul %257, %256, %cst_68 {dimension_numbers = #tpu.dot_dimension_numbers<[1], [0], [0], [1], [0, 0, 1, 1], [], []>} : vector<16x4xbf16>, vector<4x32xbf16>, vector<16x32xf32> -> vector<16x32xf32>
    %259 = arith.addf %231, %258 : vector<16x32xf32>
    %260 = arith.addf %1, %259 : vector<16x32xf32>
    %c0_69 = arith.constant 0 : index
    %c0_70 = arith.constant 0 : index
    %261 = vector.load %arg8[%c0_69, %c0_70] : memref<1x32xf32, #tpu.memory_space<vmem>>, vector<1x32xf32>
    %262 = vector.broadcast %261 : vector<1x32xf32> to vector<16x32xf32>
    %263 = arith.addf %260, %262 : vector<16x32xf32>
    %c0_71 = arith.constant 0 : index
    %c0_72 = arith.constant 0 : index
    %c0_73 = arith.constant 0 : index
    %264 = vector.load %arg9[%c0_71, %c0_72, %c0_73] : memref<1x16x32xf32, #tpu.memory_space<vmem>>, vector<1x16x32xf32>
    %265 = vector.shape_cast %264 : vector<1x16x32xf32> to vector<16x32xf32>
    %266 = vector.shape_cast %263 : vector<16x32xf32> to vector<1x16x32xf32>
    tpu.vector_store %arg9[%c0_71, %c0_72, %c0_73], %266 {strides = array<i32>} : memref<1x16x32xf32, #tpu.memory_space<vmem>>, vector<1x16x32xf32>,
    return
  }
  func.func @transform_0(%arg0: i32) -> (i32, i32, i32) {
    %c0_i32 = arith.constant 0 : i32
    %c0_i32_0 = arith.constant 0 : i32
    %c0_i32_1 = arith.constant 0 : i32
    return %arg0, %c0_i32, %c0_i32_0 : i32, i32, i32
  }
  func.func @transform_1(%arg0: i32) -> (i32, i32, i32) {
    %c0_i32 = arith.constant 0 : i32
    %c0_i32_0 = arith.constant 0 : i32
    %c0_i32_1 = arith.constant 0 : i32
    return %arg0, %c0_i32, %c0_i32_0 : i32, i32, i32
  }
  func.func @transform_2(%arg0: i32) -> (i32, i32) {
    %c0_i32 = arith.constant 0 : i32
    %c0_i32_0 = arith.constant 0 : i32
    %c0_i32_1 = arith.constant 0 : i32
    return %c0_i32, %c0_i32_0 : i32, i32
  }
  func.func @transform_3(%arg0: i32) -> (i32, i32) {
    %c0_i32 = arith.constant 0 : i32
    %c0_i32_0 = arith.constant 0 : i32
    %c0_i32_1 = arith.constant 0 : i32
    return %c0_i32, %c0_i32_0 : i32, i32
  }
  func.func @transform_4(%arg0: i32) -> (i32, i32) {
    %c0_i32 = arith.constant 0 : i32
    %c0_i32_0 = arith.constant 0 : i32
    %c0_i32_1 = arith.constant 0 : i32
    return %c0_i32, %c0_i32_0 : i32, i32
  }
  func.func @transform_5(%arg0: i32) -> (i32, i32) {
    %c0_i32 = arith.constant 0 : i32
    %c0_i32_0 = arith.constant 0 : i32
    %c0_i32_1 = arith.constant 0 : i32
    return %c0_i32, %c0_i32_0 : i32, i32
  }
  func.func @transform_6(%arg0: i32) -> (i32, i32) {
    %c0_i32 = arith.constant 0 : i32
    %c0_i32_0 = arith.constant 0 : i32
    %c0_i32_1 = arith.constant 0 : i32
    return %c0_i32, %c0_i32_0 : i32, i32
  }
  func.func @transform_7(%arg0: i32) -> (i32, i32) {
    %c0_i32 = arith.constant 0 : i32
    %c0_i32_0 = arith.constant 0 : i32
    %c0_i32_1 = arith.constant 0 : i32
    return %c0_i32, %c0_i32_0 : i32, i32
  }
  func.func @transform_8(%arg0: i32) -> (i32, i32, i32) {
    %c0_i32 = arith.constant 0 : i32
    %c0_i32_0 = arith.constant 0 : i32
    %c0_i32_1 = arith.constant 0 : i32
    return %arg0, %c0_i32, %c0_i32_0 : i32, i32, i32
  }
}

module attributes {stable_mosaic.version = 11 : i64} {
  func.func @_conv_kernel(%arg0: i32, %arg1: memref<1x16x32xf32, #tpu.memory_space<vmem>>, %arg2: memref<1x32xf32, #tpu.memory_space<vmem>>, %arg3: memref<1x32xf32, #tpu.memory_space<vmem>>, %arg4: memref<32x64xbf16, #tpu.memory_space<vmem>>, %arg5: memref<1x64xf32, #tpu.memory_space<vmem>>, %arg6: memref<5x32xf32, #tpu.memory_space<vmem>>, %arg7: memref<1x32xf32, #tpu.memory_space<vmem>>, %arg8: memref<1x32xf32, #tpu.memory_space<vmem>>, %arg9: memref<1x32xf32, #tpu.memory_space<vmem>>, %arg10: memref<32x32xbf16, #tpu.memory_space<vmem>>, %arg11: memref<1x32xf32, #tpu.memory_space<vmem>>, %arg12: memref<1x16x32xf32, #tpu.memory_space<vmem>>) attributes {dimension_semantics = [#tpu.dimension_semantics<parallel>], iteration_bounds = array<i64: 2>, scalar_prefetch = 0 : i64, scratch_operands = 0 : i64, tpu.core_type = #tpu.core_type<tc>, window_params = [{transform_indices = @transform_0, window_bounds = array<i64: 1, 16, 32>}, {pipeline_mode = #tpu.pipeline_mode<synchronous>, transform_indices = @transform_1, window_bounds = array<i64: 1, 32>}, {pipeline_mode = #tpu.pipeline_mode<synchronous>, transform_indices = @transform_2, window_bounds = array<i64: 1, 32>}, {pipeline_mode = #tpu.pipeline_mode<synchronous>, transform_indices = @transform_3, window_bounds = array<i64: 32, 64>}, {pipeline_mode = #tpu.pipeline_mode<synchronous>, transform_indices = @transform_4, window_bounds = array<i64: 1, 64>}, {pipeline_mode = #tpu.pipeline_mode<synchronous>, transform_indices = @transform_5, window_bounds = array<i64: 5, 32>}, {pipeline_mode = #tpu.pipeline_mode<synchronous>, transform_indices = @transform_6, window_bounds = array<i64: 1, 32>}, {pipeline_mode = #tpu.pipeline_mode<synchronous>, transform_indices = @transform_7, window_bounds = array<i64: 1, 32>}, {pipeline_mode = #tpu.pipeline_mode<synchronous>, transform_indices = @transform_8, window_bounds = array<i64: 1, 32>}, {pipeline_mode = #tpu.pipeline_mode<synchronous>, transform_indices = @transform_9, window_bounds = array<i64: 32, 32>}, {pipeline_mode = #tpu.pipeline_mode<synchronous>, transform_indices = @transform_10, window_bounds = array<i64: 1, 32>}, {transform_indices = @transform_11, window_bounds = array<i64: 1, 16, 32>}]} {
    %c0 = arith.constant 0 : index
    %c0_0 = arith.constant 0 : index
    %c0_1 = arith.constant 0 : index
    %0 = vector.load %arg1[%c0, %c0_0, %c0_1] : memref<1x16x32xf32, #tpu.memory_space<vmem>>, vector<1x16x32xf32>
    %1 = vector.shape_cast %0 : vector<1x16x32xf32> to vector<16x32xf32>
    %c0_2 = arith.constant 0 : index
    %c0_3 = arith.constant 0 : index
    %2 = vector.load %arg2[%c0_2, %c0_3] : memref<1x32xf32, #tpu.memory_space<vmem>>, vector<1x32xf32>
    %c0_4 = arith.constant 0 : index
    %c0_5 = arith.constant 0 : index
    %3 = vector.load %arg3[%c0_4, %c0_5] : memref<1x32xf32, #tpu.memory_space<vmem>>, vector<1x32xf32>
    %cst = arith.constant dense<0.000000e+00> : vector<16xf32>
    %4 = vector.multi_reduction <add>, %1, %cst [1] : vector<16x32xf32> to vector<16xf32>
    %5 = vector.shape_cast %4 : vector<16xf32> to vector<16x1xf32>
    %cst_6 = arith.constant 3.200000e+01 : f32
    %6 = vector.broadcast %cst_6 : f32 to vector<16x1xf32>
    %7 = arith.divf %5, %6 : vector<16x1xf32>
    %8 = vector.broadcast %7 : vector<16x1xf32> to vector<16x32xf32>
    %9 = arith.subf %1, %8 : vector<16x32xf32>
    %10 = arith.mulf %9, %9 : vector<16x32xf32>
    %cst_7 = arith.constant dense<0.000000e+00> : vector<16xf32>
    %11 = vector.multi_reduction <add>, %10, %cst_7 [1] : vector<16x32xf32> to vector<16xf32>
    %12 = vector.shape_cast %11 : vector<16xf32> to vector<16x1xf32>
    %cst_8 = arith.constant 3.200000e+01 : f32
    %13 = vector.broadcast %cst_8 : f32 to vector<16x1xf32>
    %14 = arith.divf %12, %13 : vector<16x1xf32>
    %15 = vector.broadcast %7 : vector<16x1xf32> to vector<16x32xf32>
    %16 = arith.subf %1, %15 : vector<16x32xf32>
    %cst_9 = arith.constant 9.99999974E-6 : f32
    %17 = vector.broadcast %cst_9 : f32 to vector<16x1xf32>
    %18 = arith.addf %14, %17 : vector<16x1xf32>
    %19 = math.rsqrt %18 : vector<16x1xf32>
    %20 = vector.broadcast %19 : vector<16x1xf32> to vector<16x32xf32>
    %21 = arith.mulf %16, %20 : vector<16x32xf32>
    %22 = vector.broadcast %2 : vector<1x32xf32> to vector<16x32xf32>
    %23 = arith.mulf %21, %22 : vector<16x32xf32>
    %24 = vector.broadcast %3 : vector<1x32xf32> to vector<16x32xf32>
    %25 = arith.addf %23, %24 : vector<16x32xf32>
    %26 = arith.truncf %25 : vector<16x32xf32> to vector<16x32xbf16>
    %c0_10 = arith.constant 0 : index
    %c0_11 = arith.constant 0 : index
    %27 = vector.load %arg4[%c0_10, %c0_11] : memref<32x64xbf16, #tpu.memory_space<vmem>>, vector<32x64xbf16>
    %cst_12 = arith.constant dense<0.000000e+00> : vector<16x64xf32>
    %28 = tpu.matmul %26, %27, %cst_12 {dimension_numbers = #tpu.dot_dimension_numbers<[1], [0], [0], [1], [0, 0, 1, 1], [], []>} : vector<16x32xbf16>, vector<32x64xbf16>, vector<16x64xf32> -> vector<16x64xf32>
    %c0_13 = arith.constant 0 : index
    %c0_14 = arith.constant 0 : index
    %29 = vector.load %arg5[%c0_13, %c0_14] : memref<1x64xf32, #tpu.memory_space<vmem>>, vector<1x64xf32>
    %30 = vector.broadcast %29 : vector<1x64xf32> to vector<16x64xf32>
    %31 = arith.addf %28, %30 : vector<16x64xf32>
    %32 = vector.extract_strided_slice %31 {offsets = [0, 0], sizes = [16, 32], strides = [1, 1]} : vector<16x64xf32> to vector<16x32xf32>
    %33 = vector.extract_strided_slice %31 {offsets = [0, 32], sizes = [16, 32], strides = [1, 1]} : vector<16x64xf32> to vector<16x32xf32>
    %34 = arith.negf %33 : vector<16x32xf32>
    %35 = math.exp %34 : vector<16x32xf32>
    %cst_15 = arith.constant 1.000000e+00 : f32
    %36 = vector.broadcast %cst_15 : f32 to vector<16x32xf32>
    %37 = arith.addf %36, %35 : vector<16x32xf32>
    %38 = arith.divf %36, %37 : vector<16x32xf32>
    %39 = arith.mulf %32, %38 : vector<16x32xf32>
    %cst_16 = arith.constant 0.000000e+00 : f32
    %40 = vector.broadcast %cst_16 : f32 to vector<2x32xf32>
    %41 = tpu.concatenate %40, %39, %40 in 0 : vector<2x32xf32>, vector<16x32xf32>, vector<2x32xf32> -> vector<20x32xf32>
    %c0_17 = arith.constant 0 : index
    %c0_18 = arith.constant 0 : index
    %42 = vector.load %arg6[%c0_17, %c0_18] : memref<5x32xf32, #tpu.memory_space<vmem>>, vector<5x32xf32>
    %cst_19 = arith.constant 0.000000e+00 : f32
    %43 = vector.broadcast %cst_19 : f32 to vector<16x32xf32>
    %44 = vector.extract_strided_slice %42 {offsets = [0, 0], sizes = [1, 32], strides = [1, 1]} : vector<5x32xf32> to vector<1x32xf32>
    %45 = vector.extract_strided_slice %41 {offsets = [0, 0], sizes = [16, 32], strides = [1, 1]} : vector<20x32xf32> to vector<16x32xf32>
    %46 = vector.broadcast %44 : vector<1x32xf32> to vector<16x32xf32>
    %47 = arith.mulf %46, %45 : vector<16x32xf32>
    %48 = arith.addf %43, %47 : vector<16x32xf32>
    %49 = vector.extract_strided_slice %42 {offsets = [1, 0], sizes = [1, 32], strides = [1, 1]} : vector<5x32xf32> to vector<1x32xf32>
    %50 = vector.extract_strided_slice %41 {offsets = [1, 0], sizes = [16, 32], strides = [1, 1]} : vector<20x32xf32> to vector<16x32xf32>
    %51 = vector.broadcast %49 : vector<1x32xf32> to vector<16x32xf32>
    %52 = arith.mulf %51, %50 : vector<16x32xf32>
    %53 = arith.addf %48, %52 : vector<16x32xf32>
    %54 = vector.extract_strided_slice %42 {offsets = [2, 0], sizes = [1, 32], strides = [1, 1]} : vector<5x32xf32> to vector<1x32xf32>
    %55 = vector.extract_strided_slice %41 {offsets = [2, 0], sizes = [16, 32], strides = [1, 1]} : vector<20x32xf32> to vector<16x32xf32>
    %56 = vector.broadcast %54 : vector<1x32xf32> to vector<16x32xf32>
    %57 = arith.mulf %56, %55 : vector<16x32xf32>
    %58 = arith.addf %53, %57 : vector<16x32xf32>
    %59 = vector.extract_strided_slice %42 {offsets = [3, 0], sizes = [1, 32], strides = [1, 1]} : vector<5x32xf32> to vector<1x32xf32>
    %60 = vector.extract_strided_slice %41 {offsets = [3, 0], sizes = [16, 32], strides = [1, 1]} : vector<20x32xf32> to vector<16x32xf32>
    %61 = vector.broadcast %59 : vector<1x32xf32> to vector<16x32xf32>
    %62 = arith.mulf %61, %60 : vector<16x32xf32>
    %63 = arith.addf %58, %62 : vector<16x32xf32>
    %64 = vector.extract_strided_slice %42 {offsets = [4, 0], sizes = [1, 32], strides = [1, 1]} : vector<5x32xf32> to vector<1x32xf32>
    %65 = vector.extract_strided_slice %41 {offsets = [4, 0], sizes = [16, 32], strides = [1, 1]} : vector<20x32xf32> to vector<16x32xf32>
    %66 = vector.broadcast %64 : vector<1x32xf32> to vector<16x32xf32>
    %67 = arith.mulf %66, %65 : vector<16x32xf32>
    %68 = arith.addf %63, %67 : vector<16x32xf32>
    %c0_20 = arith.constant 0 : index
    %c0_21 = arith.constant 0 : index
    %69 = vector.load %arg7[%c0_20, %c0_21] : memref<1x32xf32, #tpu.memory_space<vmem>>, vector<1x32xf32>
    %70 = vector.broadcast %69 : vector<1x32xf32> to vector<16x32xf32>
    %71 = arith.addf %68, %70 : vector<16x32xf32>
    %cst_22 = arith.constant dense<0.000000e+00> : vector<32xf32>
    %72 = vector.multi_reduction <add>, %71, %cst_22 [0] : vector<16x32xf32> to vector<32xf32>
    %73 = vector.shape_cast %72 : vector<32xf32> to vector<1x32xf32>
    %cst_23 = arith.constant 1.600000e+01 : f32
    %74 = vector.broadcast %cst_23 : f32 to vector<1x32xf32>
    %75 = arith.divf %73, %74 : vector<1x32xf32>
    %76 = vector.broadcast %75 : vector<1x32xf32> to vector<16x32xf32>
    %77 = arith.subf %71, %76 : vector<16x32xf32>
    %78 = arith.mulf %77, %77 : vector<16x32xf32>
    %cst_24 = arith.constant dense<0.000000e+00> : vector<32xf32>
    %79 = vector.multi_reduction <add>, %78, %cst_24 [0] : vector<16x32xf32> to vector<32xf32>
    %80 = vector.shape_cast %79 : vector<32xf32> to vector<1x32xf32>
    %cst_25 = arith.constant 1.600000e+01 : f32
    %81 = vector.broadcast %cst_25 : f32 to vector<1x32xf32>
    %82 = arith.divf %80, %81 : vector<1x32xf32>
    %83 = vector.broadcast %75 : vector<1x32xf32> to vector<16x32xf32>
    %84 = arith.subf %71, %83 : vector<16x32xf32>
    %cst_26 = arith.constant 9.99999974E-6 : f32
    %85 = vector.broadcast %cst_26 : f32 to vector<1x32xf32>
    %86 = arith.addf %82, %85 : vector<1x32xf32>
    %87 = math.rsqrt %86 : vector<1x32xf32>
    %88 = vector.broadcast %87 : vector<1x32xf32> to vector<16x32xf32>
    %89 = arith.mulf %84, %88 : vector<16x32xf32>
    %c0_27 = arith.constant 0 : index
    %c0_28 = arith.constant 0 : index
    %90 = vector.load %arg8[%c0_27, %c0_28] : memref<1x32xf32, #tpu.memory_space<vmem>>, vector<1x32xf32>
    %91 = vector.broadcast %90 : vector<1x32xf32> to vector<16x32xf32>
    %92 = arith.mulf %89, %91 : vector<16x32xf32>
    %c0_29 = arith.constant 0 : index
    %c0_30 = arith.constant 0 : index
    %93 = vector.load %arg9[%c0_29, %c0_30] : memref<1x32xf32, #tpu.memory_space<vmem>>, vector<1x32xf32>
    %94 = vector.broadcast %93 : vector<1x32xf32> to vector<16x32xf32>
    %95 = arith.addf %92, %94 : vector<16x32xf32>
    %96 = arith.negf %95 : vector<16x32xf32>
    %97 = math.exp %96 : vector<16x32xf32>
    %cst_31 = arith.constant 1.000000e+00 : f32
    %98 = vector.broadcast %cst_31 : f32 to vector<16x32xf32>
    %99 = arith.addf %98, %97 : vector<16x32xf32>
    %100 = arith.divf %98, %99 : vector<16x32xf32>
    %101 = arith.mulf %95, %100 : vector<16x32xf32>
    %102 = arith.truncf %101 : vector<16x32xf32> to vector<16x32xbf16>
    %c0_32 = arith.constant 0 : index
    %c0_33 = arith.constant 0 : index
    %103 = vector.load %arg10[%c0_32, %c0_33] : memref<32x32xbf16, #tpu.memory_space<vmem>>, vector<32x32xbf16>
    %cst_34 = arith.constant dense<0.000000e+00> : vector<16x32xf32>
    %104 = tpu.matmul %102, %103, %cst_34 {dimension_numbers = #tpu.dot_dimension_numbers<[1], [0], [0], [1], [0, 0, 1, 1], [], []>} : vector<16x32xbf16>, vector<32x32xbf16>, vector<16x32xf32> -> vector<16x32xf32>
    %c0_35 = arith.constant 0 : index
    %c0_36 = arith.constant 0 : index
    %105 = vector.load %arg11[%c0_35, %c0_36] : memref<1x32xf32, #tpu.memory_space<vmem>>, vector<1x32xf32>
    %106 = vector.broadcast %105 : vector<1x32xf32> to vector<16x32xf32>
    %107 = arith.addf %104, %106 : vector<16x32xf32>
    %108 = arith.addf %1, %107 : vector<16x32xf32>
    %c0_37 = arith.constant 0 : index
    %c0_38 = arith.constant 0 : index
    %c0_39 = arith.constant 0 : index
    %109 = vector.load %arg12[%c0_37, %c0_38, %c0_39] : memref<1x16x32xf32, #tpu.memory_space<vmem>>, vector<1x16x32xf32>
    %110 = vector.shape_cast %109 : vector<1x16x32xf32> to vector<16x32xf32>
    %111 = vector.shape_cast %108 : vector<16x32xf32> to vector<1x16x32xf32>
    tpu.vector_store %arg12[%c0_37, %c0_38, %c0_39], %111 {strides = array<i32>} : memref<1x16x32xf32, #tpu.memory_space<vmem>>, vector<1x16x32xf32>,
    return
  }
  func.func @transform_0(%arg0: i32) -> (i32, i32, i32) {
    %c0_i32 = arith.constant 0 : i32
    %c0_i32_0 = arith.constant 0 : i32
    %c0_i32_1 = arith.constant 0 : i32
    return %arg0, %c0_i32, %c0_i32_0 : i32, i32, i32
  }
  func.func @transform_1(%arg0: i32) -> (i32, i32) {
    %c0_i32 = arith.constant 0 : i32
    %c0_i32_0 = arith.constant 0 : i32
    %c0_i32_1 = arith.constant 0 : i32
    return %c0_i32, %c0_i32_0 : i32, i32
  }
  func.func @transform_2(%arg0: i32) -> (i32, i32) {
    %c0_i32 = arith.constant 0 : i32
    %c0_i32_0 = arith.constant 0 : i32
    %c0_i32_1 = arith.constant 0 : i32
    return %c0_i32, %c0_i32_0 : i32, i32
  }
  func.func @transform_3(%arg0: i32) -> (i32, i32) {
    %c0_i32 = arith.constant 0 : i32
    %c0_i32_0 = arith.constant 0 : i32
    %c0_i32_1 = arith.constant 0 : i32
    return %c0_i32, %c0_i32_0 : i32, i32
  }
  func.func @transform_4(%arg0: i32) -> (i32, i32) {
    %c0_i32 = arith.constant 0 : i32
    %c0_i32_0 = arith.constant 0 : i32
    %c0_i32_1 = arith.constant 0 : i32
    return %c0_i32, %c0_i32_0 : i32, i32
  }
  func.func @transform_5(%arg0: i32) -> (i32, i32) {
    %c0_i32 = arith.constant 0 : i32
    %c0_i32_0 = arith.constant 0 : i32
    %c0_i32_1 = arith.constant 0 : i32
    return %c0_i32, %c0_i32_0 : i32, i32
  }
  func.func @transform_6(%arg0: i32) -> (i32, i32) {
    %c0_i32 = arith.constant 0 : i32
    %c0_i32_0 = arith.constant 0 : i32
    %c0_i32_1 = arith.constant 0 : i32
    return %c0_i32, %c0_i32_0 : i32, i32
  }
  func.func @transform_7(%arg0: i32) -> (i32, i32) {
    %c0_i32 = arith.constant 0 : i32
    %c0_i32_0 = arith.constant 0 : i32
    %c0_i32_1 = arith.constant 0 : i32
    return %c0_i32, %c0_i32_0 : i32, i32
  }
  func.func @transform_8(%arg0: i32) -> (i32, i32) {
    %c0_i32 = arith.constant 0 : i32
    %c0_i32_0 = arith.constant 0 : i32
    %c0_i32_1 = arith.constant 0 : i32
    return %c0_i32, %c0_i32_0 : i32, i32
  }
  func.func @transform_9(%arg0: i32) -> (i32, i32) {
    %c0_i32 = arith.constant 0 : i32
    %c0_i32_0 = arith.constant 0 : i32
    %c0_i32_1 = arith.constant 0 : i32
    return %c0_i32, %c0_i32_0 : i32, i32
  }
  func.func @transform_10(%arg0: i32) -> (i32, i32) {
    %c0_i32 = arith.constant 0 : i32
    %c0_i32_0 = arith.constant 0 : i32
    %c0_i32_1 = arith.constant 0 : i32
    return %c0_i32, %c0_i32_0 : i32, i32
  }
  func.func @transform_11(%arg0: i32) -> (i32, i32, i32) {
    %c0_i32 = arith.constant 0 : i32
    %c0_i32_0 = arith.constant 0 : i32
    %c0_i32_1 = arith.constant 0 : i32
    return %arg0, %c0_i32, %c0_i32_0 : i32, i32, i32
  }
}

module attributes {stable_mosaic.version = 11 : i64} {
  func.func @_ffn_kernel(%arg0: i32, %arg1: memref<32x32xf32, #tpu.memory_space<vmem>>, %arg2: memref<1x32xf32, #tpu.memory_space<vmem>>, %arg3: memref<1x32xf32, #tpu.memory_space<vmem>>, %arg4: memref<32x1024xbf16, #tpu.memory_space<vmem>>, %arg5: memref<1x1024xf32, #tpu.memory_space<vmem>>, %arg6: memref<1024x32xbf16, #tpu.memory_space<vmem>>, %arg7: memref<1x32xf32, #tpu.memory_space<vmem>>, %arg8: memref<1x32xf32, #tpu.memory_space<vmem>>, %arg9: memref<1x32xf32, #tpu.memory_space<vmem>>, %arg10: memref<32x32xf32, #tpu.memory_space<vmem>>) attributes {dimension_semantics = [#tpu.dimension_semantics<parallel>], iteration_bounds = array<i64: 1>, scalar_prefetch = 0 : i64, scratch_operands = 0 : i64, tpu.core_type = #tpu.core_type<tc>, window_params = [{transform_indices = @transform_0, window_bounds = array<i64: 32, 32>}, {pipeline_mode = #tpu.pipeline_mode<synchronous>, transform_indices = @transform_1, window_bounds = array<i64: 1, 32>}, {pipeline_mode = #tpu.pipeline_mode<synchronous>, transform_indices = @transform_2, window_bounds = array<i64: 1, 32>}, {pipeline_mode = #tpu.pipeline_mode<synchronous>, transform_indices = @transform_3, window_bounds = array<i64: 32, 1024>}, {pipeline_mode = #tpu.pipeline_mode<synchronous>, transform_indices = @transform_4, window_bounds = array<i64: 1, 1024>}, {pipeline_mode = #tpu.pipeline_mode<synchronous>, transform_indices = @transform_5, window_bounds = array<i64: 1024, 32>}, {pipeline_mode = #tpu.pipeline_mode<synchronous>, transform_indices = @transform_6, window_bounds = array<i64: 1, 32>}, {pipeline_mode = #tpu.pipeline_mode<synchronous>, transform_indices = @transform_7, window_bounds = array<i64: 1, 32>}, {pipeline_mode = #tpu.pipeline_mode<synchronous>, transform_indices = @transform_8, window_bounds = array<i64: 1, 32>}, {transform_indices = @transform_9, window_bounds = array<i64: 32, 32>}]} {
    %c0 = arith.constant 0 : index
    %c0_0 = arith.constant 0 : index
    %0 = vector.load %arg1[%c0, %c0_0] : memref<32x32xf32, #tpu.memory_space<vmem>>, vector<32x32xf32>
    %c0_1 = arith.constant 0 : index
    %c0_2 = arith.constant 0 : index
    %1 = vector.load %arg2[%c0_1, %c0_2] : memref<1x32xf32, #tpu.memory_space<vmem>>, vector<1x32xf32>
    %c0_3 = arith.constant 0 : index
    %c0_4 = arith.constant 0 : index
    %2 = vector.load %arg3[%c0_3, %c0_4] : memref<1x32xf32, #tpu.memory_space<vmem>>, vector<1x32xf32>
    %cst = arith.constant dense<0.000000e+00> : vector<32xf32>
    %3 = vector.multi_reduction <add>, %0, %cst [1] : vector<32x32xf32> to vector<32xf32>
    %4 = vector.shape_cast %3 : vector<32xf32> to vector<32x1xf32>
    %cst_5 = arith.constant 3.200000e+01 : f32
    %5 = vector.broadcast %cst_5 : f32 to vector<32x1xf32>
    %6 = arith.divf %4, %5 : vector<32x1xf32>
    %7 = vector.broadcast %6 : vector<32x1xf32> to vector<32x32xf32>
    %8 = arith.subf %0, %7 : vector<32x32xf32>
    %9 = arith.mulf %8, %8 : vector<32x32xf32>
    %cst_6 = arith.constant dense<0.000000e+00> : vector<32xf32>
    %10 = vector.multi_reduction <add>, %9, %cst_6 [1] : vector<32x32xf32> to vector<32xf32>
    %11 = vector.shape_cast %10 : vector<32xf32> to vector<32x1xf32>
    %cst_7 = arith.constant 3.200000e+01 : f32
    %12 = vector.broadcast %cst_7 : f32 to vector<32x1xf32>
    %13 = arith.divf %11, %12 : vector<32x1xf32>
    %14 = vector.broadcast %6 : vector<32x1xf32> to vector<32x32xf32>
    %15 = arith.subf %0, %14 : vector<32x32xf32>
    %cst_8 = arith.constant 9.99999974E-6 : f32
    %16 = vector.broadcast %cst_8 : f32 to vector<32x1xf32>
    %17 = arith.addf %13, %16 : vector<32x1xf32>
    %18 = math.rsqrt %17 : vector<32x1xf32>
    %19 = vector.broadcast %18 : vector<32x1xf32> to vector<32x32xf32>
    %20 = arith.mulf %15, %19 : vector<32x32xf32>
    %21 = vector.broadcast %1 : vector<1x32xf32> to vector<32x32xf32>
    %22 = arith.mulf %20, %21 : vector<32x32xf32>
    %23 = vector.broadcast %2 : vector<1x32xf32> to vector<32x32xf32>
    %24 = arith.addf %22, %23 : vector<32x32xf32>
    %25 = arith.truncf %24 : vector<32x32xf32> to vector<32x32xbf16>
    %c0_9 = arith.constant 0 : index
    %c0_10 = arith.constant 0 : index
    %26 = vector.load %arg4[%c0_9, %c0_10] : memref<32x1024xbf16, #tpu.memory_space<vmem>>, vector<32x1024xbf16>
    %cst_11 = arith.constant dense<0.000000e+00> : vector<32x1024xf32>
    %27 = tpu.matmul %25, %26, %cst_11 {dimension_numbers = #tpu.dot_dimension_numbers<[1], [0], [0], [1], [0, 0, 1, 1], [], []>} : vector<32x32xbf16>, vector<32x1024xbf16>, vector<32x1024xf32> -> vector<32x1024xf32>
    %c0_12 = arith.constant 0 : index
    %c0_13 = arith.constant 0 : index
    %28 = vector.load %arg5[%c0_12, %c0_13] : memref<1x1024xf32, #tpu.memory_space<vmem>>, vector<1x1024xf32>
    %29 = vector.broadcast %28 : vector<1x1024xf32> to vector<32x1024xf32>
    %30 = arith.addf %27, %29 : vector<32x1024xf32>
    %31 = arith.negf %30 : vector<32x1024xf32>
    %32 = math.exp %31 : vector<32x1024xf32>
    %cst_14 = arith.constant 1.000000e+00 : f32
    %33 = vector.broadcast %cst_14 : f32 to vector<32x1024xf32>
    %34 = arith.addf %33, %32 : vector<32x1024xf32>
    %35 = arith.divf %33, %34 : vector<32x1024xf32>
    %36 = arith.mulf %30, %35 : vector<32x1024xf32>
    %37 = arith.truncf %36 : vector<32x1024xf32> to vector<32x1024xbf16>
    %c0_15 = arith.constant 0 : index
    %c0_16 = arith.constant 0 : index
    %38 = vector.load %arg6[%c0_15, %c0_16] : memref<1024x32xbf16, #tpu.memory_space<vmem>>, vector<1024x32xbf16>
    %cst_17 = arith.constant dense<0.000000e+00> : vector<32x32xf32>
    %39 = tpu.matmul %37, %38, %cst_17 {dimension_numbers = #tpu.dot_dimension_numbers<[1], [0], [0], [1], [0, 0, 1, 1], [], []>} : vector<32x1024xbf16>, vector<1024x32xbf16>, vector<32x32xf32> -> vector<32x32xf32>
    %c0_18 = arith.constant 0 : index
    %c0_19 = arith.constant 0 : index
    %40 = vector.load %arg7[%c0_18, %c0_19] : memref<1x32xf32, #tpu.memory_space<vmem>>, vector<1x32xf32>
    %41 = vector.broadcast %40 : vector<1x32xf32> to vector<32x32xf32>
    %42 = arith.addf %39, %41 : vector<32x32xf32>
    %cst_20 = arith.constant 5.000000e-01 : f32
    %43 = vector.broadcast %cst_20 : f32 to vector<32x32xf32>
    %44 = arith.mulf %43, %42 : vector<32x32xf32>
    %45 = arith.addf %0, %44 : vector<32x32xf32>
    %c0_21 = arith.constant 0 : index
    %c0_22 = arith.constant 0 : index
    %46 = vector.load %arg8[%c0_21, %c0_22] : memref<1x32xf32, #tpu.memory_space<vmem>>, vector<1x32xf32>
    %c0_23 = arith.constant 0 : index
    %c0_24 = arith.constant 0 : index
    %47 = vector.load %arg9[%c0_23, %c0_24] : memref<1x32xf32, #tpu.memory_space<vmem>>, vector<1x32xf32>
    %cst_25 = arith.constant dense<0.000000e+00> : vector<32xf32>
    %48 = vector.multi_reduction <add>, %45, %cst_25 [1] : vector<32x32xf32> to vector<32xf32>
    %49 = vector.shape_cast %48 : vector<32xf32> to vector<32x1xf32>
    %cst_26 = arith.constant 3.200000e+01 : f32
    %50 = vector.broadcast %cst_26 : f32 to vector<32x1xf32>
    %51 = arith.divf %49, %50 : vector<32x1xf32>
    %52 = vector.broadcast %51 : vector<32x1xf32> to vector<32x32xf32>
    %53 = arith.subf %45, %52 : vector<32x32xf32>
    %54 = arith.mulf %53, %53 : vector<32x32xf32>
    %cst_27 = arith.constant dense<0.000000e+00> : vector<32xf32>
    %55 = vector.multi_reduction <add>, %54, %cst_27 [1] : vector<32x32xf32> to vector<32xf32>
    %56 = vector.shape_cast %55 : vector<32xf32> to vector<32x1xf32>
    %cst_28 = arith.constant 3.200000e+01 : f32
    %57 = vector.broadcast %cst_28 : f32 to vector<32x1xf32>
    %58 = arith.divf %56, %57 : vector<32x1xf32>
    %59 = vector.broadcast %51 : vector<32x1xf32> to vector<32x32xf32>
    %60 = arith.subf %45, %59 : vector<32x32xf32>
    %cst_29 = arith.constant 9.99999974E-6 : f32
    %61 = vector.broadcast %cst_29 : f32 to vector<32x1xf32>
    %62 = arith.addf %58, %61 : vector<32x1xf32>
    %63 = math.rsqrt %62 : vector<32x1xf32>
    %64 = vector.broadcast %63 : vector<32x1xf32> to vector<32x32xf32>
    %65 = arith.mulf %60, %64 : vector<32x32xf32>
    %66 = vector.broadcast %46 : vector<1x32xf32> to vector<32x32xf32>
    %67 = arith.mulf %65, %66 : vector<32x32xf32>
    %68 = vector.broadcast %47 : vector<1x32xf32> to vector<32x32xf32>
    %69 = arith.addf %67, %68 : vector<32x32xf32>
    %c0_30 = arith.constant 0 : index
    %c0_31 = arith.constant 0 : index
    %70 = vector.load %arg10[%c0_30, %c0_31] : memref<32x32xf32, #tpu.memory_space<vmem>>, vector<32x32xf32>
    tpu.vector_store %arg10[%c0_30, %c0_31], %69 {strides = array<i32>} : memref<32x32xf32, #tpu.memory_space<vmem>>, vector<32x32xf32>,
    return
  }
  func.func @transform_0(%arg0: i32) -> (i32, i32) {
    %c0_i32 = arith.constant 0 : i32
    %c0_i32_0 = arith.constant 0 : i32
    return %arg0, %c0_i32 : i32, i32
  }
  func.func @transform_1(%arg0: i32) -> (i32, i32) {
    %c0_i32 = arith.constant 0 : i32
    %c0_i32_0 = arith.constant 0 : i32
    %c0_i32_1 = arith.constant 0 : i32
    return %c0_i32, %c0_i32_0 : i32, i32
  }
  func.func @transform_2(%arg0: i32) -> (i32, i32) {
    %c0_i32 = arith.constant 0 : i32
    %c0_i32_0 = arith.constant 0 : i32
    %c0_i32_1 = arith.constant 0 : i32
    return %c0_i32, %c0_i32_0 : i32, i32
  }
  func.func @transform_3(%arg0: i32) -> (i32, i32) {
    %c0_i32 = arith.constant 0 : i32
    %c0_i32_0 = arith.constant 0 : i32
    %c0_i32_1 = arith.constant 0 : i32
    return %c0_i32, %c0_i32_0 : i32, i32
  }
  func.func @transform_4(%arg0: i32) -> (i32, i32) {
    %c0_i32 = arith.constant 0 : i32
    %c0_i32_0 = arith.constant 0 : i32
    %c0_i32_1 = arith.constant 0 : i32
    return %c0_i32, %c0_i32_0 : i32, i32
  }
  func.func @transform_5(%arg0: i32) -> (i32, i32) {
    %c0_i32 = arith.constant 0 : i32
    %c0_i32_0 = arith.constant 0 : i32
    %c0_i32_1 = arith.constant 0 : i32
    return %c0_i32, %c0_i32_0 : i32, i32
  }
  func.func @transform_6(%arg0: i32) -> (i32, i32) {
    %c0_i32 = arith.constant 0 : i32
    %c0_i32_0 = arith.constant 0 : i32
    %c0_i32_1 = arith.constant 0 : i32
    return %c0_i32, %c0_i32_0 : i32, i32
  }
  func.func @transform_7(%arg0: i32) -> (i32, i32) {
    %c0_i32 = arith.constant 0 : i32
    %c0_i32_0 = arith.constant 0 : i32
    %c0_i32_1 = arith.constant 0 : i32
    return %c0_i32, %c0_i32_0 : i32, i32
  }
  func.func @transform_8(%arg0: i32) -> (i32, i32) {
    %c0_i32 = arith.constant 0 : i32
    %c0_i32_0 = arith.constant 0 : i32
    %c0_i32_1 = arith.constant 0 : i32
    return %c0_i32, %c0_i32_0 : i32, i32
  }
  func.func @transform_9(%arg0: i32) -> (i32, i32) {
    %c0_i32 = arith.constant 0 : i32
    %c0_i32_0 = arith.constant 0 : i32
    return %arg0, %c0_i32 : i32, i32
  }
}

module attributes {stable_mosaic.version = 11 : i64} {
  func.func @_matmul_bias_kernel(%arg0: i32, %arg1: memref<32x32xf32, #tpu.memory_space<vmem>>, %arg2: memref<32x32xbf16, #tpu.memory_space<vmem>>, %arg3: memref<1x32xf32, #tpu.memory_space<vmem>>, %arg4: memref<32x32xf32, #tpu.memory_space<vmem>>) attributes {dimension_semantics = [#tpu.dimension_semantics<parallel>], iteration_bounds = array<i64: 1>, scalar_prefetch = 0 : i64, scratch_operands = 0 : i64, tpu.core_type = #tpu.core_type<tc>, window_params = [{transform_indices = @transform_0, window_bounds = array<i64: 32, 32>}, {pipeline_mode = #tpu.pipeline_mode<synchronous>, transform_indices = @transform_1, window_bounds = array<i64: 32, 32>}, {pipeline_mode = #tpu.pipeline_mode<synchronous>, transform_indices = @transform_2, window_bounds = array<i64: 1, 32>}, {transform_indices = @transform_3, window_bounds = array<i64: 32, 32>}]} {
    %c0 = arith.constant 0 : index
    %c0_0 = arith.constant 0 : index
    %0 = vector.load %arg1[%c0, %c0_0] : memref<32x32xf32, #tpu.memory_space<vmem>>, vector<32x32xf32>
    %1 = arith.truncf %0 : vector<32x32xf32> to vector<32x32xbf16>
    %c0_1 = arith.constant 0 : index
    %c0_2 = arith.constant 0 : index
    %2 = vector.load %arg2[%c0_1, %c0_2] : memref<32x32xbf16, #tpu.memory_space<vmem>>, vector<32x32xbf16>
    %cst = arith.constant dense<0.000000e+00> : vector<32x32xf32>
    %3 = tpu.matmul %1, %2, %cst {dimension_numbers = #tpu.dot_dimension_numbers<[1], [0], [0], [1], [0, 0, 1, 1], [], []>} : vector<32x32xbf16>, vector<32x32xbf16>, vector<32x32xf32> -> vector<32x32xf32>
    %c0_3 = arith.constant 0 : index
    %c0_4 = arith.constant 0 : index
    %4 = vector.load %arg3[%c0_3, %c0_4] : memref<1x32xf32, #tpu.memory_space<vmem>>, vector<1x32xf32>
    %5 = vector.broadcast %4 : vector<1x32xf32> to vector<32x32xf32>
    %6 = arith.addf %3, %5 : vector<32x32xf32>
    %c0_5 = arith.constant 0 : index
    %c0_6 = arith.constant 0 : index
    %7 = vector.load %arg4[%c0_5, %c0_6] : memref<32x32xf32, #tpu.memory_space<vmem>>, vector<32x32xf32>
    tpu.vector_store %arg4[%c0_5, %c0_6], %6 {strides = array<i32>} : memref<32x32xf32, #tpu.memory_space<vmem>>, vector<32x32xf32>,
    return
  }
  func.func @transform_0(%arg0: i32) -> (i32, i32) {
    %c0_i32 = arith.constant 0 : i32
    %c0_i32_0 = arith.constant 0 : i32
    return %arg0, %c0_i32 : i32, i32
  }
  func.func @transform_1(%arg0: i32) -> (i32, i32) {
    %c0_i32 = arith.constant 0 : i32
    %c0_i32_0 = arith.constant 0 : i32
    %c0_i32_1 = arith.constant 0 : i32
    return %c0_i32, %c0_i32_0 : i32, i32
  }
  func.func @transform_2(%arg0: i32) -> (i32, i32) {
    %c0_i32 = arith.constant 0 : i32
    %c0_i32_0 = arith.constant 0 : i32
    %c0_i32_1 = arith.constant 0 : i32
    return %c0_i32, %c0_i32_0 : i32, i32
  }
  func.func @transform_3(%arg0: i32) -> (i32, i32) {
    %c0_i32 = arith.constant 0 : i32
    %c0_i32_0 = arith.constant 0 : i32
    return %arg0, %c0_i32 : i32, i32
  }
}

module attributes {stable_mosaic.version = 11 : i64} {
  func.func @_matmul_bias_kernel(%arg0: i32, %arg1: memref<8x512xf32, #tpu.memory_space<vmem>>, %arg2: memref<512x32xbf16, #tpu.memory_space<vmem>>, %arg3: memref<1x32xf32, #tpu.memory_space<vmem>>, %arg4: memref<8x32xf32, #tpu.memory_space<vmem>>) attributes {dimension_semantics = [#tpu.dimension_semantics<parallel>], iteration_bounds = array<i64: 1>, scalar_prefetch = 0 : i64, scratch_operands = 0 : i64, tpu.core_type = #tpu.core_type<tc>, window_params = [{transform_indices = @transform_0, window_bounds = array<i64: 8, 512>}, {pipeline_mode = #tpu.pipeline_mode<synchronous>, transform_indices = @transform_1, window_bounds = array<i64: 512, 32>}, {pipeline_mode = #tpu.pipeline_mode<synchronous>, transform_indices = @transform_2, window_bounds = array<i64: 1, 32>}, {transform_indices = @transform_3, window_bounds = array<i64: 8, 32>}]} {
    %c0 = arith.constant 0 : index
    %c0_0 = arith.constant 0 : index
    %0 = vector.load %arg1[%c0, %c0_0] : memref<8x512xf32, #tpu.memory_space<vmem>>, vector<8x512xf32>
    %1 = arith.truncf %0 : vector<8x512xf32> to vector<8x512xbf16>
    %c0_1 = arith.constant 0 : index
    %c0_2 = arith.constant 0 : index
    %2 = vector.load %arg2[%c0_1, %c0_2] : memref<512x32xbf16, #tpu.memory_space<vmem>>, vector<512x32xbf16>
    %cst = arith.constant dense<0.000000e+00> : vector<8x32xf32>
    %3 = tpu.matmul %1, %2, %cst {dimension_numbers = #tpu.dot_dimension_numbers<[1], [0], [0], [1], [0, 0, 1, 1], [], []>} : vector<8x512xbf16>, vector<512x32xbf16>, vector<8x32xf32> -> vector<8x32xf32>
    %c0_3 = arith.constant 0 : index
    %c0_4 = arith.constant 0 : index
    %4 = vector.load %arg3[%c0_3, %c0_4] : memref<1x32xf32, #tpu.memory_space<vmem>>, vector<1x32xf32>
    %5 = vector.broadcast %4 : vector<1x32xf32> to vector<8x32xf32>
    %6 = arith.addf %3, %5 : vector<8x32xf32>
    %c0_5 = arith.constant 0 : index
    %c0_6 = arith.constant 0 : index
    %7 = vector.load %arg4[%c0_5, %c0_6] : memref<8x32xf32, #tpu.memory_space<vmem>>, vector<8x32xf32>
    tpu.vector_store %arg4[%c0_5, %c0_6], %6 {strides = array<i32>} : memref<8x32xf32, #tpu.memory_space<vmem>>, vector<8x32xf32>,
    return
  }
  func.func @transform_0(%arg0: i32) -> (i32, i32) {
    %c0_i32 = arith.constant 0 : i32
    %c0_i32_0 = arith.constant 0 : i32
    return %arg0, %c0_i32 : i32, i32
  }
  func.func @transform_1(%arg0: i32) -> (i32, i32) {
    %c0_i32 = arith.constant 0 : i32
    %c0_i32_0 = arith.constant 0 : i32
    %c0_i32_1 = arith.constant 0 : i32
    return %c0_i32, %c0_i32_0 : i32, i32
  }
  func.func @transform_2(%arg0: i32) -> (i32, i32) {
    %c0_i32 = arith.constant 0 : i32
    %c0_i32_0 = arith.constant 0 : i32
    %c0_i32_1 = arith.constant 0 : i32
    return %c0_i32, %c0_i32_0 : i32, i32
  }
  func.func @transform_3(%arg0: i32) -> (i32, i32) {
    %c0_i32 = arith.constant 0 : i32
    %c0_i32_0 = arith.constant 0 : i32
    return %arg0, %c0_i32 : i32, i32
  }
}

module attributes {stable_mosaic.version = 11 : i64} {
  func.func @_matmul_bias_kernel(%arg0: i32, %arg1: memref<32x32xf32, #tpu.memory_space<vmem>>, %arg2: memref<32x64xbf16, #tpu.memory_space<vmem>>, %arg3: memref<1x64xf32, #tpu.memory_space<vmem>>, %arg4: memref<32x64xf32, #tpu.memory_space<vmem>>) attributes {dimension_semantics = [#tpu.dimension_semantics<parallel>], iteration_bounds = array<i64: 1>, scalar_prefetch = 0 : i64, scratch_operands = 0 : i64, tpu.core_type = #tpu.core_type<tc>, window_params = [{transform_indices = @transform_0, window_bounds = array<i64: 32, 32>}, {pipeline_mode = #tpu.pipeline_mode<synchronous>, transform_indices = @transform_1, window_bounds = array<i64: 32, 64>}, {pipeline_mode = #tpu.pipeline_mode<synchronous>, transform_indices = @transform_2, window_bounds = array<i64: 1, 64>}, {transform_indices = @transform_3, window_bounds = array<i64: 32, 64>}]} {
    %c0 = arith.constant 0 : index
    %c0_0 = arith.constant 0 : index
    %0 = vector.load %arg1[%c0, %c0_0] : memref<32x32xf32, #tpu.memory_space<vmem>>, vector<32x32xf32>
    %1 = arith.truncf %0 : vector<32x32xf32> to vector<32x32xbf16>
    %c0_1 = arith.constant 0 : index
    %c0_2 = arith.constant 0 : index
    %2 = vector.load %arg2[%c0_1, %c0_2] : memref<32x64xbf16, #tpu.memory_space<vmem>>, vector<32x64xbf16>
    %cst = arith.constant dense<0.000000e+00> : vector<32x64xf32>
    %3 = tpu.matmul %1, %2, %cst {dimension_numbers = #tpu.dot_dimension_numbers<[1], [0], [0], [1], [0, 0, 1, 1], [], []>} : vector<32x32xbf16>, vector<32x64xbf16>, vector<32x64xf32> -> vector<32x64xf32>
    %c0_3 = arith.constant 0 : index
    %c0_4 = arith.constant 0 : index
    %4 = vector.load %arg3[%c0_3, %c0_4] : memref<1x64xf32, #tpu.memory_space<vmem>>, vector<1x64xf32>
    %5 = vector.broadcast %4 : vector<1x64xf32> to vector<32x64xf32>
    %6 = arith.addf %3, %5 : vector<32x64xf32>
    %c0_5 = arith.constant 0 : index
    %c0_6 = arith.constant 0 : index
    %7 = vector.load %arg4[%c0_5, %c0_6] : memref<32x64xf32, #tpu.memory_space<vmem>>, vector<32x64xf32>
    tpu.vector_store %arg4[%c0_5, %c0_6], %6 {strides = array<i32>} : memref<32x64xf32, #tpu.memory_space<vmem>>, vector<32x64xf32>,
    return
  }
  func.func @transform_0(%arg0: i32) -> (i32, i32) {
    %c0_i32 = arith.constant 0 : i32
    %c0_i32_0 = arith.constant 0 : i32
    return %arg0, %c0_i32 : i32, i32
  }
  func.func @transform_1(%arg0: i32) -> (i32, i32) {
    %c0_i32 = arith.constant 0 : i32
    %c0_i32_0 = arith.constant 0 : i32
    %c0_i32_1 = arith.constant 0 : i32
    return %c0_i32, %c0_i32_0 : i32, i32
  }
  func.func @transform_2(%arg0: i32) -> (i32, i32) {
    %c0_i32 = arith.constant 0 : i32
    %c0_i32_0 = arith.constant 0 : i32
    %c0_i32_1 = arith.constant 0 : i32
    return %c0_i32, %c0_i32_0 : i32, i32
  }
  func.func @transform_3(%arg0: i32) -> (i32, i32) {
    %c0_i32 = arith.constant 0 : i32
    %c0_i32_0 = arith.constant 0 : i32
    return %arg0, %c0_i32 : i32, i32
  }
}

</mosaic_0001>

<bundles_post_ra>
// kernel: _lambda_.17
= control target key start
LH: loop header
LB: loop body
LE: loop exit
PB: predicated region body
PF: predicated region fallthrough
CT: control target
= control target key end

     0   :  { %8 = vsyncpa [#allocation3], 0  ;;  %s523_s12 = smov [#allocation2]   ;;  %s576_s0 = inlined_call_operand.vmem [shape: f32[8,512], index: 0, kind: input, shape index: {}]   ;;  %s577_s1 = inlined_call_operand.hbm [shape: bf16[512,32], index: 1, kind: input, shape index: {}]   ;;  %s578_s2 = inlined_call_operand.vmem [shape: f32[1,32], index: 2, kind: input, shape index: {}]   ;;  %s579_s3 = inlined_call_operand.vmem [shape: f32[8,32], index: 3, kind: output, shape index: {}]  }
   0x1   :  { %s16_s13 = sshll.u32 %s523_s12, 4  ;;  %s499_s16 = scalar_lea.hbm %s577_s1, 4096  ;;  %s17_s13 = int_to_ptr.vmem [resolvable:$true] %s16_s13 }
   0x2   :  { %p500_p0 = scmp.ne.s32.totalorder %s577_s1, %s499_s16  ;;  %p503_p1 = scmp.lt.u32.totalorder %s499_s16, %s577_s1 }
   0x4   :  { %p505_p2 = pnand %p503_p1, %p500_p0 }
   0x6   :  { %508 = shalt.err (!%p505_p2)
}
   0x7   :  { %s509_s21 = scalar_lea.vmem %s17_s13, 4096  ;;  %p514_p4 = scmp.lt.s32.totalorder %s17_s13, %s17_s13 }
   0x8   :  { %p510_p3 = scmp.ne.s32.totalorder %s17_s13, %s509_s21  ;;  %p515_p5 = scmp.lt.s32.totalorder %s509_s21, %s509_s21 }
   0xa   :  { %p516_p6 = por %p515_p5, %p514_p4 }
   0xc   :  { %p517_p7 = pnand %p516_p6, %p510_p3 }
   0xe   :  { %520 = shalt.err (!%p517_p7)
}
   0xf   :  { %s524_s22 = smov 64   ;;  %s525_s23 = smov 4  }
  0x10   :  { %22 = dma.hbm_to_vmem [thread:$0]  %s577_s1, 4096, %s17_s13, [#allocation3], %s524_s22, %s524_s22, %s525_s23  }
  0x11   :  { %521 = dma.done.wait [#allocation3], 4096  }
  0x12   :  { %522 = vsyncadd [#allocation3], 4294963200  ;;  %v467_v0 = vld [vmem:[#allocation2 + $0x40] sm:$0xff]   ;;  %v471_v4 = vld [vmem:[#allocation2 + $0x48] sm:$0xff]   ;;  %vm380_vm0 = vcmask 261120  }
  0x13   :  { %v468_v1 = vld [vmem:[#allocation2 + $0xc0] sm:$0xff]   ;;  %420 = vmatprep.subr.bf16.mxu0 %v467_v0  ;;  %v472_v5 = vld [vmem:[#allocation2 + $0xc8] sm:$0xff]   ;;  %v475_v8 = vld [vmem:[#allocation2 + $0x50] sm:$0xff]  }
  0x14   :  { %v469_v2 = vld [vmem:[#allocation2] sm:$0xff]   ;;  %442 = vmatprep.subr.bf16.mxu1 %v468_v1  ;;  %v473_v6 = vld [vmem:[#allocation2 + $0x8] sm:$0xff]   ;;  %v476_v9 = vld [vmem:[#allocation2 + $0xd0] sm:$0xff]  }
  0x15   :  { %v470_v3 = vld [vmem:[#allocation2 + $0x80] sm:$0xff]   ;;  %421 = vmatpush3.bf16.msra.mxu0 %v469_v2  ;;  %v474_v7 = vld [vmem:[#allocation2 + $0x88] sm:$0xff]   ;;  %v477_v10 = vld [vmem:[#allocation2 + $0x10] sm:$0xff]  }
  0x16   :  { %443 = vmatpush3.bf16.msra.mxu1 %v470_v3  ;;  %422 = vmatprep.subr.bf16.mxu0 %v471_v4  ;;  %v478_v11 = vld [vmem:[#allocation2 + $0x90] sm:$0xff]   ;;  %v479_v12 = vld [vmem:[#allocation2 + $0x58] sm:$0xff]   ;;  %v483_v16 = vld [vmem:[#allocation2 + $0x60] sm:$0xff]  }
  0x17   :  { %444 = vmatprep.subr.bf16.mxu1 %v472_v5  ;;  %v480_v13 = vld [vmem:[#allocation2 + $0xd8] sm:$0xff]   ;;  %v484_v17 = vld [vmem:[#allocation2 + $0xe0] sm:$0xff]   ;;  %v487_v20 = vld [vmem:[#allocation2 + $0x68] sm:$0xff]  }
  0x18   :  { %v481_v14 = vld [vmem:[#allocation2 + $0x18] sm:$0xff]   ;;  %v485_v18 = vld [vmem:[#allocation2 + $0x20] sm:$0xff]   ;;  %v488_v21 = vld [vmem:[#allocation2 + $0xe8] sm:$0xff]  }
  0x19   :  { %423 = vmatpush3.bf16.msra.mxu0 %v473_v6  ;;  %v482_v15 = vld [vmem:[#allocation2 + $0x98] sm:$0xff]   ;;  %v486_v19 = vld [vmem:[#allocation2 + $0xa0] sm:$0xff]   ;;  %v489_v22 = vld [vmem:[#allocation2 + $0x28] sm:$0xff]  }
  0x1a   :  { %445 = vmatpush3.bf16.msra.mxu1 %v474_v7  ;;  %424 = vmatprep.subr.bf16.mxu0 %v475_v8  ;;  %v490_v23 = vld [vmem:[#allocation2 + $0xa8] sm:$0xff]   ;;  %v491_v24 = vld [vmem:[#allocation2 + $0x70] sm:$0xff]   ;;  %v495_v28 = vld [vmem:[#allocation2 + $0x78] sm:$0xff]  }
  0x1b   :  { %446 = vmatprep.subr.bf16.mxu1 %v476_v9  ;;  %v492_v25 = vld [vmem:[#allocation2 + $0xf0] sm:$0xff]   ;;  %v496_v29 = vld [vmem:[#allocation2 + $0xf8] sm:$0xff]   ;;  %v30_v32 = vld [vmem:[%s576_s0 + $0x8] sm:$0xff] }
  0x1c   :  { %v493_v26 = vld [vmem:[#allocation2 + $0x30] sm:$0xff]   ;;  %v497_v30 = vld [vmem:[#allocation2 + $0x38] sm:$0xff]   ;;  %v29_v34 = vld [vmem:[%s576_s0] sm:$0xff]  ;;  %v34_v35 = vpack.c.bf16 %v30_v32, %v30_v32 }
  0x1d   :  { %425 = vmatpush3.bf16.msra.mxu0 %v477_v10  ;;  %v494_v27 = vld [vmem:[#allocation2 + $0xb0] sm:$0xff]   ;;  %v498_v31 = vld [vmem:[#allocation2 + $0xb8] sm:$0xff]   ;;  %v33_v37 = vpack.c.bf16 %v29_v34, %v29_v34  ;;  %v387_v42 = vld [vmem:[%s578_s2] ss:$0 sm:$0xff] }
  0x1e   :  { %447 = vmatpush3.bf16.msra.mxu1 %v478_v11  ;;  %426 = vmatprep.subr.bf16.mxu0 %v479_v12  ;;  %v32_v33 = vld [vmem:[%s576_s0 + $0x18] sm:$0xff]  ;;  %v31_v38 = vld [vmem:[%s576_s0 + $0x10] sm:$0xff] }
  0x1f   :  { %448 = vmatprep.subr.bf16.mxu1 %v480_v13  ;;  %v36_v36 = vpack.c.bf16 %v32_v33, %v32_v33  ;;  %v35_v39 = vpack.c.bf16 %v31_v38, %v31_v38  ;;  %332 = vmatprep.mubr.bf16.mxu0 %v34_v35 }
  0x21   :  { %427 = vmatpush3.bf16.msra.mxu0 %v481_v14  ;;  %372 = vmatprep.mubr.bf16.mxu1 %v36_v36 }
  0x22   :  { %449 = vmatpush3.bf16.msra.mxu1 %v482_v15  ;;  %428 = vmatprep.subr.bf16.mxu0 %v483_v16 }
  0x23   :  { %450 = vmatprep.subr.bf16.mxu1 %v484_v17 }
  0x25   :  { %429 = vmatpush3.bf16.msra.mxu0 %v485_v18 }
  0x26   :  { %451 = vmatpush3.bf16.msra.mxu1 %v486_v19  ;;  %430 = vmatprep.subr.bf16.mxu0 %v487_v20 }
  0x27   :  { %452 = vmatprep.subr.bf16.mxu1 %v488_v21 }
  0x29   :  { %431 = vmatpush3.bf16.msra.mxu0 %v489_v22 }
  0x2a   :  { %453 = vmatpush3.bf16.msra.mxu1 %v490_v23  ;;  %432 = vmatprep.subr.bf16.mxu0 %v491_v24 }
  0x2b   :  { %454 = vmatprep.subr.bf16.mxu1 %v492_v25 }
  0x2d   :  { %433 = vmatpush3.bf16.msra.mxu0 %v493_v26 }
  0x2e   :  { %455 = vmatpush3.bf16.msra.mxu1 %v494_v27  ;;  %434 = vmatprep.subr.bf16.mxu0 %v495_v28 }
  0x2f   :  { %456 = vmatprep.subr.bf16.mxu1 %v496_v29 }
  0x31   :  { %435 = vmatpush3.bf16.msra.mxu0 %v497_v30 }
  0x32   :  { %457 = vmatpush3.bf16.msra.mxu1 %v498_v31 }
  0x34   :  { %333 = vmatmul.mubr.bf16.vlgmr.msra.gmra.mrb[0].mxu0 %v33_v37 }
  0x35   :  { %373 = vmatmul.mubr.bf16.vlgmr.msra.gmra.mrb[0].mxu1 %v35_v39 }
 0x107   :  { %v436_v40 = vpop.f32.mrb[0].mxu0 }
 0x108   :  { %v458_v41 = vpop.f32.mrb[0].mxu1  ;;  %v437_v43 = vpop.f32.mrb[1].mxu0 }
 0x109   :  { %v459_v44 = vpop.f32.mrb[1].mxu1  ;;  %v438_v45 = vadd.f32 %v437_v43, %v436_v40  ;;  %v439_v47 = vpop.f32.mrb[2].mxu0 }
 0x10a   :  { %v460_v46 = vadd.f32 %v459_v44, %v458_v41  ;;  %v461_v48 = vpop.f32.mrb[2].mxu1  ;;  %v440_v49 = vpop.f32.mrb[3].mxu0 }
 0x10b   :  { %v462_v50 = vpop.f32.mrb[3].mxu1  ;;  %v335_v51 = vadd.f32 %v438_v45, %v387_v42 }
 0x10d   :  { %v375_v52 = vadd.f32 %v460_v46, %v335_v51 }
 0x10f   :  { %381 = vst.msk [vmem:[%s579_s3] sm:$0xff] %vm380_vm0, %v375_v52 }
 0x110   :  { %386 = vsyncpa [#allocation3], 1 }

// kernel: _lambda_.15
= control target key start
LH: loop header
LB: loop body
LE: loop exit
PB: predicated region body
PF: predicated region fallthrough
CT: control target
= control target key end

     0   :  { %vm60_vm0 = vcmask 523264   ;;  %vm116_vm1 = vcmask 261120   ;;  %s213_s1 = inlined_call_operand.vmem [shape: bf16[64,32], index: 1, kind: input, shape index: {}]   ;;  %s214_s0 = inlined_call_operand.vmem [shape: f32[32,64], index: 0, kind: input, shape index: {}]   ;;  %s215_s2 = inlined_call_operand.vmem [shape: f32[1,32], index: 2, kind: input, shape index: {}]   ;;  %s216_s3 = inlined_call_operand.vmem [shape: f32[32,32], index: 3, kind: output, shape index: {}]  }
   0x1   :  { %v150_v0 = vld [vmem:[%s213_s1] sm:$0xff]   ;;  %v151_v1 = vld [vmem:[%s213_s1 + $0x8] sm:$0xff]   ;;  %v152_v2 = vld [vmem:[%s213_s1 + $0x10] sm:$0xff]  }
   0x2   :  { %138 = vmatprep.subr.bf16.mxu0 %v150_v0  ;;  %v15_v3 = vld [vmem:[%s214_s0] sm:$0xff]  ;;  %v16_v4 = vld [vmem:[%s214_s0 + $0x8] sm:$0xff]  ;;  %v153_v6 = vld [vmem:[%s213_s1 + $0x18] sm:$0xff]  }
   0x3   :  { %139 = vmatpush3.bf16.msra.mxu0 %v150_v0  ;;  %v19_v5 = vpack.c.bf16 %v16_v4, %v15_v3  ;;  %v17_v7 = vld [vmem:[%s214_s0 + $0x10] sm:$0xff]  ;;  %v18_v8 = vld [vmem:[%s214_s0 + $0x18] sm:$0xff]  ;;  %v125_v10 = vld [vmem:[%s215_s2] ss:$0 sm:$0xff] }
   0x4   :  { %140 = vmatprep.subr.bf16.mxu0 %v151_v1  ;;  %v20_v9 = vpack.c.bf16 %v18_v8, %v17_v7 }
   0x5   :  { %146 = vmatprep.mubr.msk.bf16.mxu0 %vm60_vm0, %v19_v5 }
   0x7   :  { %141 = vmatpush3.bf16.msra.mxu0 %v151_v1 }
   0x8   :  { %142 = vmatprep.subr.bf16.mxu0 %v152_v2 }
   0xb   :  { %143 = vmatpush3.bf16.msra.mxu0 %v152_v2 }
   0xc   :  { %144 = vmatprep.subr.bf16.mxu0 %v153_v6 }
   0xf   :  { %145 = vmatpush3.bf16.msra.mxu0 %v153_v6 }
  0x12   :  { %147 = vmatmul.mubr.msk.bf16.vlgmr.msra.gmra.mrb[0].mxu0 %vm60_vm0, %v20_v9 }
  0xe5   :  { %v148_v11 = vpop.f32.mrb[0].mxu0 }
  0xe6   :  { %v110_v12 = vadd.f32 %v148_v11, %v125_v10  ;;  %v101_v13 = vpop.f32.mrb[1].mxu0 }
  0xe7   :  { %v102_v14 = vadd.f32 %v125_v10, %v101_v13  ;;  %v149_v15 = vpop.f32.mrb[2].mxu0 }
  0xe8   :  { %119 = vst.msk [vmem:[%s216_s3 + $0x10] sm:$0xff] %vm116_vm1, %v110_v12  ;;  %v113_v16 = vadd.f32 %v149_v15, %v125_v10  ;;  %v104_v17 = vpop.f32.mrb[3].mxu0 }
  0xe9   :  { %117 = vst.msk [vmem:[%s216_s3] sm:$0xff] %vm116_vm1, %v102_v14  ;;  %v105_v18 = vadd.f32 %v125_v10, %v104_v17 }
  0xea   :  { %120 = vst.msk [vmem:[%s216_s3 + $0x18] sm:$0xff] %vm116_vm1, %v113_v16 }
  0xeb   :  { %118 = vst.msk [vmem:[%s216_s3 + $0x8] sm:$0xff] %vm116_vm1, %v105_v18 }

// kernel: _lambda_.16
= control target key start
LH: loop header
LB: loop body
LE: loop exit
PB: predicated region body
PF: predicated region fallthrough
CT: control target
= control target key end

     0   :  { %vm589_vm0 = vcmask 261120   ;;  %s1046_s1 = inlined_call_operand.vmem [shape: bf16[768,32], index: 1, kind: input, shape index: {}]   ;;  %s1047_s0 = inlined_call_operand.vmem [shape: f32[32,768], index: 0, kind: input, shape index: {}]   ;;  %s1048_s2 = inlined_call_operand.vmem [shape: f32[1,32], index: 2, kind: input, shape index: {}]   ;;  %s1049_s3 = inlined_call_operand.vmem [shape: f32[32,32], index: 3, kind: output, shape index: {}]  }
   0x1   :  { %v747_v0 = vld [vmem:[%s1046_s1 + $0x40] sm:$0xff]   ;;  %v751_v4 = vld [vmem:[%s1046_s1 + $0x48] sm:$0xff]   ;;  %v755_v8 = vld [vmem:[%s1046_s1 + $0x50] sm:$0xff]  }
   0x2   :  { %v748_v1 = vld [vmem:[%s1046_s1 + $0xc0] sm:$0xff]   ;;  %647 = vmatprep.subr.bf16.mxu0 %v747_v0  ;;  %v752_v5 = vld [vmem:[%s1046_s1 + $0xc8] sm:$0xff]   ;;  %v756_v9 = vld [vmem:[%s1046_s1 + $0xd0] sm:$0xff]  }
   0x3   :  { %v749_v2 = vld [vmem:[%s1046_s1] sm:$0xff]   ;;  %675 = vmatprep.subr.bf16.mxu1 %v748_v1  ;;  %v753_v6 = vld [vmem:[%s1046_s1 + $0x8] sm:$0xff]   ;;  %v757_v10 = vld [vmem:[%s1046_s1 + $0x10] sm:$0xff]  }
   0x4   :  { %v750_v3 = vld [vmem:[%s1046_s1 + $0x80] sm:$0xff]   ;;  %648 = vmatpush3.bf16.msra.mxu0 %v749_v2  ;;  %v754_v7 = vld [vmem:[%s1046_s1 + $0x88] sm:$0xff]   ;;  %v758_v11 = vld [vmem:[%s1046_s1 + $0x90] sm:$0xff]  }
   0x5   :  { %676 = vmatpush3.bf16.msra.mxu1 %v750_v3  ;;  %649 = vmatprep.subr.bf16.mxu0 %v751_v4  ;;  %v759_v12 = vld [vmem:[%s1046_s1 + $0x58] sm:$0xff]   ;;  %v763_v16 = vld [vmem:[%s1046_s1 + $0x60] sm:$0xff]   ;;  %v767_v20 = vld [vmem:[%s1046_s1 + $0x68] sm:$0xff]  }
   0x6   :  { %677 = vmatprep.subr.bf16.mxu1 %v752_v5  ;;  %v760_v13 = vld [vmem:[%s1046_s1 + $0xd8] sm:$0xff]   ;;  %v764_v17 = vld [vmem:[%s1046_s1 + $0xe0] sm:$0xff]   ;;  %v768_v21 = vld [vmem:[%s1046_s1 + $0xe8] sm:$0xff]  }
   0x7   :  { %v761_v14 = vld [vmem:[%s1046_s1 + $0x18] sm:$0xff]   ;;  %v765_v18 = vld [vmem:[%s1046_s1 + $0x20] sm:$0xff]   ;;  %v769_v22 = vld [vmem:[%s1046_s1 + $0x28] sm:$0xff]  }
   0x8   :  { %650 = vmatpush3.bf16.msra.mxu0 %v753_v6  ;;  %v762_v15 = vld [vmem:[%s1046_s1 + $0x98] sm:$0xff]   ;;  %v766_v19 = vld [vmem:[%s1046_s1 + $0xa0] sm:$0xff]   ;;  %v770_v23 = vld [vmem:[%s1046_s1 + $0xa8] sm:$0xff]  }
   0x9   :  { %678 = vmatpush3.bf16.msra.mxu1 %v754_v7  ;;  %651 = vmatprep.subr.bf16.mxu0 %v755_v8  ;;  %v771_v24 = vld [vmem:[%s1046_s1 + $0x70] sm:$0xff]   ;;  %v775_v28 = vld [vmem:[%s1046_s1 + $0x78] sm:$0xff]   ;;  %v16_v32 = vld [vmem:[%s1047_s0 + $0x8] sm:$0xff] }
   0xa   :  { %679 = vmatprep.subr.bf16.mxu1 %v756_v9  ;;  %v772_v25 = vld [vmem:[%s1046_s1 + $0xf0] sm:$0xff]   ;;  %v776_v29 = vld [vmem:[%s1046_s1 + $0xf8] sm:$0xff]   ;;  %v24_v36 = vld [vmem:[%s1047_s0 + $0x48] sm:$0xff] }
   0xb   :  { %v773_v26 = vld [vmem:[%s1046_s1 + $0x30] sm:$0xff]   ;;  %v777_v30 = vld [vmem:[%s1046_s1 + $0x38] sm:$0xff]   ;;  %v15_v37 = vld [vmem:[%s1047_s0] sm:$0xff] }
   0xc   :  { %652 = vmatpush3.bf16.msra.mxu0 %v757_v10  ;;  %v774_v27 = vld [vmem:[%s1046_s1 + $0xb0] sm:$0xff]   ;;  %v778_v31 = vld [vmem:[%s1046_s1 + $0xb8] sm:$0xff]   ;;  %v23_v42 = vld [vmem:[%s1047_s0 + $0x40] sm:$0xff] }
   0xd   :  { %680 = vmatpush3.bf16.msra.mxu1 %v758_v11  ;;  %653 = vmatprep.subr.bf16.mxu0 %v759_v12  ;;  %v22_v33 = vld [vmem:[%s1047_s0 + $0x38] sm:$0xff]  ;;  %v21_v38 = vld [vmem:[%s1047_s0 + $0x30] sm:$0xff]  ;;  %v779_v44 = vld [vmem:[%s1046_s1 + $0x140] sm:$0xff]  }
   0xe   :  { %681 = vmatprep.subr.bf16.mxu1 %v760_v13  ;;  %v18_v34 = vld [vmem:[%s1047_s0 + $0x18] sm:$0xff]  ;;  %v40_v35 = vpack.c.bf16 %v22_v33, %v16_v32  ;;  %v39_v40 = vpack.c.bf16 %v21_v38, %v15_v37  ;;  %v17_v41 = vld [vmem:[%s1047_s0 + $0x10] sm:$0xff]  ;;  %v780_v45 = vld [vmem:[%s1046_s1 + $0x100] sm:$0xff]  }
   0xf   :  { %v42_v39 = vpack.c.bf16 %v24_v36, %v18_v34  ;;  %v41_v43 = vpack.c.bf16 %v23_v42, %v17_v41  ;;  %v781_v46 = vld [vmem:[%s1046_s1 + $0x148] sm:$0xff]   ;;  %v783_v48 = vld [vmem:[%s1046_s1 + $0x150] sm:$0xff]   ;;  %v785_v50 = vld [vmem:[%s1046_s1 + $0x158] sm:$0xff]  }
  0x10   :  { %654 = vmatpush3.bf16.msra.mxu0 %v761_v14  ;;  %474 = vmatprep.mubr.bf16.mxu0 %v40_v35  ;;  %v782_v47 = vld [vmem:[%s1046_s1 + $0x108] sm:$0xff]   ;;  %v784_v49 = vld [vmem:[%s1046_s1 + $0x110] sm:$0xff]   ;;  %v786_v51 = vld [vmem:[%s1046_s1 + $0x118] sm:$0xff]  }
  0x11   :  { %682 = vmatpush3.bf16.msra.mxu1 %v762_v15  ;;  %655 = vmatprep.subr.bf16.mxu0 %v763_v16  ;;  %v28_v52 = vld [vmem:[%s1047_s0 + $0x68] sm:$0xff]  ;;  %v34_v53 = vld [vmem:[%s1047_s0 + $0x98] sm:$0xff]  ;;  %v27_v54 = vld [vmem:[%s1047_s0 + $0x60] sm:$0xff] }
  0x12   :  { %683 = vmatprep.subr.bf16.mxu1 %v764_v17  ;;  %523 = vmatprep.mubr.bf16.mxu1 %v42_v39  ;;  %v33_v55 = vld [vmem:[%s1047_s0 + $0x90] sm:$0xff]  ;;  %v46_v56 = vpack.c.bf16 %v34_v53, %v28_v52  ;;  %v30_v58 = vld [vmem:[%s1047_s0 + $0x78] sm:$0xff]  ;;  %v36_v59 = vld [vmem:[%s1047_s0 + $0xa8] sm:$0xff] }
  0x13   :  { %v45_v57 = vpack.c.bf16 %v33_v55, %v27_v54  ;;  %v787_v60 = vld [vmem:[%s1046_s1 + $0x160] sm:$0xff]   ;;  %v48_v61 = vpack.c.bf16 %v36_v59, %v30_v58  ;;  %v29_v62 = vld [vmem:[%s1047_s0 + $0x70] sm:$0xff]  ;;  %v789_v2 = vld [vmem:[%s1046_s1 + $0x168] sm:$0xff]  }
  0x14   :  { %656 = vmatpush3.bf16.msra.mxu0 %v765_v18  ;;  %v35_v63 = vld [vmem:[%s1047_s0 + $0xa0] sm:$0xff]  ;;  %v20_v3 = vld [vmem:[%s1047_s0 + $0x28] sm:$0xff]  ;;  %v26_v4 = vld [vmem:[%s1047_s0 + $0x58] sm:$0xff] }
  0x15   :  { %684 = vmatpush3.bf16.msra.mxu1 %v766_v19  ;;  %657 = vmatprep.subr.bf16.mxu0 %v767_v20  ;;  %v47_v0 = vpack.c.bf16 %v35_v63, %v29_v62  ;;  %v788_v1 = vld [vmem:[%s1046_s1 + $0x120] sm:$0xff]   ;;  %v790_v5 = vld [vmem:[%s1046_s1 + $0x128] sm:$0xff]   ;;  %v44_v6 = vpack.c.bf16 %v26_v4, %v20_v3  ;;  %v38_v8 = vld [vmem:[%s1047_s0 + $0xb8] sm:$0xff] }
  0x16   :  { %685 = vmatprep.subr.bf16.mxu1 %v768_v21  ;;  %v32_v7 = vld [vmem:[%s1047_s0 + $0x88] sm:$0xff]  ;;  %v791_v9 = vld [vmem:[%s1046_s1 + $0x170] sm:$0xff]   ;;  %v793_v12 = vld [vmem:[%s1046_s1 + $0x178] sm:$0xff]  }
  0x17   :  { %v50_v10 = vpack.c.bf16 %v38_v8, %v32_v7  ;;  %v792_v11 = vld [vmem:[%s1046_s1 + $0x130] sm:$0xff]   ;;  %v794_v13 = vld [vmem:[%s1046_s1 + $0x138] sm:$0xff]   ;;  %v19_v14 = vld [vmem:[%s1047_s0 + $0x20] sm:$0xff] }
  0x18   :  { %658 = vmatpush3.bf16.msra.mxu0 %v769_v22  ;;  %v25_v15 = vld [vmem:[%s1047_s0 + $0x50] sm:$0xff]  ;;  %v31_v16 = vld [vmem:[%s1047_s0 + $0x80] sm:$0xff] }
  0x19   :  { %686 = vmatpush3.bf16.msra.mxu1 %v770_v23  ;;  %659 = vmatprep.subr.bf16.mxu0 %v771_v24  ;;  %v37_v17 = vld [vmem:[%s1047_s0 + $0xb0] sm:$0xff]  ;;  %v43_v18 = vpack.c.bf16 %v25_v15, %v19_v14  ;;  %v598_v22 = vld [vmem:[%s1048_s2] ss:$0 sm:$0xff] }
  0x1a   :  { %687 = vmatprep.subr.bf16.mxu1 %v772_v25  ;;  %v49_v19 = vpack.c.bf16 %v37_v17, %v31_v16 }
  0x1c   :  { %660 = vmatpush3.bf16.msra.mxu0 %v773_v26 }
  0x1d   :  { %688 = vmatpush3.bf16.msra.mxu1 %v774_v27  ;;  %661 = vmatprep.subr.bf16.mxu0 %v775_v28 }
  0x1e   :  { %689 = vmatprep.subr.bf16.mxu1 %v776_v29 }
  0x20   :  { %662 = vmatpush3.bf16.msra.mxu0 %v777_v30 }
  0x21   :  { %690 = vmatpush3.bf16.msra.mxu1 %v778_v31  ;;  %703 = vmatprep.subr.bf16.mxu0 %v779_v44 }
  0x22   :  { %731 = vmatprep.subr.bf16.mxu1 %v779_v44 }
  0x23   :  { %475 = vmatmul.mubr.bf16.vlgmr.msra.gmra.mrb[0].mxu0 %v39_v40 }
  0x24   :  { %524 = vmatmul.mubr.bf16.vlgmr.msra.gmra.mrb[0].mxu1 %v41_v43  ;;  %704 = vmatpush3.bf16.msra.mxu0 %v780_v45 }
  0x25   :  { %739 = vmatpush3.bf16.msra.mxu1 %v780_v45  ;;  %705 = vmatprep.subr.bf16.mxu0 %v781_v46 }
  0x26   :  { %732 = vmatprep.subr.bf16.mxu1 %v781_v46  ;;  %482 = vmatprep.mubr.bf16.mxu0 %v46_v56 }
  0x27   :  { %531 = vmatprep.mubr.bf16.mxu1 %v48_v61 }
  0x28   :  { %706 = vmatpush3.bf16.msra.mxu0 %v782_v47 }
  0x29   :  { %740 = vmatpush3.bf16.msra.mxu1 %v782_v47  ;;  %707 = vmatprep.subr.bf16.mxu0 %v783_v48 }
  0x2a   :  { %733 = vmatprep.subr.bf16.mxu1 %v783_v48 }
  0x2b   :  { %483 = vmatmul.mubr.bf16.gmra.mrb[4].mxu0 %v45_v57 }
  0x2c   :  { %708 = vmatpush3.bf16.msra.mxu0 %v784_v49  ;;  %532 = vmatmul.mubr.bf16.gmra.mrb[4].mxu1 %v47_v0 }
  0x2d   :  { %741 = vmatpush3.bf16.msra.mxu1 %v784_v49  ;;  %709 = vmatprep.subr.bf16.mxu0 %v785_v50 }
  0x2e   :  { %734 = vmatprep.subr.bf16.mxu1 %v785_v50  ;;  %572 = vmatprep.mubr.bf16.mxu0 %v44_v6 }
  0x2f   :  { %580 = vmatprep.mubr.bf16.mxu1 %v50_v10 }
  0x30   :  { %710 = vmatpush3.bf16.msra.mxu0 %v786_v51 }
  0x31   :  { %742 = vmatpush3.bf16.msra.mxu1 %v786_v51  ;;  %711 = vmatprep.subr.bf16.mxu0 %v787_v60 }
  0x32   :  { %735 = vmatprep.subr.bf16.mxu1 %v787_v60 }
  0x34   :  { %712 = vmatpush3.bf16.msra.mxu0 %v788_v1 }
  0x35   :  { %743 = vmatpush3.bf16.msra.mxu1 %v788_v1  ;;  %713 = vmatprep.subr.bf16.mxu0 %v789_v2 }
  0x36   :  { %736 = vmatprep.subr.bf16.mxu1 %v789_v2 }
  0x38   :  { %714 = vmatpush3.bf16.msra.mxu0 %v790_v5 }
  0x39   :  { %744 = vmatpush3.bf16.msra.mxu1 %v790_v5  ;;  %715 = vmatprep.subr.bf16.mxu0 %v791_v9 }
  0x3a   :  { %737 = vmatprep.subr.bf16.mxu1 %v791_v9 }
  0x3c   :  { %716 = vmatpush3.bf16.msra.mxu0 %v792_v11 }
  0x3d   :  { %745 = vmatpush3.bf16.msra.mxu1 %v792_v11  ;;  %717 = vmatprep.subr.bf16.mxu0 %v793_v12 }
  0x3e   :  { %738 = vmatprep.subr.bf16.mxu1 %v793_v12 }
  0x40   :  { %718 = vmatpush3.bf16.msra.mxu0 %v794_v13 }
  0x41   :  { %746 = vmatpush3.bf16.msra.mxu1 %v794_v13 }
  0x43   :  { %573 = vmatmul.mubr.bf16.vlgmr.msra.gmra.mrb[8].mxu0 %v43_v18 }
  0x44   :  { %581 = vmatmul.mubr.bf16.vlgmr.msra.gmra.mrb[8].mxu1 %v49_v19 }
  0xf6   :  { %v663_v20 = vpop.f32.mrb[0].mxu0 }
  0xf7   :  { %v691_v21 = vpop.f32.mrb[0].mxu1  ;;  %v664_v23 = vpop.f32.mrb[1].mxu0 }
  0xf8   :  { %v665_v24 = vadd.f32 %v664_v23, %v663_v20  ;;  %v692_v25 = vpop.f32.mrb[1].mxu1  ;;  %v666_v26 = vpop.f32.mrb[2].mxu0 }
  0xf9   :  { %v693_v27 = vadd.f32 %v692_v25, %v691_v21  ;;  %v694_v28 = vpop.f32.mrb[2].mxu1  ;;  %v667_v29 = vpop.f32.mrb[3].mxu0 }
  0xfa   :  { %v477_v30 = vadd.f32 %v665_v24, %v598_v22  ;;  %v668_v31 = vadd.f32 %v667_v29, %v666_v26  ;;  %v695_v32 = vpop.f32.mrb[3].mxu1 }
  0xfb   :  { %v696_v33 = vadd.f32 %v695_v32, %v694_v28 }
  0xfc   :  { %v526_v34 = vadd.f32 %v693_v27, %v477_v30  ;;  %v480_v35 = vadd.f32 %v668_v31, %v598_v22 }
  0xfe   :  { %v529_v36 = vadd.f32 %v696_v33, %v480_v35  ;;  %v669_v37 = vpop.f32.mrb[4].mxu0 }
  0xff   :  { %v670_v38 = vpop.f32.mrb[5].mxu0  ;;  %v697_v41 = vpop.f32.mrb[4].mxu1 }
 0x100   :  { %v671_v39 = vadd.f32 %v670_v38, %v669_v37  ;;  %v672_v40 = vpop.f32.mrb[6].mxu0  ;;  %v698_v45 = vpop.f32.mrb[5].mxu1 }
 0x101   :  { %v673_v42 = vpop.f32.mrb[7].mxu0  ;;  %v699_v46 = vadd.f32 %v698_v45, %v697_v41  ;;  %v700_v47 = vpop.f32.mrb[6].mxu1 }
 0x102   :  { %v485_v43 = vadd.f32 %v671_v39, %v598_v22  ;;  %v674_v44 = vadd.f32 %v673_v42, %v672_v40  ;;  %v701_v49 = vpop.f32.mrb[7].mxu1 }
 0x103   :  { %v702_v51 = vadd.f32 %v701_v49, %v700_v47 }
 0x104   :  { %v488_v48 = vadd.f32 %v674_v44, %v598_v22  ;;  %v534_v50 = vadd.f32 %v699_v46, %v485_v43 }
 0x106   :  { %v537_v52 = vadd.f32 %v702_v51, %v488_v48 }
 0x116   :  { %v719_v53 = vpop.f32.mrb[8].mxu0 }
 0x117   :  { %v725_v54 = vpop.f32.mrb[8].mxu1  ;;  %v720_v55 = vpop.f32.mrb[9].mxu0 }
 0x118   :  { %v721_v56 = vadd.f32 %v720_v55, %v719_v53  ;;  %v726_v57 = vpop.f32.mrb[9].mxu1  ;;  %v722_v58 = vpop.f32.mrb[10].mxu0 }
 0x119   :  { %v727_v59 = vadd.f32 %v726_v57, %v725_v54  ;;  %v728_v60 = vpop.f32.mrb[10].mxu1  ;;  %v723_v61 = vpop.f32.mrb[11].mxu0 }
 0x11a   :  { %v575_v62 = vadd.f32 %v721_v56, %v526_v34  ;;  %v724_v63 = vadd.f32 %v723_v61, %v722_v58  ;;  %v729_v0 = vpop.f32.mrb[11].mxu1 }
 0x11b   :  { %v583_v1 = vadd.f32 %v727_v59, %v534_v50  ;;  %v730_v2 = vadd.f32 %v729_v0, %v728_v60 }
 0x11c   :  { %590 = vst.msk [vmem:[%s1049_s3] sm:$0xff] %vm589_vm0, %v575_v62  ;;  %v578_v3 = vadd.f32 %v724_v63, %v529_v36 }
 0x11d   :  { %592 = vst.msk [vmem:[%s1049_s3 + $0x10] sm:$0xff] %vm589_vm0, %v583_v1  ;;  %v586_v4 = vadd.f32 %v730_v2, %v537_v52 }
 0x11e   :  { %591 = vst.msk [vmem:[%s1049_s3 + $0x8] sm:$0xff] %vm589_vm0, %v578_v3 }
 0x11f   :  { %593 = vst.msk [vmem:[%s1049_s3 + $0x18] sm:$0xff] %vm589_vm0, %v586_v4 }

// kernel: _lambda_.18
= control target key start
LH: loop header
LB: loop body
LE: loop exit
PB: predicated region body
PF: predicated region fallthrough
CT: control target
= control target key end

     0   :  { %vm39_vm0 = vcmask 261120   ;;  %v1882_v44 = vmov 0   ;;  %s2501_s0 = inlined_call_operand.vmem [shape: f32[32,32], index: 0, kind: input, shape index: {}]   ;;  %s2502_s7 = inlined_call_operand.vmem [shape: f32[1,32], index: 7, kind: input, shape index: {}, may-alias: {1,7}]   ;;  %s2503_s8 = inlined_call_operand.vmem [shape: f32[1,32], index: 8, kind: input, shape index: {}, may-alias: {2,8}]   ;;  %s2504_s3 = inlined_call_operand.vmem [shape: bf16[32,1024], index: 3, kind: input, shape index: {}]   ;;  %s2505_s1 = inlined_call_operand.vmem [shape: f32[1,32], index: 1, kind: input, shape index: {}, may-alias: {1,7}]   ;;  %s2506_s2 = inlined_call_operand.vmem [shape: f32[1,32], index: 2, kind: input, shape index: {}, may-alias: {2,8}]   ;;  %s2507_s5 = inlined_call_operand.vmem [shape: bf16[1024,32], index: 5, kind: input, shape index: {}]   ;;  %s2508_s4 = inlined_call_operand.vmem [shape: f32[1,1024], index: 4, kind: input, shape index: {}]   ;;  %s2509_s6 = inlined_call_operand.vmem [shape: f32[1,32], index: 6, kind: input, shape index: {}]   ;;  %s2510_s9 = inlined_call_operand.vmem [shape: f32[32,32], index: 9, kind: output, shape index: {}]  }
   0x1   :  { %v33_v0 = vld [vmem:[%s2501_s0] sm:$0xff]  ;;  %v35_v1 = vld [vmem:[%s2501_s0 + $0x10] sm:$0xff]  ;;  %v34_v2 = vld [vmem:[%s2501_s0 + $0x8] sm:$0xff]  ;;  %291 = vmatprep.mubr.bf16.mxu0 %v1882_v44  ;;  %344 = vmatprep.mubr.bf16.mxu1 %v1882_v44 }
   0x2   :  { %v40_v3 = vsel %vm39_vm0, %v33_v0, 0.0  ;;  %v46_v4 = vsel %vm39_vm0, %v35_v1, 0.0  ;;  %v36_v5 = vld [vmem:[%s2501_s0 + $0x18] sm:$0xff]  ;;  %v43_v6 = vsel %vm39_vm0, %v34_v2, 0.0  ;;  %v115_v28 = vld [vmem:[%s2504_s3] sm:$0xff]  ;;  %v116_v30 = vld [vmem:[%s2504_s3 + $0x8] sm:$0xff] }
   0x3   :  { %41 = vadd.xlane.f32.xlu0 %v40_v3  ;;  %47 = vadd.xlane.f32.xlu1 %v46_v4  ;;  %v49_v7 = vsel %vm39_vm0, %v36_v5, 0.0  ;;  %v119_v29 = vld [vmem:[%s2504_s3 + $0x20] sm:$0xff]  ;;  %v120_v32 = vld [vmem:[%s2504_s3 + $0x28] sm:$0xff]  ;;  %v117_v45 = vld [vmem:[%s2504_s3 + $0x10] sm:$0xff] }
   0x4   :  { %v1445_v31 = vcombine.high %v115_v28, %v119_v29  ;;  %v1447_v33 = vcombine.high %v116_v30, %v120_v32  ;;  %v1444_v34 = vcombine.low %v115_v28, %v119_v29  ;;  %v1446_v35 = vcombine.low %v116_v30, %v120_v32  ;;  %v123_v36 = vld [vmem:[%s2504_s3 + $0x40] sm:$0xff]  ;;  %v124_v38 = vld [vmem:[%s2504_s3 + $0x48] sm:$0xff]  ;;  %v121_v46 = vld [vmem:[%s2504_s3 + $0x30] sm:$0xff] }
   0x5   :  { %v127_v37 = vld [vmem:[%s2504_s3 + $0x60] sm:$0xff]  ;;  %v128_v40 = vld [vmem:[%s2504_s3 + $0x68] sm:$0xff]  ;;  %v118_v47 = vld [vmem:[%s2504_s3 + $0x18] sm:$0xff]  ;;  %v1449_v48 = vcombine.high %v117_v45, %v121_v46  ;;  %v1448_v50 = vcombine.low %v117_v45, %v121_v46 }
   0x6   :  { %259 = vmatprep.subr.bf16.mxu0 %v1445_v31  ;;  %312 = vmatprep.subr.bf16.mxu1 %v1447_v33  ;;  %v1453_v39 = vcombine.high %v123_v36, %v127_v37  ;;  %v1455_v41 = vcombine.high %v124_v38, %v128_v40  ;;  %v1452_v42 = vcombine.low %v123_v36, %v127_v37  ;;  %v122_v49 = vld [vmem:[%s2504_s3 + $0x38] sm:$0xff]  ;;  %v1442_v3 = vld [vmem:[%s2505_s1] ss:$0 sm:$0xff]  ;;  %v1682_v33 = vld [vmem:[%s2507_s5 + $0x48] sm:$0xff]  }
   0x7   :  { %44 = vadd.xlane.f32.xlu0 %v43_v6  ;;  %50 = vadd.xlane.f32.xlu1 %v49_v7  ;;  %v1454_v43 = vcombine.low %v124_v38, %v128_v40  ;;  %v1450_v51 = vcombine.low %v118_v47, %v122_v49  ;;  %v1451_v52 = vcombine.high %v118_v47, %v122_v49  ;;  %v1678_v29 = vld [vmem:[%s2507_s5 + $0x40] sm:$0xff]   ;;  %v1685_v36 = vld [vmem:[%s2507_s5 + $0x88] sm:$0xff]   ;;  %v1686_v37 = vld [vmem:[%s2507_s5 + $0x50] sm:$0xff]  }
   0x8   :  { %260 = vmatpush1.bf16.msra.mxu0 %v1444_v34  ;;  %313 = vmatpush1.bf16.msra.mxu1 %v1446_v35  ;;  %v1679_v30 = vld [vmem:[%s2507_s5 + $0xc0] sm:$0xff]   ;;  %v1683_v34 = vld [vmem:[%s2507_s5 + $0xc8] sm:$0xff]   ;;  %v1687_v38 = vld [vmem:[%s2507_s5 + $0xd0] sm:$0xff]  }
   0x9   :  { %261 = vmatprep.subr.bf16.mxu0 %v1453_v39  ;;  %314 = vmatprep.subr.bf16.mxu1 %v1455_v41  ;;  %v1680_v31 = vld [vmem:[%s2507_s5] sm:$0xff]   ;;  %v1684_v35 = vld [vmem:[%s2507_s5 + $0x8] sm:$0xff]   ;;  %v1688_v39 = vld [vmem:[%s2507_s5 + $0x10] sm:$0xff]  }
   0xa   :  { %v1681_v32 = vld [vmem:[%s2507_s5 + $0x80] sm:$0xff]   ;;  %v1689_v40 = vld [vmem:[%s2507_s5 + $0x90] sm:$0xff]   ;;  %v1690_v41 = vld [vmem:[%s2507_s5 + $0x58] sm:$0xff]  }
   0xb   :  { %v1694_v45 = vld [vmem:[%s2507_s5 + $0x60] sm:$0xff]   ;;  %v1698_v49 = vld [vmem:[%s2507_s5 + $0x68] sm:$0xff]  }
   0xc   :  { %262 = vmatpush1.bf16.msra.mxu0 %v1452_v42  ;;  %315 = vmatpush1.bf16.msra.mxu1 %v1454_v43  ;;  %v1691_v42 = vld [vmem:[%s2507_s5 + $0xd8] sm:$0xff]   ;;  %v1695_v46 = vld [vmem:[%s2507_s5 + $0xe0] sm:$0xff]  }
   0xd   :  { %365 = vmatprep.subr.bf16.mxu0 %v1449_v48  ;;  %418 = vmatprep.subr.bf16.mxu1 %v1451_v52  ;;  %v1692_v43 = vld [vmem:[%s2507_s5 + $0x18] sm:$0xff]   ;;  %v1696_v47 = vld [vmem:[%s2507_s5 + $0x20] sm:$0xff]   ;;  %v1701_v52 = vld [vmem:[%s2507_s5 + $0xa8] sm:$0xff]  }
   0xe   :  { %v1697_v48 = vld [vmem:[%s2507_s5 + $0xa0] sm:$0xff]  }
  0x90   :  { %v42_v8 = vpop.xlane.xlu0 %41  ;;  %v48_v9 = vpop.xlane.xlu1 %47 }
  0x91   :  { %v53_v10 = vmul.f32 0.03125, %v42_v8  ;;  %v55_v11 = vmul.f32 0.03125, %v48_v9  ;;  %v1443_v8 = vld [vmem:[%s2506_s2] ss:$0 sm:$0xff] }
  0x93   :  { %v1949_v12 = vsub.f32 %v33_v0, %v53_v10  ;;  %v1951_v13 = vsub.f32 %v35_v1, %v55_v11  ;;  %v125_v11 = vld [vmem:[%s2504_s3 + $0x50] sm:$0xff] }
  0x94   :  { %v45_v14 = vpop.xlane.xlu0 %44  ;;  %v51_v15 = vpop.xlane.xlu1 %50 }
  0x95   :  { %v54_v16 = vmul.f32 0.03125, %v45_v14  ;;  %v56_v17 = vmul.f32 0.03125, %v51_v15  ;;  %v61_v18 = vmul.f32 %v1949_v12, %v1949_v12  ;;  %v63_v19 = vmul.f32 %v1951_v13, %v1951_v13 }
  0x97   :  { %v1957_v20 = vsub.f32 %v34_v2, %v54_v16  ;;  %v1959_v21 = vsub.f32 %v36_v5, %v56_v17  ;;  %v65_v22 = vsel %vm39_vm0, %v61_v18, 0.0  ;;  %v71_v23 = vsel %vm39_vm0, %v63_v19, 0.0  ;;  %v129_v17 = vld [vmem:[%s2504_s3 + $0x70] sm:$0xff]  ;;  %v126_v18 = vld [vmem:[%s2504_s3 + $0x58] sm:$0xff] }
  0x98   :  { %66 = vadd.xlane.f32.xlu0 %v65_v22  ;;  %v130_v19 = vld [vmem:[%s2504_s3 + $0x78] sm:$0xff] }
  0x99   :  { %v62_v24 = vmul.f32 %v1957_v20, %v1957_v20  ;;  %v64_v25 = vmul.f32 %v1959_v21, %v1959_v21 }
  0x9b   :  { %v68_v26 = vsel %vm39_vm0, %v62_v24, 0.0  ;;  %v74_v27 = vsel %vm39_vm0, %v64_v25, 0.0  ;;  %v1456_v25 = vcombine.low %v125_v11, %v129_v17 }
  0x9c   :  { %72 = vadd.xlane.f32.xlu0 %v71_v23  ;;  %69 = vadd.xlane.f32.xlu1 %v68_v26  ;;  %v1457_v23 = vcombine.high %v125_v11, %v129_v17  ;;  %v1458_v26 = vcombine.low %v126_v18, %v130_v19 }
  0xa0   :  { %75 = vadd.xlane.f32.xlu1 %v74_v27 }
 0x125   :  { %v67_v53 = vpop.xlane.xlu0 %66 }
 0x126   :  { %v77_v54 = vmul.f32 0.03125, %v67_v53  ;;  %v1702_v53 = vld [vmem:[%s2507_s5 + $0x70] sm:$0xff]  }
 0x128   :  { %v81_v55 = vadd.f32 1e-05, %v77_v54  ;;  %v1703_v54 = vld [vmem:[%s2507_s5 + $0xf0] sm:$0xff]  }
 0x129   :  { %v70_v56 = vpop.xlane.xlu1 %69  ;;  %v73_v57 = vpop.xlane.xlu0 %72 }
 0x12a   :  { %1742 = vrsqrt.f32 %v81_v55  ;;  %v78_v58 = vmul.f32 0.03125, %v70_v56  ;;  %v79_v59 = vmul.f32 0.03125, %v73_v57  ;;  %v1704_v55 = vld [vmem:[%s2507_s5 + $0x30] sm:$0xff]   ;;  %v1706_v57 = vld [vmem:[%s2507_s5 + $0x78] sm:$0xff]  }
 0x12b   :  { %v1705_v56 = vld [vmem:[%s2507_s5 + $0xb0] sm:$0xff]  }
 0x12c   :  { %v82_v60 = vadd.f32 1e-05, %v78_v58  ;;  %v83_v61 = vadd.f32 1e-05, %v79_v59  ;;  %v1707_v58 = vld [vmem:[%s2507_s5 + $0xf8] sm:$0xff]  }
 0x12d   :  { %v76_v62 = vpop.xlane.xlu1 %75  ;;  %v1708_v59 = vld [vmem:[%s2507_s5 + $0x38] sm:$0xff]  }
 0x12e   :  { %1744 = vrsqrt.f32 %v82_v60  ;;  %v80_v63 = vmul.f32 0.03125, %v76_v62  ;;  %v1709_v60 = vld [vmem:[%s2507_s5 + $0xb8] sm:$0xff]   ;;  %v1711_v62 = vld [vmem:[%s2507_s5 + $0x1c0] sm:$0xff]  }
 0x12f   :  { %1746 = vrsqrt.f32 %v83_v61  ;;  %v1710_v61 = vld [vmem:[%s2507_s5 + $0x140] sm:$0xff]  }
 0x130   :  { %v84_v0 = vadd.f32 1e-05, %v80_v63  ;;  %v133_v63 = vlaneseq }
 0x132   :  { %1748 = vrsqrt.f32 %v84_v0  ;;  %v2145_v0 = vshrl.u32 %v133_v63, 7 }
 0x134   :  { %v1743_v1 = vpop.eup %1742 }
 0x135   :  { %v89_v2 = vmul.f32 %v1743_v1, %v1949_v12  ;;  %v135_v1 = vsub.s32 0, %v2145_v0 }
 0x137   :  { %v99_v6 = vmul.f32 %v1442_v3, %v89_v2  ;;  %v143_v2 = vsub.s32 2, %v2145_v0 }
 0x138   :  { %v1745_v4 = vpop.eup %1744 }
 0x139   :  { %v90_v5 = vmul.f32 %v1745_v4, %v1957_v20  ;;  %v1747_v7 = vpop.eup %1746  ;;  %v109_v15 = vadd.f32 %v1443_v8, %v99_v6  ;;  %v139_v4 = vsub.s32 1, %v2145_v0 }
 0x13a   :  { %v91_v12 = vmul.f32 %v1747_v7, %v1951_v13  ;;  %v1459_v13 = vcombine.high %v126_v18, %v130_v19 }
 0x13b   :  { %v100_v9 = vmul.f32 %v1442_v3, %v90_v5  ;;  %v147_v5 = vsub.s32 3, %v2145_v0 }
 0x13c   :  { %v1749_v10 = vpop.eup %1748 }
 0x13d   :  { %v92_v14 = vmul.f32 %v1749_v10, %v1959_v21  ;;  %v110_v16 = vadd.f32 %v1443_v8, %v100_v9  ;;  %v101_v21 = vmul.f32 %v1442_v3, %v91_v12 }
 0x13f   :  { %v113_v20 = vpack.c.bf16 %v110_v16, %v109_v15  ;;  %v102_v22 = vmul.f32 %v1442_v3, %v92_v14  ;;  %v111_v27 = vadd.f32 %v1443_v8, %v101_v21  ;;  %v2152_v3 = vld [vmem:[%s2508_s4] sm:$0xff] }
 0x140   :  { %v136_v6 = vrot.slane %v2152_v3, %v135_v1  ;;  %v2158_v7 = vrot.slane %v2152_v3, %v143_v2  ;;  %v2164_v9 = vrot.slane %v2152_v3, %v147_v5  ;;  %v159_v1 = vsub.s32 6, %v2145_v0 }
 0x141   :  { %1460 = vmatmul.mubr.msk.bf16.vlgmr.msra.gmra.mrb[0].mxu0 %vm39_vm0, %v113_v20  ;;  %1462 = vmatmul.mubr.msk.bf16.vlgmr.msra.gmra.mrb[0].mxu1 %vm39_vm0, %v113_v20  ;;  %v112_v24 = vadd.f32 %v1443_v8, %v102_v22  ;;  %v2161_v8 = vrot.slane %v2152_v3, %v139_v4  ;;  %v155_v2 = vsub.s32 5, %v2145_v0 }
 0x142   :  { %301 = vmatprep.mubr.bf16.mxu0 %v1882_v44  ;;  %354 = vmatprep.mubr.bf16.mxu1 %v1882_v44 }
 0x143   :  { %366 = vmatpush1.bf16.msra.mxu0 %v1448_v50  ;;  %419 = vmatpush1.bf16.msra.mxu1 %v1450_v51  ;;  %v114_v28 = vpack.c.bf16 %v112_v24, %v111_v27  ;;  %v1699_v50 = vld [vmem:[%s2507_s5 + $0xe8] sm:$0xff]  }
 0x144   :  { %367 = vmatprep.subr.bf16.mxu0 %v1457_v23  ;;  %420 = vmatprep.subr.bf16.mxu1 %v1459_v13  ;;  %v1700_v51 = vld [vmem:[%s2507_s5 + $0x28] sm:$0xff]  }
 0x147   :  { %368 = vmatpush1.bf16.msra.mxu0 %v1456_v25  ;;  %421 = vmatpush1.bf16.msra.mxu1 %v1458_v26 }
 0x148   :  { %1565 = vmatprep.subr.bf16.mxu0 %v1678_v29  ;;  %1593 = vmatprep.subr.bf16.mxu1 %v1679_v30 }
 0x149   :  { %1461 = vmatmul.mubr.msk.bf16.gmra.mrb[4].mxu0 %vm39_vm0, %v114_v28  ;;  %1463 = vmatmul.mubr.msk.bf16.gmra.mrb[4].mxu1 %vm39_vm0, %v114_v28 }
 0x14a   :  { %397 = vmatprep.mubr.bf16.mxu0 %v1882_v44  ;;  %450 = vmatprep.mubr.bf16.mxu1 %v1882_v44 }
 0x151   :  { %1464 = vmatmul.mubr.msk.bf16.vlgmr.msra.gmra.mrb[8].mxu0 %vm39_vm0, %v113_v20  ;;  %1466 = vmatmul.mubr.msk.bf16.vlgmr.msra.gmra.mrb[8].mxu1 %vm39_vm0, %v113_v20 }
 0x152   :  { %407 = vmatprep.mubr.bf16.mxu0 %v1882_v44  ;;  %460 = vmatprep.mubr.bf16.mxu1 %v1882_v44  ;;  %v1693_v44 = vld [vmem:[%s2507_s5 + $0x98] sm:$0xff]  }
 0x153   :  { %1566 = vmatpush3.bf16.msra.mxu0 %v1680_v31  ;;  %1594 = vmatpush3.bf16.msra.mxu1 %v1681_v32 }
 0x154   :  { %1567 = vmatprep.subr.bf16.mxu0 %v1682_v33  ;;  %1595 = vmatprep.subr.bf16.mxu1 %v1683_v34 }
 0x157   :  { %1568 = vmatpush3.bf16.msra.mxu0 %v1684_v35  ;;  %1596 = vmatpush3.bf16.msra.mxu1 %v1685_v36 }
 0x158   :  { %1569 = vmatprep.subr.bf16.mxu0 %v1686_v37  ;;  %1597 = vmatprep.subr.bf16.mxu1 %v1687_v38 }
 0x159   :  { %1465 = vmatmul.mubr.msk.bf16.gmra.mrb[12].mxu0 %vm39_vm0, %v114_v28  ;;  %1467 = vmatmul.mubr.msk.bf16.gmra.mrb[12].mxu1 %vm39_vm0, %v114_v28 }
 0x15b   :  { %1570 = vmatpush3.bf16.msra.mxu0 %v1688_v39  ;;  %1598 = vmatpush3.bf16.msra.mxu1 %v1689_v40 }
 0x15c   :  { %1571 = vmatprep.subr.bf16.mxu0 %v1690_v41  ;;  %1599 = vmatprep.subr.bf16.mxu1 %v1691_v42 }
 0x15f   :  { %1572 = vmatpush3.bf16.msra.mxu0 %v1692_v43  ;;  %1600 = vmatpush3.bf16.msra.mxu1 %v1693_v44 }
 0x160   :  { %1573 = vmatprep.subr.bf16.mxu0 %v1694_v45  ;;  %1601 = vmatprep.subr.bf16.mxu1 %v1695_v46 }
 0x163   :  { %1574 = vmatpush3.bf16.msra.mxu0 %v1696_v47  ;;  %1602 = vmatpush3.bf16.msra.mxu1 %v1697_v48 }
 0x164   :  { %1575 = vmatprep.subr.bf16.mxu0 %v1698_v49  ;;  %1603 = vmatprep.subr.bf16.mxu1 %v1699_v50 }
 0x167   :  { %1576 = vmatpush3.bf16.msra.mxu0 %v1700_v51  ;;  %1604 = vmatpush3.bf16.msra.mxu1 %v1701_v52 }
 0x168   :  { %1577 = vmatprep.subr.bf16.mxu0 %v1702_v53  ;;  %1605 = vmatprep.subr.bf16.mxu1 %v1703_v54 }
 0x16b   :  { %1578 = vmatpush3.bf16.msra.mxu0 %v1704_v55  ;;  %1606 = vmatpush3.bf16.msra.mxu1 %v1705_v56 }
 0x16c   :  { %1579 = vmatprep.subr.bf16.mxu0 %v1706_v57  ;;  %1607 = vmatprep.subr.bf16.mxu1 %v1707_v58 }
 0x16f   :  { %1580 = vmatpush3.bf16.msra.mxu0 %v1708_v59  ;;  %1608 = vmatpush3.bf16.msra.mxu1 %v1709_v60  ;;  %v151_v59 = vsub.s32 4, %v2145_v0 }
 0x170   :  { %1621 = vmatprep.subr.bf16.mxu0 %v1710_v61  ;;  %1649 = vmatprep.subr.bf16.mxu1 %v1711_v62 }
 0x214   :  { %v293_v10 = vpop.f32.mrb[0].mxu0  ;;  %v346_v11 = vpop.f32.mrb[0].mxu1 }
 0x215   :  { %v2166_v12 = vadd.f32 %v293_v10, %v136_v6  ;;  %v2169_v14 = vadd.f32 %v346_v11, %v2158_v7  ;;  %v295_v15 = vpop.f32.mrb[1].mxu0  ;;  %v348_v16 = vpop.f32.mrb[1].mxu1  ;;  %v163_v11 = vsub.s32 7, %v2145_v0 }
 0x216   :  { %v2172_v17 = vadd.f32 %v295_v15, %v2161_v8  ;;  %v2175_v18 = vadd.f32 %v348_v16, %v2164_v9  ;;  %v297_v19 = vpop.f32.mrb[2].mxu0  ;;  %v350_v20 = vpop.f32.mrb[2].mxu1 }
 0x217   :  { %v1468_v22 = vmul.f32 -1.442695, %v2166_v12  ;;  %v1470_v23 = vmul.f32 -1.442695, %v2169_v14  ;;  %v2179_v13 = vadd.f32 %v297_v19, %v136_v6  ;;  %v2182_v21 = vadd.f32 %v350_v20, %v2158_v7  ;;  %v299_v24 = vpop.f32.mrb[3].mxu0  ;;  %v352_v25 = vpop.f32.mrb[3].mxu1 }
 0x218   :  { %v1469_v26 = vmul.f32 -1.442695, %v2172_v17  ;;  %v1471_v27 = vmul.f32 -1.442695, %v2175_v18  ;;  %v2187_v28 = vadd.f32 %v299_v24, %v2161_v8  ;;  %v2190_v29 = vadd.f32 %v352_v25, %v2164_v9 }
 0x219   :  { %1750 = vpow2.f32 %v1468_v22  ;;  %v1476_v30 = vmul.f32 -1.442695, %v2179_v13  ;;  %v1478_v31 = vmul.f32 -1.442695, %v2182_v21 }
 0x21a   :  { %1752 = vpow2.f32 %v1470_v23  ;;  %v1477_v32 = vmul.f32 -1.442695, %v2187_v28  ;;  %v1479_v33 = vmul.f32 -1.442695, %v2190_v29 }
 0x21b   :  { %1754 = vpow2.f32 %v1469_v26  ;;  %v2225_v26 = vrot.slane %v2152_v3, %v151_v59 }
 0x21c   :  { %1756 = vpow2.f32 %v1471_v27  ;;  %v303_v34 = vpop.f32.mrb[4].mxu0  ;;  %v356_v35 = vpop.f32.mrb[4].mxu1 }
 0x21d   :  { %1758 = vpow2.f32 %v1476_v30  ;;  %v2196_v36 = vadd.f32 %v303_v34, %v136_v6  ;;  %v2199_v37 = vadd.f32 %v356_v35, %v2158_v7  ;;  %v305_v38 = vpop.f32.mrb[5].mxu0  ;;  %v358_v39 = vpop.f32.mrb[5].mxu1  ;;  %v2228_v30 = vrot.slane %v2152_v3, %v159_v1 }
 0x21e   :  { %1760 = vpow2.f32 %v1478_v31  ;;  %v2202_v40 = vadd.f32 %v305_v38, %v2161_v8  ;;  %v2205_v41 = vadd.f32 %v358_v39, %v2164_v9  ;;  %v307_v42 = vpop.f32.mrb[6].mxu0  ;;  %v360_v43 = vpop.f32.mrb[6].mxu1  ;;  %v2231_v31 = vrot.slane %v2152_v3, %v155_v2 }
 0x21f   :  { %1762 = vpow2.f32 %v1477_v32  ;;  %v1484_v44 = vmul.f32 -1.442695, %v2196_v36  ;;  %v1486_v45 = vmul.f32 -1.442695, %v2199_v37  ;;  %v2209_v46 = vadd.f32 %v307_v42, %v136_v6  ;;  %v309_v47 = vpop.f32.mrb[7].mxu0  ;;  %v362_v48 = vpop.f32.mrb[7].mxu1 }
 0x220   :  { %1764 = vpow2.f32 %v1479_v33  ;;  %v1485_v49 = vmul.f32 -1.442695, %v2202_v40  ;;  %v1487_v50 = vmul.f32 -1.442695, %v2205_v41  ;;  %v2219_v20 = vadd.f32 %v360_v43, %v2158_v7 }
 0x221   :  { %1766 = vpow2.f32 %v1484_v44  ;;  %v1492_v51 = vmul.f32 -1.442695, %v2209_v46  ;;  %v2222_v25 = vadd.f32 %v309_v47, %v2161_v8  ;;  %v2234_v33 = vrot.slane %v2152_v3, %v163_v11 }
 0x222   :  { %1768 = vpow2.f32 %v1486_v45  ;;  %v1494_v35 = vmul.f32 -1.442695, %v2219_v20  ;;  %v2238_v38 = vadd.f32 %v362_v48, %v2164_v9 }
 0x223   :  { %v1751_v52 = vpop.eup %1750  ;;  %1770 = vpow2.f32 %v1485_v49  ;;  %v1493_v44 = vmul.f32 -1.442695, %v2222_v25 }
 0x224   :  { %v1753_v53 = vpop.eup %1752  ;;  %v567_v54 = vadd.f32 1.0, %v1751_v52  ;;  %1772 = vpow2.f32 %v1487_v50  ;;  %v399_v55 = vpop.f32.mrb[8].mxu0  ;;  %v1495_v2 = vmul.f32 -1.442695, %v2238_v38 }
 0x225   :  { %v452_v56 = vpop.f32.mrb[8].mxu1  ;;  %v1755_v57 = vpop.eup %1754  ;;  %v569_v58 = vadd.f32 1.0, %v1753_v53  ;;  %1774 = vpow2.f32 %v1492_v51  ;;  %v2242_v45 = vadd.f32 %v399_v55, %v2225_v26 }
 0x226   :  { %v401_v60 = vpop.f32.mrb[9].mxu0  ;;  %v454_v61 = vpop.f32.mrb[9].mxu1  ;;  %1776 = vrcp.f32 %v567_v54  ;;  %v568_v63 = vadd.f32 1.0, %v1755_v57  ;;  %v2247_v51 = vadd.f32 %v452_v56, %v2228_v30 }
 0x227   :  { %v1757_v62 = vpop.eup %1756  ;;  %v403_v4 = vpop.f32.mrb[10].mxu0  ;;  %1778 = vrcp.f32 %v569_v58  ;;  %v2250_v9 = vadd.f32 %v401_v60, %v2231_v31  ;;  %v2257_v55 = vadd.f32 %v454_v61, %v2234_v33 }
 0x228   :  { %v456_v5 = vpop.f32.mrb[10].mxu1  ;;  %v1759_v6 = vpop.eup %1758  ;;  %v570_v10 = vadd.f32 1.0, %v1757_v62  ;;  %1780 = vrcp.f32 %v568_v63  ;;  %v2260_v57 = vadd.f32 %v403_v4, %v2225_v26 }
 0x229   :  { %v405_v15 = vpop.f32.mrb[11].mxu0  ;;  %v1761_v16 = vpop.eup %1760  ;;  %v575_v19 = vadd.f32 1.0, %v1759_v6  ;;  %v2267_v62 = vadd.f32 %v456_v5, %v2228_v30  ;;  %v1472_v6 = vmul.f32 -1.442695, %v2242_v45  ;;  %v1473_v5 = vmul.f32 -1.442695, %v2250_v9 }
 0x22a   :  { %v458_v22 = vpop.f32.mrb[11].mxu1  ;;  %v1763_v23 = vpop.eup %1762  ;;  %1782 = vrcp.f32 %v570_v10  ;;  %v577_v24 = vadd.f32 1.0, %v1761_v16  ;;  %v2270_v63 = vadd.f32 %v405_v15, %v2231_v31  ;;  %v1474_v10 = vmul.f32 -1.442695, %v2247_v51 }
 0x22b   :  { %v1765_v27 = vpop.eup %1764  ;;  %1784 = vrcp.f32 %v575_v19  ;;  %v576_v0 = vadd.f32 1.0, %v1763_v23  ;;  %v1475_v16 = vmul.f32 -1.442695, %v2257_v55  ;;  %v2280_v15 = vadd.f32 %v458_v22, %v2234_v33 }
 0x22c   :  { %v1767_v7 = vpop.eup %1766  ;;  %1786 = vrcp.f32 %v577_v24  ;;  %v578_v32 = vadd.f32 1.0, %v1765_v27  ;;  %v409_v39 = vpop.f32.mrb[12].mxu0  ;;  %v1480_v23 = vmul.f32 -1.442695, %v2260_v57  ;;  %v1482_v24 = vmul.f32 -1.442695, %v2267_v62 }
 0x22d   :  { %v1769_v8 = vpop.eup %1768  ;;  %1788 = vrcp.f32 %v576_v0  ;;  %v583_v34 = vadd.f32 1.0, %v1767_v7  ;;  %v462_v47 = vpop.f32.mrb[12].mxu1  ;;  %v1481_v27 = vmul.f32 -1.442695, %v2270_v63 }
 0x22e   :  { %v1771_v42 = vpop.eup %1770  ;;  %1790 = vrcp.f32 %v578_v32  ;;  %v585_v43 = vadd.f32 1.0, %v1769_v8  ;;  %v2244_v3 = vpop.f32.mrb[13].mxu0  ;;  %v2288_v8 = vadd.f32 %v409_v39, %v2225_v26 }
 0x22f   :  { %v1773_v49 = vpop.eup %1772  ;;  %1792 = vrcp.f32 %v583_v34  ;;  %v584_v50 = vadd.f32 1.0, %v1771_v42  ;;  %v2252_v48 = vpop.f32.mrb[13].mxu1  ;;  %v2293_v42 = vadd.f32 %v462_v47, %v2228_v30 }
 0x230   :  { %v2254_v52 = vpop.f32.mrb[14].mxu0  ;;  %v1775_v53 = vpop.eup %1774  ;;  %1794 = vrcp.f32 %v585_v43  ;;  %v586_v54 = vadd.f32 1.0, %v1773_v49 }
 0x231   :  { %v2262_v58 = vpop.f32.mrb[14].mxu1  ;;  %v2264_v56 = vpop.f32.mrb[15].mxu0  ;;  %1796 = vrcp.f32 %v584_v50  ;;  %v591_v60 = vadd.f32 1.0, %v1775_v53 }
 0x232   :  { %v1777_v59 = vpop.eup %1776  ;;  %v2272_v1 = vpop.f32.mrb[15].mxu1  ;;  %1798 = vrcp.f32 %v586_v54 }
 0x233   :  { %v1779_v61 = vpop.eup %1778  ;;  %1800 = vrcp.f32 %v591_v60  ;;  %v663_v7 = vmul.f32 %v1777_v59, %v2166_v12  ;;  %v1714_v59 = vld [vmem:[%s2507_s5 + $0x148] sm:$0xff]  }
 0x234   :  { %v1781_v4 = vpop.eup %1780  ;;  %1802 = vpow2.f32 %v1494_v35  ;;  %v665_v22 = vmul.f32 %v1779_v61, %v2169_v14  ;;  %v1490_v61 = vmul.f32 -1.442695, %v2293_v42 }
 0x235   :  { %v1783_v11 = vpop.eup %1782  ;;  %1804 = vpow2.f32 %v1493_v44  ;;  %v664_v44 = vmul.f32 %v1781_v4, %v2172_v17  ;;  %v1712_v17 = vld [vmem:[%s2507_s5 + $0x100] sm:$0xff]  }
 0x236   :  { %v1785_v19 = vpop.eup %1784  ;;  %1806 = vpow2.f32 %v1495_v2  ;;  %v666_v39 = vmul.f32 %v1783_v11, %v2175_v18  ;;  %v1715_v2 = vld [vmem:[%s2507_s5 + $0x1c8] sm:$0xff]  }
 0x237   :  { %v1787_v0 = vpop.eup %1786  ;;  %v671_v32 = vmul.f32 %v1785_v19, %v2179_v13  ;;  %1808 = vpow2.f32 %v1472_v6 }
 0x238   :  { %v1789_v34 = vpop.eup %1788  ;;  %v673_v35 = vmul.f32 %v1787_v0, %v2182_v21  ;;  %1810 = vpow2.f32 %v1474_v10  ;;  %v1483_v21 = vmul.f32 -1.442695, %v2280_v15 }
 0x239   :  { %v1791_v43 = vpop.eup %1790  ;;  %v695_v49 = vpack.c.bf16 %v671_v32, %v663_v7  ;;  %v672_v12 = vmul.f32 %v1789_v34, %v2187_v28  ;;  %1812 = vpow2.f32 %v1473_v5  ;;  %v1488_v28 = vmul.f32 -1.442695, %v2288_v8  ;;  %v1716_v5 = vld [vmem:[%s2507_s5 + $0x108] sm:$0xff]  }
 0x23a   :  { %v1793_v13 = vpop.eup %1792  ;;  %v697_v50 = vpack.c.bf16 %v673_v35, %v665_v22  ;;  %v674_v53 = vmul.f32 %v1791_v43, %v2190_v29  ;;  %1814 = vpow2.f32 %v1475_v16  ;;  %v1713_v29 = vld [vmem:[%s2507_s5 + $0x180] sm:$0xff]   ;;  %v1720_v35 = vld [vmem:[%s2507_s5 + $0x110] sm:$0xff]  }
 0x23b   :  { %v2299_v14 = vpop.eup %1794  ;;  %v696_v47 = vpack.c.bf16 %v672_v12, %v664_v44  ;;  %1816 = vpow2.f32 %v1480_v23  ;;  %v2321_v10 = vmul.f32 %v1793_v13, %v2196_v36  ;;  %v1717_v36 = vld [vmem:[%s2507_s5 + $0x188] sm:$0xff]   ;;  %v1722_v12 = vld [vmem:[%s2507_s5 + $0x158] sm:$0xff]  }
 0x23c   :  { %v2305_v54 = vpop.eup %1796  ;;  %v698_v18 = vpack.c.bf16 %v674_v53, %v666_v39  ;;  %1818 = vpow2.f32 %v1482_v24 }
 0x23d   :  { %v2314_v60 = vpop.eup %1798  ;;  %1262 = vmatprep.mubr.bf16.mxu0 %v696_v47  ;;  %1820 = vpow2.f32 %v1481_v27  ;;  %v1719_v27 = vld [vmem:[%s2507_s5 + $0x1d0] sm:$0xff]  }
 0x23e   :  { %v1801_v4 = vpop.eup %1800  ;;  %1311 = vmatprep.mubr.bf16.mxu1 %v698_v18  ;;  %1263 = vmatmul.mubr.bf16.vlgmr.msra.gmra.mrb[16].mxu0 %v695_v49  ;;  %1822 = vpow2.f32 %v1483_v21  ;;  %v1721_v49 = vld [vmem:[%s2507_s5 + $0x190] sm:$0xff]   ;;  %v1724_v18 = vld [vmem:[%s2507_s5 + $0x118] sm:$0xff]  }
 0x23f   :  { %v1803_v6 = vpop.eup %1802  ;;  %v2324_v11 = vmul.f32 %v1801_v4, %v2209_v46  ;;  %1312 = vmatmul.mubr.bf16.vlgmr.msra.gmra.mrb[16].mxu1 %v697_v50  ;;  %1622 = vmatpush3.bf16.msra.mxu0 %v1712_v17  ;;  %1824 = vpow2.f32 %v1488_v28  ;;  %v1718_v46 = vld [vmem:[%s2507_s5 + $0x150] sm:$0xff]   ;;  %v1723_v50 = vld [vmem:[%s2507_s5 + $0x1d8] sm:$0xff]   ;;  %v2354_v28 = vadd.f32 %v2244_v3, %v2231_v31  ;;  %v1726_v3 = vld [vmem:[%s2507_s5 + $0x160] sm:$0xff]  }
 0x240   :  { %v1805_v16 = vpop.eup %1804  ;;  %v593_v19 = vadd.f32 1.0, %v1803_v6  ;;  %1650 = vmatpush3.bf16.msra.mxu1 %v1713_v29  ;;  %1623 = vmatprep.subr.bf16.mxu0 %v1714_v59  ;;  %1826 = vpow2.f32 %v1490_v61  ;;  %v2361_v61 = vadd.f32 %v2252_v48, %v2234_v33  ;;  %v1727_v48 = vld [vmem:[%s2507_s5 + $0x1e0] sm:$0xff]  }
 0x241   :  { %v1807_v23 = vpop.eup %1806  ;;  %v592_v24 = vadd.f32 1.0, %v1805_v16  ;;  %1651 = vmatprep.subr.bf16.mxu1 %v1715_v2  ;;  %v703_v0 = vpack.c.bf16 %v2324_v11, %v2321_v10  ;;  %v1725_v2 = vld [vmem:[%s2507_s5 + $0x198] sm:$0xff]  }
 0x242   :  { %v1809_v7 = vpop.eup %1808  ;;  %1828 = vrcp.f32 %v593_v19  ;;  %v594_v32 = vadd.f32 1.0, %v1807_v23 }
 0x243   :  { %v1811_v34 = vpop.eup %1810  ;;  %1830 = vrcp.f32 %v592_v24  ;;  %v571_v22 = vadd.f32 1.0, %v1809_v7  ;;  %1624 = vmatpush3.bf16.msra.mxu0 %v1716_v5  ;;  %v2371_v5 = vadd.f32 %v2254_v52, %v2225_v26  ;;  %v1489_v26 = vmul.f32 -1.442695, %v2354_v28  ;;  %v1728_v52 = vld [vmem:[%s2507_s5 + $0x120] sm:$0xff]  }
 0x244   :  { %v1813_v43 = vpop.eup %1812  ;;  %1832 = vrcp.f32 %v594_v32  ;;  %v573_v44 = vadd.f32 1.0, %v1811_v34  ;;  %1652 = vmatpush3.bf16.msra.mxu1 %v1717_v36  ;;  %1625 = vmatprep.subr.bf16.mxu0 %v1718_v46  ;;  %v2380_v36 = vadd.f32 %v2262_v58, %v2228_v30  ;;  %v2384_v46 = vadd.f32 %v2264_v56, %v2231_v31  ;;  %v1729_v31 = vld [vmem:[%s2507_s5 + $0x1a0] sm:$0xff]   ;;  %v1730_v58 = vld [vmem:[%s2507_s5 + $0x168] sm:$0xff]  }
 0x245   :  { %v1815_v13 = vpop.eup %1814  ;;  %1834 = vrcp.f32 %v571_v22  ;;  %v572_v39 = vadd.f32 1.0, %v1813_v43  ;;  %1653 = vmatprep.subr.bf16.mxu1 %v1719_v27  ;;  %v1491_v27 = vmul.f32 -1.442695, %v2361_v61  ;;  %v2395_v30 = vadd.f32 %v2272_v1, %v2234_v33  ;;  %v1731_v33 = vld [vmem:[%s2507_s5 + $0x1e8] sm:$0xff]  }
 0x246   :  { %v1817_v53 = vpop.eup %1816  ;;  %1836 = vrcp.f32 %v573_v44  ;;  %v574_v21 = vadd.f32 1.0, %v1815_v13  ;;  %v681_v7 = vmul.f32 %v2299_v14, %v2199_v37  ;;  %v1496_v34 = vmul.f32 -1.442695, %v2371_v5 }
 0x247   :  { %v1819_v47 = vpop.eup %1818  ;;  %1838 = vrcp.f32 %v572_v39  ;;  %v579_v17 = vadd.f32 1.0, %v1817_v53  ;;  %1626 = vmatpush3.bf16.msra.mxu0 %v1720_v35  ;;  %v680_v22 = vmul.f32 %v2305_v54, %v2202_v40  ;;  %v1498_v43 = vmul.f32 -1.442695, %v2380_v36 }
 0x248   :  { %v1821_v29 = vpop.eup %1820  ;;  %1840 = vrcp.f32 %v574_v21  ;;  %v581_v59 = vadd.f32 1.0, %v1819_v47  ;;  %1654 = vmatpush3.bf16.msra.mxu1 %v1721_v49  ;;  %1627 = vmatprep.subr.bf16.mxu0 %v1722_v12  ;;  %v1497_v44 = vmul.f32 -1.442695, %v2384_v46  ;;  %v1499_v13 = vmul.f32 -1.442695, %v2395_v30 }
 0x249   :  { %v1823_v4 = vpop.eup %1822  ;;  %1842 = vrcp.f32 %v579_v17  ;;  %v580_v6 = vadd.f32 1.0, %v1821_v29  ;;  %1655 = vmatprep.subr.bf16.mxu1 %v1723_v50  ;;  %v1735_v50 = vld [vmem:[%s2507_s5 + $0x1f0] sm:$0xff]  }
 0x24a   :  { %v2376_v16 = vpop.eup %1824  ;;  %1844 = vrcp.f32 %v581_v59  ;;  %v582_v19 = vadd.f32 1.0, %v1823_v4 }
 0x24b   :  { %v2386_v23 = vpop.eup %1826  ;;  %1846 = vrcp.f32 %v580_v6  ;;  %1628 = vmatpush3.bf16.msra.mxu0 %v1724_v18  ;;  %v1736_v18 = vld [vmem:[%s2507_s5 + $0x130] sm:$0xff]  }
 0x24c   :  { %v1829_v24 = vpop.eup %1828  ;;  %1848 = vrcp.f32 %v582_v19  ;;  %1656 = vmatpush3.bf16.msra.mxu1 %v1725_v2  ;;  %1629 = vmatprep.subr.bf16.mxu0 %v1726_v3  ;;  %v589_v19 = vadd.f32 1.0, %v2386_v23 }
 0x24d   :  { %v1831_v56 = vpop.eup %1830  ;;  %v689_v32 = vmul.f32 %v1829_v24, %v2219_v20  ;;  %1657 = vmatprep.subr.bf16.mxu1 %v1727_v48  ;;  %v682_v20 = vmul.f32 %v2314_v60, %v2205_v41  ;;  %1850 = vpow2.f32 %v1489_v26  ;;  %v1733_v41 = vld [vmem:[%s2507_s5 + $0x1a8] sm:$0xff]  }
 0x24e   :  { %v1833_v1 = vpop.eup %1832  ;;  %v688_v35 = vmul.f32 %v1831_v56, %v2222_v25  ;;  %1852 = vpow2.f32 %v1491_v27  ;;  %v1732_v25 = vld [vmem:[%s2507_s5 + $0x128] sm:$0xff]  }
 0x24f   :  { %v1835_v37 = vpop.eup %1834  ;;  %v690_v14 = vmul.f32 %v1833_v1, %v2238_v38  ;;  %v705_v49 = vpack.c.bf16 %v689_v32, %v681_v7  ;;  %1630 = vmatpush3.bf16.msra.mxu0 %v1728_v52  ;;  %1854 = vpow2.f32 %v1496_v34  ;;  %v1734_v38 = vld [vmem:[%s2507_s5 + $0x170] sm:$0xff]   ;;  %v1741_v52 = vld [vmem:[%s2507_s5 + $0x1b8] sm:$0xff]  }
 0x250   :  { %v1837_v12 = vpop.eup %1836  ;;  %v704_v40 = vpack.c.bf16 %v688_v35, %v680_v22  ;;  %1658 = vmatpush3.bf16.msra.mxu1 %v1729_v31  ;;  %1631 = vmatprep.subr.bf16.mxu0 %v1730_v58  ;;  %1856 = vpow2.f32 %v1498_v43  ;;  %v667_v47 = vmul.f32 %v1835_v37, %v2242_v45  ;;  %v1737_v45 = vld [vmem:[%s2507_s5 + $0x1b0] sm:$0xff]  }
 0x251   :  { %v1839_v54 = vpop.eup %1838  ;;  %v706_v39 = vpack.c.bf16 %v690_v14, %v682_v20  ;;  %1659 = vmatprep.subr.bf16.mxu1 %v1731_v33  ;;  %1858 = vpow2.f32 %v1497_v44  ;;  %v669_v59 = vmul.f32 %v1837_v12, %v2247_v51  ;;  %v587_v51 = vadd.f32 1.0, %v2376_v16 }
 0x252   :  { %v1841_v60 = vpop.eup %1840  ;;  %1270 = vmatprep.mubr.bf16.mxu0 %v704_v40  ;;  %1860 = vpow2.f32 %v1499_v13  ;;  %v668_v11 = vmul.f32 %v1839_v54, %v2250_v9  ;;  %v1740_v9 = vld [vmem:[%s2507_s5 + $0x138] sm:$0xff]  }
 0x253   :  { %v1843_v53 = vpop.eup %1842  ;;  %1319 = vmatprep.mubr.bf16.mxu1 %v706_v39  ;;  %1271 = vmatmul.mubr.bf16.gmra.mrb[20].mxu0 %v703_v0  ;;  %v670_v4 = vmul.f32 %v1841_v60, %v2257_v55  ;;  %1862 = vrcp.f32 %v587_v51 }
 0x254   :  { %v1845_v21 = vpop.eup %1844  ;;  %v675_v17 = vmul.f32 %v1843_v53, %v2260_v57  ;;  %1320 = vmatmul.mubr.bf16.gmra.mrb[20].mxu1 %v705_v49  ;;  %1632 = vmatpush3.bf16.msra.mxu0 %v1732_v25  ;;  %v1738_v57 = vld [vmem:[%s2507_s5 + $0x178] sm:$0xff]   ;;  %1864 = vrcp.f32 %v589_v19 }
 0x255   :  { %v1847_v29 = vpop.eup %1846  ;;  %v677_v2 = vmul.f32 %v1845_v21, %v2267_v62  ;;  %1660 = vmatpush3.bf16.msra.mxu1 %v1733_v41  ;;  %1633 = vmatprep.subr.bf16.mxu0 %v1734_v38  ;;  %v1739_v62 = vld [vmem:[%s2507_s5 + $0x1f8] sm:$0xff]  }
 0x256   :  { %v1849_v10 = vpop.eup %1848  ;;  %v699_v0 = vpack.c.bf16 %v675_v17, %v667_v47  ;;  %v676_v3 = vmul.f32 %v1847_v29, %v2270_v63  ;;  %1661 = vmatprep.subr.bf16.mxu1 %v1735_v50 }
 0x257   :  { %v701_v6 = vpack.c.bf16 %v677_v2, %v669_v59  ;;  %v678_v48 = vmul.f32 %v1849_v10, %v2280_v15  ;;  %v1851_v63 = vpop.eup %1850 }
 0x258   :  { %v700_v26 = vpack.c.bf16 %v676_v3, %v668_v11  ;;  %1634 = vmatpush3.bf16.msra.mxu0 %v1736_v18  ;;  %v1853_v55 = vpop.eup %1852  ;;  %v588_v24 = vadd.f32 1.0, %v1851_v63 }
 0x259   :  { %v702_v16 = vpack.c.bf16 %v678_v48, %v670_v4  ;;  %1662 = vmatpush3.bf16.msra.mxu1 %v1737_v45  ;;  %1635 = vmatprep.subr.bf16.mxu0 %v1738_v57  ;;  %v1855_v15 = vpop.eup %1854  ;;  %v590_v23 = vadd.f32 1.0, %v1853_v55 }
 0x25a   :  { %1360 = vmatprep.mubr.bf16.mxu0 %v700_v26  ;;  %1663 = vmatprep.subr.bf16.mxu1 %v1739_v62  ;;  %v1857_v27 = vpop.eup %1856  ;;  %1866 = vrcp.f32 %v588_v24  ;;  %v595_v31 = vadd.f32 1.0, %v1855_v15 }
 0x25b   :  { %1409 = vmatprep.mubr.bf16.mxu1 %v702_v16  ;;  %v1859_v58 = vpop.eup %1858  ;;  %1868 = vrcp.f32 %v590_v23  ;;  %v597_v56 = vadd.f32 1.0, %v1857_v27 }
 0x25c   :  { %1636 = vmatpush3.bf16.msra.mxu0 %v1740_v9  ;;  %v1861_v7 = vpop.eup %1860  ;;  %1870 = vrcp.f32 %v595_v31  ;;  %v596_v32 = vadd.f32 1.0, %v1859_v58 }
 0x25d   :  { %1664 = vmatpush3.bf16.msra.mxu1 %v1741_v52  ;;  %1872 = vrcp.f32 %v597_v56  ;;  %v598_v34 = vadd.f32 1.0, %v1861_v7  ;;  %v1863_v33 = vpop.eup %1862 }
 0x25e   :  { %1874 = vrcp.f32 %v596_v32  ;;  %v1865_v1 = vpop.eup %1864  ;;  %v683_v37 = vmul.f32 %v1863_v33, %v2288_v8 }
 0x25f   :  { %1361 = vmatmul.mubr.bf16.vlgmr.msra.gmra.mrb[24].mxu0 %v699_v0  ;;  %1876 = vrcp.f32 %v598_v34  ;;  %v685_v49 = vmul.f32 %v1865_v1, %v2293_v42 }
 0x260   :  { %1410 = vmatmul.mubr.bf16.vlgmr.msra.gmra.mrb[24].mxu1 %v701_v6 }
 0x264   :  { %v1867_v22 = vpop.eup %1866 }
 0x265   :  { %v1869_v35 = vpop.eup %1868  ;;  %v684_v40 = vmul.f32 %v1867_v22, %v2354_v28  ;;  %v1500_v28 = vld [vmem:[%s2509_s6] ss:$0 sm:$0xff] }
 0x266   :  { %v1871_v43 = vpop.eup %1870  ;;  %v686_v39 = vmul.f32 %v1869_v35, %v2361_v61 }
 0x267   :  { %v1873_v44 = vpop.eup %1872  ;;  %v691_v20 = vmul.f32 %v1871_v43, %v2371_v5 }
 0x268   :  { %v1875_v14 = vpop.eup %1874  ;;  %v693_v12 = vmul.f32 %v1873_v44, %v2380_v36 }
 0x269   :  { %v1877_v13 = vpop.eup %1876  ;;  %v692_v25 = vmul.f32 %v1875_v14, %v2384_v46  ;;  %v707_v54 = vpack.c.bf16 %v691_v20, %v683_v37  ;;  %v1878_v37 = vld [vmem:[%s2501_s0] sm:$0xff] }
 0x26a   :  { %v694_v41 = vmul.f32 %v1877_v13, %v2395_v30  ;;  %v709_v38 = vpack.c.bf16 %v693_v12, %v685_v49  ;;  %v1879_v49 = vld [vmem:[%s2501_s0 + $0x8] sm:$0xff] }
 0x26b   :  { %v708_v60 = vpack.c.bf16 %v692_v25, %v684_v40 }
 0x26c   :  { %v710_v8 = vpack.c.bf16 %v694_v41, %v686_v39 }
 0x26d   :  { %1368 = vmatprep.mubr.bf16.mxu0 %v708_v60 }
 0x26e   :  { %1417 = vmatprep.mubr.bf16.mxu1 %v710_v8  ;;  %1369 = vmatmul.mubr.bf16.gmra.mrb[28].mxu0 %v707_v54 }
 0x26f   :  { %1418 = vmatmul.mubr.bf16.gmra.mrb[28].mxu1 %v709_v38 }
 0x311   :  { %v1581_v42 = vpop.f32.mrb[16].mxu0 }
 0x312   :  { %v1609_v5 = vpop.f32.mrb[16].mxu1  ;;  %v1582_v36 = vpop.f32.mrb[17].mxu0 }
 0x313   :  { %v1583_v46 = vadd.f32 %v1582_v36, %v1581_v42  ;;  %v1610_v50 = vpop.f32.mrb[17].mxu1  ;;  %v1584_v53 = vpop.f32.mrb[18].mxu0 }
 0x314   :  { %v1611_v61 = vadd.f32 %v1610_v50, %v1609_v5  ;;  %v1612_v21 = vpop.f32.mrb[18].mxu1  ;;  %v1585_v30 = vpop.f32.mrb[19].mxu0 }
 0x315   :  { %v1265_v47 = vadd.f32 %v1583_v46, %v1500_v28  ;;  %v1586_v17 = vadd.f32 %v1585_v30, %v1584_v53  ;;  %v1613_v18 = vpop.f32.mrb[19].mxu1 }
 0x316   :  { %v1614_v29 = vadd.f32 %v1613_v18, %v1612_v21  ;;  %v1880_v21 = vld [vmem:[%s2501_s0 + $0x10] sm:$0xff] }
 0x317   :  { %v1314_v59 = vadd.f32 %v1611_v61, %v1265_v47  ;;  %v1268_v2 = vadd.f32 %v1586_v17, %v1500_v28  ;;  %v1881_v17 = vld [vmem:[%s2501_s0 + $0x18] sm:$0xff] }
 0x319   :  { %v1317_v45 = vadd.f32 %v1614_v29, %v1268_v2 }
 0x326   :  { %v1587_v57 = vpop.f32.mrb[20].mxu0 }
 0x327   :  { %v1615_v10 = vpop.f32.mrb[20].mxu1  ;;  %v1588_v11 = vpop.f32.mrb[21].mxu0 }
 0x328   :  { %v1589_v0 = vadd.f32 %v1588_v11, %v1587_v57  ;;  %v1616_v3 = vpop.f32.mrb[21].mxu1  ;;  %v1590_v51 = vpop.f32.mrb[22].mxu0 }
 0x329   :  { %v1617_v62 = vadd.f32 %v1616_v3, %v1615_v10  ;;  %v1618_v4 = vpop.f32.mrb[22].mxu1  ;;  %v1591_v6 = vpop.f32.mrb[23].mxu0 }
 0x32a   :  { %v1273_v48 = vadd.f32 %v1589_v0, %v1500_v28  ;;  %v1592_v19 = vadd.f32 %v1591_v6, %v1590_v51  ;;  %v1619_v26 = vpop.f32.mrb[23].mxu1 }
 0x32b   :  { %v1620_v9 = vadd.f32 %v1619_v26, %v1618_v4 }
 0x32c   :  { %v1322_v63 = vadd.f32 %v1617_v62, %v1273_v48  ;;  %v1276_v16 = vadd.f32 %v1592_v19, %v1500_v28 }
 0x32e   :  { %v1325_v52 = vadd.f32 %v1620_v9, %v1276_v16 }
 0x332   :  { %v1637_v55 = vpop.f32.mrb[24].mxu0 }
 0x333   :  { %v1665_v24 = vpop.f32.mrb[24].mxu1  ;;  %v1638_v15 = vpop.f32.mrb[25].mxu0 }
 0x334   :  { %v1639_v23 = vadd.f32 %v1638_v15, %v1637_v55  ;;  %v1666_v27 = vpop.f32.mrb[25].mxu1  ;;  %v1640_v31 = vpop.f32.mrb[26].mxu0 }
 0x335   :  { %v1667_v58 = vadd.f32 %v1666_v27, %v1665_v24  ;;  %v1668_v56 = vpop.f32.mrb[26].mxu1  ;;  %v1641_v7 = vpop.f32.mrb[27].mxu0 }
 0x336   :  { %v1363_v32 = vadd.f32 %v1639_v23, %v1314_v59  ;;  %v1642_v34 = vadd.f32 %v1641_v7, %v1640_v31  ;;  %v1669_v33 = vpop.f32.mrb[27].mxu1 }
 0x337   :  { %v1670_v1 = vadd.f32 %v1669_v33, %v1668_v56 }
 0x338   :  { %v1412_v22 = vadd.f32 %v1667_v58, %v1363_v32  ;;  %v1366_v35 = vadd.f32 %v1642_v34, %v1317_v45 }
 0x33a   :  { %v1426_v43 = vmul.f32 0.5, %v1412_v22  ;;  %v1415_v44 = vadd.f32 %v1670_v1, %v1366_v35 }
 0x33c   :  { %v1430_v20 = vadd.f32 %v1878_v37, %v1426_v43  ;;  %v1427_v14 = vmul.f32 0.5, %v1415_v44 }
 0x33e   :  { %1434 = vst.msk [vmem:[%s2510_s9] sm:$0xff] %vm39_vm0, %v1430_v20  ;;  %v1431_v12 = vadd.f32 %v1879_v49, %v1427_v14 }
 0x340   :  { %1435 = vst.msk [vmem:[%s2510_s9 + $0x8] sm:$0xff] %vm39_vm0, %v1431_v12 }
 0x341   :  { %v1643_v13 = vpop.f32.mrb[28].mxu0 }
 0x342   :  { %v1671_v40 = vpop.f32.mrb[28].mxu1  ;;  %v1644_v25 = vpop.f32.mrb[29].mxu0 }
 0x343   :  { %v1645_v54 = vadd.f32 %v1644_v25, %v1643_v13  ;;  %v1672_v39 = vpop.f32.mrb[29].mxu1  ;;  %v1646_v41 = vpop.f32.mrb[30].mxu0 }
 0x344   :  { %v1673_v38 = vadd.f32 %v1672_v39, %v1671_v40  ;;  %v1674_v60 = vpop.f32.mrb[30].mxu1  ;;  %v1647_v8 = vpop.f32.mrb[31].mxu0 }
 0x345   :  { %v1371_v42 = vadd.f32 %v1645_v54, %v1322_v63  ;;  %v1648_v5 = vadd.f32 %v1647_v8, %v1646_v41  ;;  %v1675_v28 = vpop.f32.mrb[31].mxu1 }
 0x346   :  { %v1676_v36 = vadd.f32 %v1675_v28, %v1674_v60 }
 0x347   :  { %v1420_v46 = vadd.f32 %v1673_v38, %v1371_v42  ;;  %v1374_v50 = vadd.f32 %v1648_v5, %v1325_v52 }
 0x349   :  { %v1428_v53 = vmul.f32 0.5, %v1420_v46  ;;  %v1423_v61 = vadd.f32 %v1676_v36, %v1374_v50 }
 0x34b   :  { %v1432_v30 = vadd.f32 %v1880_v21, %v1428_v53  ;;  %v1429_v47 = vmul.f32 0.5, %v1423_v61 }
 0x34d   :  { %1436 = vst.msk [vmem:[%s2510_s9 + $0x10] sm:$0xff] %vm39_vm0, %v1432_v30  ;;  %v1433_v18 = vadd.f32 %v1881_v17, %v1429_v47 }
 0x34f   :  { %1437 = vst.msk [vmem:[%s2510_s9 + $0x18] sm:$0xff] %vm39_vm0, %v1433_v18 }

// kernel: _lambda_.20
= control target key start
LH: loop header
LB: loop body
LE: loop exit
PB: predicated region body
PF: predicated region fallthrough
CT: control target
= control target key end

     0   :  { %s983_s17 = smov 0   ;;  %s1069_s0 = inlined_call_operand.vmem [shape: f32[2,16,32], index: 0, kind: input, shape index: {}]   ;;  %s1070_s1 = inlined_call_operand.vmem [shape: f32[1,32], index: 1, kind: input, shape index: {}, may-alias: {1,7}]   ;;  %s1071_s2 = inlined_call_operand.vmem [shape: f32[1,32], index: 2, kind: input, shape index: {}, may-alias: {2,8}]   ;;  %s1072_s3 = inlined_call_operand.vmem [shape: bf16[32,64], index: 3, kind: input, shape index: {}]   ;;  %s1073_s4 = inlined_call_operand.vmem [shape: f32[1,64], index: 4, kind: input, shape index: {}]   ;;  %s1074_s5 = inlined_call_operand.vmem [shape: f32[5,32], index: 5, kind: input, shape index: {}]   ;;  %s1075_s6 = inlined_call_operand.vmem [shape: f32[1,32], index: 6, kind: input, shape index: {}]   ;;  %s1076_s7 = inlined_call_operand.vmem [shape: f32[1,32], index: 7, kind: input, shape index: {}, may-alias: {1,7}]   ;;  %s1077_s8 = inlined_call_operand.vmem [shape: f32[1,32], index: 8, kind: input, shape index: {}, may-alias: {2,8}]   ;;  %s1078_s9 = inlined_call_operand.vmem [shape: bf16[32,32], index: 9, kind: input, shape index: {}]   ;;  %s1079_s10 = inlined_call_operand.vmem [shape: f32[1,32], index: 10, kind: input, shape index: {}]   ;;  %s1080_s11 = inlined_call_operand.vmem [shape: f32[2,16,32], index: 11, kind: output, shape index: {}]  }
   0x1 LB: > { %s823_s18 = sadd.s32 4294967295, %s918_s17   ;;  %p827_p0 = scmp.ge.s32.totalorder %s918_s17, 1  ;;  %s918_s17 = sphi %s983_s17, %s21_s17  }
   0x2   : > { %p337_p1 = scmp.lt.s32.totalorder %s918_s17, 3 }
   0x4   : > { %p338_p2 = pnand %p827_p0, %p337_p1 }
   0x5   : > { %p377_p3 = scmp.lt.s32.totalorder (!%p338_p2), %s823_s18, 1  ;;  %vm392_vm0 = vcmask (!%p338_p2), 261120   ;;  %v886_v14 = vld [vmem:[%s1072_s3] sm:$0xff] (!%p338_p2)   ;;  %v920_v15 = vmov (!%p338_p2), 0.0   ;;  %v887_v16 = vld [vmem:[%s1072_s3 + $0x8] sm:$0xff] (!%p338_p2)   ;;  %vm921_vm1 = vmmov (!%p338_p2), 0   ;;  %v538_v51 = vlaneseq (!%p338_p2) }
   0x6   : > { %341 = sbr.rel (%p338_p2) target bundleno = 1020 (0x3fc), region = 64  ;;  %859 = vmatprep.subr.bf16.mxu0 (!%p338_p2), %v920_v15  ;;  %867 = vmatprep.subr.bf16.mxu1 (!%p338_p2), %v920_v15  ;;  %v832_v25 = vld [vmem:[%s1070_s1] ss:$0 sm:$0xff] (!%p338_p2)  ;;  %s922_s14 = smov (!%p338_p2), 96   ;;  %v889_v50 = vld [vmem:[%s1078_s9 + $0x8] sm:$0xff] (!%p338_p2)   ;;  %vm528_vm2 = vcmask (!%p338_p2), 1041408  }
   0x7   : > { %860 = vmatpush3.bf16.msra.mxu0 (!%p338_p2), %v886_v14  ;;  %863 = vmatprep.mubr.msk.bf16.mxu0 (!%p338_p2), %vm921_vm1, %v920_v15  ;;  %v833_v29 = vld [vmem:[%s1071_s2] ss:$0 sm:$0xff] (!%p338_p2)  ;;  %v539_v52 = vshrl.u32 (!%p338_p2), %v538_v51, 7  ;;  %vm556_vm3 = vcmask (!%p338_p2), 1046528   ;;  %vm576_vm4 = vcmask (!%p338_p2), 1045504   ;;  %vm596_vm5 = vcmask (!%p338_p2), 1044480  }
   0x8   : > { %861 = vmatprep.subr.bf16.mxu0 (!%p338_p2), %v920_v15  ;;  %871 = vmatprep.mubr.msk.bf16.mxu1 (!%p338_p2), %vm921_vm1, %v920_v15  ;;  %v834_v34 = vld [vmem:[%s1073_s4] ss:$0 sm:$0xff] (!%p338_p2)  ;;  %vm616_vm6 = vcmask (!%p338_p2), 1043456  }
   0x9   : > { %v888_v49 = vld [vmem:[%s1078_s9] sm:$0xff] (!%p338_p2)   ;;  %v548_v53 = vsub.s32 (!%p338_p2), 1, %v539_v52  ;;  %v540_v55 = vsub.s32 (!%p338_p2), 0, %v539_v52  ;;  %v568_v56 = vsub.s32 (!%p338_p2), 2, %v539_v52  ;;  %v588_v57 = vsub.s32 (!%p338_p2), 3, %v539_v52 }
   0xa   : > { %868 = vmatpush3.bf16.msra.mxu1 (!%p338_p2), %v888_v49  ;;  %v537_v54 = vld [vmem:[%s1074_s5] sm:$0x1f] (!%p338_p2)  ;;  %v608_v62 = vsub.s32 (!%p338_p2), 4, %v539_v52 }
   0xb   : > { %862 = vmatpush3.bf16.msra.mxu0 (!%p338_p2), %v887_v16  ;;  %869 = vmatprep.subr.bf16.mxu1 (!%p338_p2), %v920_v15  ;;  %v549_v60 = vrot.slane (!%p338_p2), %v537_v54, %v548_v53  ;;  %v840_v49 = vld [vmem:[%s1075_s6] ss:$0 sm:$0xff] (!%p338_p2) }
   0xd   : > { %s1082_s18 = smov (!%p377_p3, %s823_s18), 1 }
   0xe   : > { %s851_s19 = sshll.u32 %s1082_s18, 4  ;;  %870 = vmatpush3.bf16.msra.mxu1 %v889_v50 }
   0xf   : > { %s381_s22 = scalar_lea.vmem %s1069_s0, %s851_s19  ;;  %s386_s15 = scalar_lea.vmem %s1080_s11, %s851_s19 }
  0x10   : > { %v999_v0 = vld [vmem:[%s381_s22] sm:$0xff]  ;;  %v1001_v1 = vld [vmem:[%s381_s22 + $0x8] sm:$0xff] }
  0x11   : > { %v393_v2 = vsel %vm392_vm0, %v999_v0, 0.0  ;;  %v396_v3 = vsel %vm392_vm0, %v1001_v1, 0.0 }
  0x12   : > { %394 = vadd.xlane.f32.xlu0 %v393_v2 }
  0x16   : > { %397 = vadd.xlane.f32.xlu0 %v396_v3  ;;  %v541_v3 = vrot.slane %v537_v54, %v540_v55 }
  0x9f   : > { %v395_v4 = vpop.xlane.xlu0 %394 }
  0xa0   : > { %v400_v5 = vmul.f32 0.03125, %v395_v4  ;;  %v569_v4 = vrot.slane %v537_v54, %v568_v56 }
  0xa2   : > { %v402_v6 = vsub.f32 %v999_v0, %v400_v5  ;;  %v589_v5 = vrot.slane %v537_v54, %v588_v57 }
  0xa3   : > { %v398_v7 = vpop.xlane.xlu0 %397 }
  0xa4   : > { %v401_v8 = vmul.f32 0.03125, %v398_v7  ;;  %v404_v9 = vmul.f32 %v402_v6, %v402_v6 }
  0xa6   : > { %v403_v10 = vsub.f32 %v1001_v1, %v401_v8  ;;  %v406_v11 = vsel %vm392_vm0, %v404_v9, 0.0  ;;  %v609_v9 = vrot.slane %v537_v54, %v608_v62 }
  0xa7   : > { %407 = vadd.xlane.f32.xlu1 %v406_v11 }
  0xa8   : > { %v405_v12 = vmul.f32 %v403_v10, %v403_v10 }
  0xaa   : > { %v409_v13 = vsel %vm392_vm0, %v405_v12, 0.0 }
  0xab   : > { %410 = vadd.xlane.f32.xlu1 %v409_v13 }
 0x134   : > { %v408_v17 = vpop.xlane.xlu1 %407 }
 0x135   : > { %v412_v18 = vmul.f32 0.03125, %v408_v17 }
 0x137   : > { %v414_v19 = vadd.f32 1e-05, %v412_v18 }
 0x138   : > { %v411_v20 = vpop.xlane.xlu1 %410 }
 0x139   : > { %890 = vrsqrt.f32 %v414_v19  ;;  %v413_v21 = vmul.f32 0.03125, %v411_v20 }
 0x13b   : > { %v415_v22 = vadd.f32 1e-05, %v413_v21 }
 0x13d   : > { %892 = vrsqrt.f32 %v415_v22 }
 0x143   : > { %v891_v23 = vpop.eup %890 }
 0x144   : > { %v418_v24 = vmul.f32 %v891_v23, %v402_v6 }
 0x146   : > { %v426_v28 = vmul.f32 %v832_v25, %v418_v24 }
 0x147   : > { %v893_v26 = vpop.eup %892 }
 0x148   : > { %v419_v27 = vmul.f32 %v893_v26, %v403_v10  ;;  %v434_v31 = vadd.f32 %v833_v29, %v426_v28 }
 0x14a   : > { %v427_v30 = vmul.f32 %v832_v25, %v419_v27 }
 0x14c   : > { %v435_v32 = vadd.f32 %v833_v29, %v427_v30 }
 0x14e   : > { %v436_v33 = vpack.c.bf16 %v435_v32, %v434_v31 }
 0x150   : > { %864 = vmatmul.mubr.msk.bf16.vlgmr.msra.gmra.mrb[0].mxu0 %vm392_vm0, %v436_v33 }
 0x223   : > { %v497_v35 = vpop.f32.mrb[0].mxu0 }
 0x224   : > { %v498_v36 = vadd.f32 %v834_v34, %v497_v35  ;;  %v865_v37 = vpop.f32.mrb[1].mxu0 }
 0x225   : > { %v500_v38 = vpop.f32.mrb[2].mxu0 }
 0x226   : > { %v838_v39 = vmul.f32 -1.442695, %v498_v36  ;;  %v501_v40 = vadd.f32 %v834_v34, %v500_v38  ;;  %v866_v41 = vpop.f32.mrb[3].mxu0 }
 0x228   : > { %894 = vpow2.f32 %v838_v39  ;;  %v839_v42 = vmul.f32 -1.442695, %v501_v40 }
 0x22a   : > { %896 = vpow2.f32 %v839_v42 }
 0x232   : > { %v895_v43 = vpop.eup %894 }
 0x233   : > { %v510_v44 = vadd.f32 1.0, %v895_v43 }
 0x234   : > { %v897_v45 = vpop.eup %896 }
 0x235   : > { %898 = vrcp.f32 %v510_v44  ;;  %v511_v46 = vadd.f32 1.0, %v897_v45 }
 0x237   : > { %900 = vrcp.f32 %v511_v46 }
 0x23f   : > { %v899_v47 = vpop.eup %898 }
 0x240   : > { %518 = vrot.lane.b32.xlu0 %v899_v47, %s922_s14 }
 0x241   : > { %v901_v48 = vpop.eup %900 }
 0x242   : > { %520 = vrot.lane.b32.xlu1 %v901_v48, %s922_s14 }
 0x2b2   : > { %v519_v58 = vpop.permute.xlu0 %518 }
 0x2b3   : > { %v524_v59 = vmul.f32 %v519_v58, %v498_v36 }
 0x2b4   : > { %v521_v61 = vpop.permute.xlu1 %520 }
 0x2b5   : > { %v529_v63 = vrot.slane %v524_v59, 6  ;;  %v525_v2 = vmul.f32 %v521_v61, %v501_v40 }
 0x2b7   : > { %v535_v6 = vsel %vm528_vm2, 0.0, %v529_v63  ;;  %v530_v7 = vrot.slane %v525_v2, 6 }
 0x2b8   : > { %v550_v8 = vmul.f32 %v549_v60, %v535_v6  ;;  %v542_v12 = vmul.f32 %v541_v3, %v535_v6  ;;  %v570_v13 = vmul.f32 %v569_v4, %v535_v6  ;;  %v590_v14 = vmul.f32 %v589_v5, %v535_v6 }
 0x2b9   : > { %v531_v10 = vsel %vm528_vm2, %v529_v63, %v530_v7  ;;  %v536_v11 = vsel %vm528_vm2, %v530_v7, 0.0  ;;  %v610_v28 = vmul.f32 %v609_v9, %v535_v6 }
 0x2ba   : > { %v557_v15 = vrot.slane %v550_v8, 1  ;;  %v551_v16 = vmul.f32 %v549_v60, %v531_v10  ;;  %v552_v17 = vmul.f32 %v549_v60, %v536_v11  ;;  %v571_v18 = vmul.f32 %v569_v4, %v531_v10 }
 0x2bb   : > { %v572_v19 = vmul.f32 %v569_v4, %v536_v11  ;;  %v591_v20 = vmul.f32 %v589_v5, %v531_v10  ;;  %v592_v21 = vmul.f32 %v589_v5, %v536_v11  ;;  %v611_v22 = vmul.f32 %v609_v9, %v531_v10 }
 0x2bc   : > { %v558_v23 = vrot.slane %v551_v16, 1  ;;  %v560_v24 = vrot.slane %v552_v17, 1  ;;  %v578_v25 = vrot.slane %v571_v18, 2  ;;  %v612_v26 = vmul.f32 %v609_v9, %v536_v11 }
 0x2bd   : > { %v577_v27 = vrot.slane %v570_v13, 2  ;;  %v543_v29 = vmul.f32 %v541_v3, %v531_v10  ;;  %v580_v30 = vrot.slane %v572_v19, 2  ;;  %v598_v33 = vrot.slane %v591_v20, 3  ;;  %v841_v20 = vld [vmem:[%s1076_s7] ss:$0 sm:$0xff] }
 0x2be   : > { %v559_v31 = vsel %vm556_vm3, %v557_v15, %v558_v23  ;;  %v561_v32 = vsel %vm556_vm3, %v558_v23, %v560_v24  ;;  %v600_v34 = vrot.slane %v592_v21, 3  ;;  %v597_v35 = vrot.slane %v590_v14, 3  ;;  %v842_v23 = vld [vmem:[%s1077_s8] ss:$0 sm:$0xff] }
 0x2bf   : > { %v564_v36 = vadd.f32 %v559_v31, %v542_v12  ;;  %v565_v37 = vadd.f32 %v561_v32, %v543_v29  ;;  %v579_v38 = vsel %vm576_vm4, %v577_v27, %v578_v25  ;;  %v581_v39 = vsel %vm576_vm4, %v578_v25, %v580_v30 }
 0x2c0   : > { %v618_v40 = vrot.slane %v611_v22, 4  ;;  %v620_v41 = vrot.slane %v612_v26, 4  ;;  %v617_v44 = vrot.slane %v610_v28, 4  ;;  %v599_v45 = vsel %vm596_vm5, %v597_v35, %v598_v33 }
 0x2c1   : > { %v584_v42 = vadd.f32 %v579_v38, %v564_v36  ;;  %v585_v43 = vadd.f32 %v581_v39, %v565_v37  ;;  %v601_v46 = vsel %vm596_vm5, %v598_v33, %v600_v34  ;;  %v845_v39 = vld [vmem:[%s1079_s10] ss:$0 sm:$0xff] }
 0x2c2   : > { %v619_v50 = vsel %vm616_vm6, %v617_v44, %v618_v40  ;;  %v621_v51 = vsel %vm616_vm6, %v618_v40, %v620_v41 }
 0x2c3   : > { %v604_v47 = vadd.f32 %v599_v45, %v584_v42  ;;  %v605_v48 = vadd.f32 %v601_v46, %v585_v43 }
 0x2c5   : > { %v624_v52 = vadd.f32 %v619_v50, %v604_v47  ;;  %v625_v53 = vadd.f32 %v621_v51, %v605_v48 }
 0x2c7   : > { %v633_v54 = vadd.f32 %v840_v49, %v624_v52  ;;  %v634_v55 = vadd.f32 %v840_v49, %v625_v53 }
 0x2c9   : > { %v635_v56 = vsel %vm392_vm0, %v633_v54, 0.0  ;;  %v636_v57 = vsel %vm392_vm0, %v634_v55, 0.0 }
 0x2ca   : > { %v637_v58 = vadd.f32 %v636_v57, %v635_v56 }
 0x2cc   : > { %v638_v59 = vrot.slane %v637_v58, 4 }
 0x2ce   : > { %v639_v60 = vadd.f32 %v638_v59, %v637_v58 }
 0x2d0   : > { %v640_v61 = vrot.slane %v639_v60, 2 }
 0x2d2   : > { %v641_v62 = vadd.f32 %v640_v61, %v639_v60 }
 0x2d4   : > { %v642_v63 = vrot.slane %v641_v62, 1 }
 0x2d6   : > { %v643_v2 = vadd.f32 %v642_v63, %v641_v62 }
 0x2d8   : > { %v645_v3 = vmul.f32 0.0625, %v643_v2 }
 0x2da   : > { %v647_v4 = vsub.f32 %v634_v55, %v645_v3  ;;  %v646_v5 = vsub.f32 %v633_v54, %v645_v3 }
 0x2dc   : > { %v649_v6 = vmul.f32 %v647_v4, %v647_v4  ;;  %v648_v7 = vmul.f32 %v646_v5, %v646_v5 }
 0x2de   : > { %v651_v8 = vsel %vm392_vm0, %v649_v6, 0.0  ;;  %v650_v9 = vsel %vm392_vm0, %v648_v7, 0.0 }
 0x2df   : > { %v652_v10 = vadd.f32 %v651_v8, %v650_v9 }
 0x2e1   : > { %v653_v11 = vrot.slane %v652_v10, 4 }
 0x2e3   : > { %v654_v12 = vadd.f32 %v653_v11, %v652_v10 }
 0x2e5   : > { %v655_v13 = vrot.slane %v654_v12, 2 }
 0x2e7   : > { %v656_v14 = vadd.f32 %v655_v13, %v654_v12 }
 0x2e9   : > { %v657_v15 = vrot.slane %v656_v14, 1 }
 0x2eb   : > { %v658_v16 = vadd.f32 %v657_v15, %v656_v14 }
 0x2ed   : > { %v659_v17 = vmul.f32 0.0625, %v658_v16 }
 0x2ef   : > { %v660_v18 = vadd.f32 1e-05, %v659_v17 }
 0x2f1   : > { %902 = vrsqrt.f32 %v660_v18 }
 0x2fb   : > { %v903_v19 = vpop.eup %902 }
 0x2fc   : > { %v662_v21 = vmul.f32 %v903_v19, %v646_v5  ;;  %v663_v22 = vmul.f32 %v903_v19, %v647_v4 }
 0x2fe   : > { %v671_v24 = vmul.f32 %v841_v20, %v662_v21  ;;  %v672_v25 = vmul.f32 %v841_v20, %v663_v22 }
 0x300   : > { %v680_v26 = vadd.f32 %v842_v23, %v671_v24  ;;  %v681_v27 = vadd.f32 %v842_v23, %v672_v25 }
 0x302   : > { %v843_v28 = vmul.f32 -1.442695, %v680_v26  ;;  %v844_v29 = vmul.f32 -1.442695, %v681_v27 }
 0x304   : > { %904 = vpow2.f32 %v843_v28 }
 0x305   : > { %906 = vpow2.f32 %v844_v29 }
 0x30e   : > { %v905_v30 = vpop.eup %904 }
 0x30f   : > { %v907_v31 = vpop.eup %906  ;;  %v688_v32 = vadd.f32 1.0, %v905_v30 }
 0x310   : > { %v689_v33 = vadd.f32 1.0, %v907_v31 }
 0x311   : > { %908 = vrcp.f32 %v688_v32 }
 0x312   : > { %910 = vrcp.f32 %v689_v33 }
 0x31b   : > { %v909_v34 = vpop.eup %908 }
 0x31c   : > { %v911_v35 = vpop.eup %910  ;;  %v694_v36 = vmul.f32 %v909_v34, %v680_v26 }
 0x31d   : > { %v695_v37 = vmul.f32 %v911_v35, %v681_v27 }
 0x31f   : > { %v696_v38 = vpack.c.bf16 %v695_v37, %v694_v36 }
 0x321   : > { %872 = vmatmul.mubr.msk.bf16.vlgmr.msra.gmra.mrb[0].mxu1 %vm392_vm0, %v696_v38 }
 0x3f4   : > { %v757_v40 = vpop.f32.mrb[0].mxu1 }
 0x3f5   : > { %v758_v41 = vadd.f32 %v845_v39, %v757_v40  ;;  %v873_v42 = vpop.f32.mrb[1].mxu1 }
 0x3f6   : > { %v760_v43 = vpop.f32.mrb[2].mxu1 }
 0x3f7   : > { %v764_v44 = vadd.f32 %v758_v41, %v999_v0  ;;  %v761_v45 = vadd.f32 %v845_v39, %v760_v43  ;;  %v874_v46 = vpop.f32.mrb[3].mxu1 }
 0x3f9   : > { %766 = vst.msk [vmem:[%s386_s15] sm:$0xff] %vm392_vm0, %v764_v44  ;;  %v765_v47 = vadd.f32 %v761_v45, %v1001_v1 }
 0x3fb   : > { %767 = vst.msk [vmem:[%s386_s15 + $0x8] sm:$0xff] %vm392_vm0, %v765_v47 }
 0x3fc PF: > { %s21_s17 = sadd.s32 1, %s918_s17  }
 0x3fd   : > { %p18_p4 = scmp.ge.s32.totalorder %s21_s17, 4  }
 0x3ff   :  { %20 = sbr.rel (!%p18_p4) target bundleno = 1 (0x1), region = 94 }

// kernel: _lambda_.19
= control target key start
LH: loop header
LB: loop body
LE: loop exit
PB: predicated region body
PF: predicated region fallthrough
CT: control target
= control target key end

     0   :  { %s2367_s27 = smov 0   ;;  %s2668_s0 = inlined_call_operand.vmem [shape: f32[2,16,32], index: 0, kind: input, shape index: {}]   ;;  %s2669_s1 = inlined_call_operand.vmem [shape: f32[2,1,16], index: 1, kind: input, shape index: {}]   ;;  %s2670_s2 = inlined_call_operand.vmem [shape: f32[1,32], index: 2, kind: input, shape index: {}]   ;;  %s2671_s3 = inlined_call_operand.vmem [shape: f32[1,32], index: 3, kind: input, shape index: {}]   ;;  %s2672_s4 = inlined_call_operand.vmem [shape: bf16[32,96], index: 4, kind: input, shape index: {}]   ;;  %s2673_s5 = inlined_call_operand.vmem [shape: f32[1,96], index: 5, kind: input, shape index: {}]   ;;  %s2674_s6 = inlined_call_operand.vmem [shape: f32[32,32], index: 6, kind: input, shape index: {}]   ;;  %s2675_s7 = inlined_call_operand.vmem [shape: f32[1,32], index: 7, kind: input, shape index: {}]   ;;  %s2676_s8 = inlined_call_operand.vmem [shape: f32[2,16,32], index: 8, kind: output, shape index: {}]  }
   0x1 LB: > { %s1936_s28 = sadd.s32 4294967295, %s2295_s27   ;;  %p1940_p0 = scmp.ge.s32.totalorder %s2295_s27, 1  ;;  %s2295_s27 = sphi %s2367_s27, %s18_s27  }
   0x2   : > { %p270_p1 = scmp.lt.s32.totalorder %s2295_s27, 3 }
   0x4   : > { %p271_p2 = pnand %p1940_p0, %p270_p1 }
   0x5   : > { %p307_p3 = scmp.lt.s32.totalorder (!%p271_p2), %s1936_s28, 1  ;;  %vm325_vm0 = vcmask (!%p271_p2), 261120   ;;  %v2217_v14 = vld [vmem:[%s2672_s4] sm:$0xff] (!%p271_p2)   ;;  %v2297_v15 = vmov (!%p271_p2), 0.0   ;;  %v2218_v16 = vld [vmem:[%s2672_s4 + $0x8] sm:$0xff] (!%p271_p2)   ;;  %vm2298_vm1 = vmmov (!%p271_p2), 0  }
   0x6   : > { %274 = sbr.rel (%p271_p2) target bundleno = 5132 (0x140c), region = 52  ;;  %2032 = vmatprep.subr.bf16.mxu0 (!%p271_p2), %v2297_v15  ;;  %2040 = vmatprep.subr.bf16.mxu1 (!%p271_p2), %v2297_v15  ;;  %v1945_v25 = vld [vmem:[%s2670_s2] ss:$0 sm:$0xff] (!%p271_p2)  ;;  %s2299_s21 = smov (!%p271_p2), 92   ;;  %vm446_vm2 = vcmask (!%p271_p2), 31744   ;;  %vm504_vm3 = vcmask (!%p271_p2), 130048  }
   0x7   : > { %2033 = vmatpush3.bf16.msra.mxu0 (!%p271_p2), %v2217_v14  ;;  %2036 = vmatprep.mubr.msk.bf16.mxu0 (!%p271_p2), %vm2298_vm1, %v2297_v15  ;;  %v1946_v29 = vld [vmem:[%s2671_s3] ss:$0 sm:$0xff] (!%p271_p2)  ;;  %s2300_s22 = smov (!%p271_p2), 96   ;;  %s2301_s23 = smov (!%p271_p2), 124   ;;  %vm708_vm4 = vcmask (!%p271_p2), 1041408  }
   0x8   : > { %2034 = vmatprep.subr.bf16.mxu0 (!%p271_p2), %v2297_v15  ;;  %2042 = vmatprep.mubr.msk.bf16.mxu1 (!%p271_p2), %vm2298_vm1, %v2297_v15  ;;  %v1947_v34 = vld [vmem:[%s2673_s5] ss:$0 sm:$0xff] (!%p271_p2)  ;;  %s2302_s30 = smov (!%p271_p2), 64   ;;  %s2303_s9 = smov (!%p271_p2), 88  }
   0x9   : > { %s2304_s11 = smov (!%p271_p2), 120   ;;  %s2305_s12 = smov (!%p271_p2), 60  }
   0xa   : > { %s2306_s15 = smov (!%p271_p2), 56   ;;  %s2307_s16 = smov (!%p271_p2), 116  }
   0xb   : > { %2035 = vmatpush3.bf16.msra.mxu0 (!%p271_p2), %v2218_v16  ;;  %s2308_s17 = smov (!%p271_p2), 84   ;;  %s2309_s20 = smov (!%p271_p2), 80  }
   0xc   : > { %2046 = vmatprep.subr.bf16.mxu0 (!%p271_p2), %v2297_v15  ;;  %s2313_s24 = smov (!%p271_p2), 108   ;;  %s2314_s25 = smov (!%p271_p2), 76  }
   0xd   : > { %s2678_s28 = smov (!%p307_p3, %s1936_s28), 1  ;;  %s2318_s13 = smov 40  }
   0xe   : > { %s1979_s29 = sshll.u32 %s2678_s28, 4  ;;  %s314_s26 = scalar_lea.vmem %s2669_s1, %s2678_s28 }
   0xf   : > { %s2383_s10 = scalar_lea.vmem %s2668_s0, %s1979_s29  ;;  %v2437_v47 = vld [vmem:[%s314_s26] ss:$0 sm:$0xff]  ;;  %s2319_s14 = smov 100  }
  0x10   : > { %v321_v0 = vld [vmem:[%s2383_s10] sm:$0xff]  ;;  %v322_v1 = vld [vmem:[%s2383_s10 + $0x8] sm:$0xff]  ;;  %s2321_s18 = smov 36  }
  0x11   : > { %v326_v2 = vsel %vm325_vm0, %v321_v0, 0.0  ;;  %v329_v3 = vsel %vm325_vm0, %v322_v1, 0.0 }
  0x12   : > { %327 = vadd.xlane.f32.xlu0 %v326_v2 }
  0x16   : > { %330 = vadd.xlane.f32.xlu0 %v329_v3 }
  0x9f   : > { %v328_v4 = vpop.xlane.xlu0 %327 }
  0xa0   : > { %v333_v5 = vmul.f32 0.03125, %v328_v4 }
  0xa2   : > { %v335_v6 = vsub.f32 %v321_v0, %v333_v5 }
  0xa3   : > { %v331_v7 = vpop.xlane.xlu0 %330 }
  0xa4   : > { %v334_v8 = vmul.f32 0.03125, %v331_v7  ;;  %v337_v9 = vmul.f32 %v335_v6, %v335_v6 }
  0xa6   : > { %v336_v10 = vsub.f32 %v322_v1, %v334_v8  ;;  %v339_v11 = vsel %vm325_vm0, %v337_v9, 0.0 }
  0xa7   : > { %340 = vadd.xlane.f32.xlu1 %v339_v11 }
  0xa8   : > { %v338_v12 = vmul.f32 %v336_v10, %v336_v10 }
  0xaa   : > { %v342_v13 = vsel %vm325_vm0, %v338_v12, 0.0 }
  0xab   : > { %343 = vadd.xlane.f32.xlu1 %v342_v13 }
 0x134   : > { %v341_v17 = vpop.xlane.xlu1 %340 }
 0x135   : > { %v345_v18 = vmul.f32 0.03125, %v341_v17 }
 0x137   : > { %v347_v19 = vadd.f32 1e-05, %v345_v18 }
 0x138   : > { %v344_v20 = vpop.xlane.xlu1 %343 }
 0x139   : > { %2219 = vrsqrt.f32 %v347_v19  ;;  %v346_v21 = vmul.f32 0.03125, %v344_v20 }
 0x13b   : > { %v348_v22 = vadd.f32 1e-05, %v346_v21 }
 0x13d   : > { %2221 = vrsqrt.f32 %v348_v22 }
 0x143   : > { %v2220_v23 = vpop.eup %2219 }
 0x144   : > { %v351_v24 = vmul.f32 %v2220_v23, %v335_v6 }
 0x146   : > { %v359_v28 = vmul.f32 %v1945_v25, %v351_v24 }
 0x147   : > { %v2222_v26 = vpop.eup %2221 }
 0x148   : > { %v352_v27 = vmul.f32 %v2222_v26, %v336_v10  ;;  %v367_v31 = vadd.f32 %v1946_v29, %v359_v28 }
 0x14a   : > { %v360_v30 = vmul.f32 %v1945_v25, %v352_v27 }
 0x14c   : > { %v368_v32 = vadd.f32 %v1946_v29, %v360_v30 }
 0x14e   : > { %v369_v33 = vpack.c.bf16 %v368_v32, %v367_v31 }
 0x150   : > { %2037 = vmatmul.mubr.msk.bf16.vlgmr.msra.gmra.mrb[0].mxu0 %vm325_vm0, %v369_v33 }
 0x151   : > { %2048 = vmatprep.mubr.msk.bf16.mxu0 %vm2298_vm1, %v2297_v15 }
 0x223   : > { %v430_v35 = vpop.f32.mrb[0].mxu0 }
 0x224   : > { %v2038_v36 = vpop.f32.mrb[1].mxu0  ;;  %v431_v38 = vadd.f32 %v1947_v34, %v430_v35 }
 0x225   : > { %v433_v37 = vpop.f32.mrb[2].mxu0 }
 0x226   : > { %v434_v39 = vadd.f32 %v1947_v34, %v433_v37  ;;  %v2039_v40 = vpop.f32.mrb[3].mxu0 }
 0x228   : > { %v2417_v41 = vpack.c.bf16 %v434_v39, %v431_v38 }
 0x22a   : > { %579 = vrot.lane.b32.xlu1 %v2417_v41, %s2299_s21  ;;  %444 = vrot.lane.b32.xlu0 %v2417_v41, %s2300_s22  ;;  %s2310_s21 = smov 52   ;;  %s2311_s22 = smov 112  }
 0x22e   : > { %577 = vrot.lane.b32.xlu1 %v2417_v41, %s2301_s23  ;;  %s2312_s23 = smov 48  }
 0x29c   : > { %v445_v42 = vpop.permute.xlu0 %444  ;;  %v580_v44 = vpop.permute.xlu1 %579 }
 0x29d   : > { %v451_v43 = vsel %vm446_vm2, %v445_v42, 0  ;;  %v585_v45 = vsel %vm446_vm2, %v580_v44, 0  ;;  %v438_v42 = vld [vmem:[%s2674_s6] sm:$0xff] }
 0x29e   : > { %2041 = vmatpush3.bf16.xpose.msra.mxu1 %v451_v43  ;;  %v575_v43 = vpack.c.bf16 %v438_v42, %v438_v42 }
 0x29f   : > { %2052 = vmatprep.subr.bf16.mxu1 %v2297_v15 }
 0x2a0   : > { %v578_v46 = vpop.permute.xlu1 %577  ;;  %v757_v44 = vsel %vm708_vm4, %v575_v43, 0 }
 0x2a5   : > { %2043 = vmatmul.mubr.msk.bf16.vlgmr.msra.gmra.mrb[0].mxu1 %vm446_vm2, %v2417_v41 }
 0x2a6   : > { %2053 = vmatpush3.bf16.xpose.msra.mxu1 %v585_v45  ;;  %2054 = vmatprep.mubr.msk.bf16.mxu1 %vm2298_vm1, %v2297_v15  ;;  %v704_v45 = vrot.slane %v575_v43, 2 }
 0x2a7   : > { %2064 = vmatprep.subr.bf16.mxu1 %v2297_v15 }
 0x2ad   : > { %2055 = vmatmul.mubr.msk.bf16.vlgmr.msra.gmra.mrb[4].mxu1 %vm446_vm2, %v578_v46  ;;  %v710_v46 = vsel %vm708_vm4, %v704_v45, 0 }
 0x2ae   : > { %2066 = vmatprep.mubr.msk.bf16.mxu1 %vm2298_vm1, %v2297_v15  ;;  %2065 = vmatpush3.bf16.msra.mxu1 %v710_v46 }
 0x2af   : > { %2076 = vmatprep.subr.bf16.mxu1 %v2297_v15 }
 0x378   : > { %v487_v48 = vpop.f32.mrb[0].mxu1 }
 0x379   : > { %v494_v49 = vmul.f32 0.5, %v487_v48  ;;  %v2044_v50 = vpop.f32.mrb[1].mxu1 }
 0x37a   : > { %v490_v51 = vpop.f32.mrb[2].mxu1 }
 0x37b   : > { %v495_v52 = vmul.f32 0.5, %v490_v51  ;;  %v2045_v53 = vpop.f32.mrb[3].mxu1  ;;  %v502_v54 = vadd.f32 %v2437_v47, %v494_v49 }
 0x37d   : > { %v505_v55 = vsel %vm504_vm3, %v502_v54, -inf  ;;  %v503_v56 = vadd.f32 %v2437_v47, %v495_v52 }
 0x37e   : > { %506 = vmax.xlane.f32.xlu1 %v505_v55 }
 0x37f   : > { %v508_v57 = vsel %vm504_vm3, %v503_v56, -inf }
 0x380   : > { %509 = vmax.xlane.f32.xlu0 %v508_v57  ;;  %v621_v58 = vpop.f32.mrb[4].mxu1 }
 0x381   : > { %v628_v59 = vmul.f32 0.5, %v621_v58  ;;  %v2056_v60 = vpop.f32.mrb[5].mxu1 }
 0x382   : > { %v624_v61 = vpop.f32.mrb[6].mxu1 }
 0x383   : > { %v629_v62 = vmul.f32 0.5, %v624_v61  ;;  %v2057_v63 = vpop.f32.mrb[7].mxu1  ;;  %v630_v0 = vadd.f32 %v2437_v47, %v628_v59 }
 0x385   : > { %v632_v1 = vsel %vm504_vm3, %v630_v0, -inf  ;;  %v631_v2 = vadd.f32 %v2437_v47, %v629_v62 }
 0x386   : > { %633 = vmax.xlane.f32.xlu0 %v632_v1 }
 0x387   : > { %v635_v3 = vsel %vm504_vm3, %v631_v2, -inf }
 0x38a   : > { %636 = vmax.xlane.f32.xlu0 %v635_v3 }
 0x40b   : > { %v507_v4 = vpop.xlane.xlu1 %506 }
 0x40c   : > { %v511_v5 = vsub.f32 %v502_v54, %v507_v4 }
 0x40d   : > { %v510_v6 = vpop.xlane.xlu0 %509 }
 0x40e   : > { %v513_v7 = vmul.f32 1.442695, %v511_v5  ;;  %v512_v8 = vsub.f32 %v503_v56, %v510_v6 }
 0x410   : > { %2223 = vpow2.f32 %v513_v7  ;;  %v515_v9 = vmul.f32 1.442695, %v512_v8 }
 0x412   : > { %2225 = vpow2.f32 %v515_v9 }
 0x413   : > { %v634_v10 = vpop.xlane.xlu0 %633 }
 0x414   : > { %v638_v11 = vsub.f32 %v630_v0, %v634_v10 }
 0x416   : > { %v640_v12 = vmul.f32 1.442695, %v638_v11 }
 0x417   : > { %v637_v13 = vpop.xlane.xlu0 %636 }
 0x418   : > { %2227 = vpow2.f32 %v640_v12  ;;  %v639_v14 = vsub.f32 %v631_v2, %v637_v13 }
 0x41a   : > { %v2224_v16 = vpop.eup %2223  ;;  %v642_v17 = vmul.f32 1.442695, %v639_v14 }
 0x41b   : > { %v517_v18 = vsel %vm504_vm3, %v2224_v16, 0.0 }
 0x41c   : > { %v2226_v19 = vpop.eup %2225  ;;  %2229 = vpow2.f32 %v642_v17  ;;  %518 = vadd.xlane.f32.xlu1 %v517_v18 }
 0x41d   : > { %v520_v20 = vsel %vm504_vm3, %v2226_v19, 0.0 }
 0x41e   : > { %521 = vadd.xlane.f32.xlu0 %v520_v20 }
 0x422   : > { %v2228_v21 = vpop.eup %2227 }
 0x423   : > { %v644_v22 = vsel %vm504_vm3, %v2228_v21, 0.0 }
 0x424   : > { %645 = vadd.xlane.f32.xlu1 %v644_v22 }
 0x426   : > { %v2230_v23 = vpop.eup %2229 }
 0x427   : > { %v647_v24 = vsel %vm504_vm3, %v2230_v23, 0.0 }
 0x428   : > { %648 = vadd.xlane.f32.xlu0 %v647_v24 }
 0x435   : > { %528 = vrot.lane.b32.xlu1 %v2417_v41, %s2302_s30 }
 0x439   : > { %802 = vrot.lane.b32.xlu1 %v2417_v41, %s2303_s9  ;;  %s2315_s9 = smov 72  }
 0x43d   : > { %800 = vrot.lane.b32.xlu1 %v2417_v41, %s2304_s11  ;;  %s2316_s11 = smov 44  }
 0x43e   : > { %655 = vrot.lane.b32.xlu0 %v2417_v41, %s2305_s12  ;;  %s2317_s12 = smov 104  }
 0x4a9   : > { %v519_v25 = vpop.xlane.xlu1 %518 }
 0x4aa   : > { %2231 = vrcp.f32 %v519_v25 }
 0x4ab   : > { %v522_v26 = vpop.xlane.xlu0 %521 }
 0x4ac   : > { %2233 = vrcp.f32 %v522_v26 }
 0x4b1   : > { %v646_v27 = vpop.xlane.xlu1 %645 }
 0x4b2   : > { %2235 = vrcp.f32 %v646_v27 }
 0x4b4   : > { %v2232_v28 = vpop.eup %2231 }
 0x4b5   : > { %v529_v29 = vpop.permute.xlu1 %528  ;;  %v649_v30 = vpop.xlane.xlu0 %648  ;;  %v525_v32 = vmul.f32 %v2232_v28, %v2224_v16 }
 0x4b6   : > { %v2234_v31 = vpop.eup %2233  ;;  %2237 = vrcp.f32 %v649_v30  ;;  %2047 = vmatpush3.bf16.msra.mxu0 %v529_v29 }
 0x4b7   : > { %v526_v33 = vmul.f32 %v2234_v31, %v2226_v19  ;;  %2058 = vmatprep.subr.bf16.mxu0 %v2297_v15 }
 0x4b9   : > { %v656_v34 = vpop.permute.xlu0 %655  ;;  %v527_v35 = vpack.c.bf16 %v526_v33, %v525_v32  ;;  %v803_v55 = vpop.permute.xlu1 %802 }
 0x4ba   : > { %v808_v59 = vsel %vm446_vm2, %v803_v55, 0 }
 0x4bb   : > { %2049 = vmatmul.mubr.msk.bf16.vlgmr.msra.gmra.mrb[4].mxu0 %vm504_vm3, %v527_v35 }
 0x4bc   : > { %2059 = vmatpush3.bf16.msra.mxu0 %v656_v34  ;;  %2060 = vmatprep.mubr.msk.bf16.mxu0 %vm2298_vm1, %v2297_v15  ;;  %v2236_v36 = vpop.eup %2235 }
 0x4bd   : > { %2070 = vmatprep.subr.bf16.mxu0 %v2297_v15  ;;  %v652_v38 = vmul.f32 %v2236_v36, %v2228_v21  ;;  %v801_v60 = vpop.permute.xlu1 %800 }
 0x4c0   : > { %v2238_v37 = vpop.eup %2237 }
 0x4c1   : > { %v653_v39 = vmul.f32 %v2238_v37, %v2230_v23 }
 0x4c3   : > { %v654_v40 = vpack.c.bf16 %v653_v39, %v652_v38  ;;  %v439_v39 = vld [vmem:[%s2674_s6 + $0x8] sm:$0xff] }
 0x4c5   : > { %2061 = vmatmul.mubr.msk.bf16.vlgmr.msra.gmra.mrb[8].mxu0 %vm504_vm3, %v654_v40  ;;  %v2506_v40 = vpack.c.bf16 %v439_v39, %v439_v39 }
 0x4c6   : > { %2072 = vmatprep.mubr.msk.bf16.mxu0 %vm2298_vm1, %v2297_v15  ;;  %2071 = vmatpush3.bf16.msra.mxu0 %v757_v44 }
 0x4c7   : > { %2082 = vmatprep.subr.bf16.mxu0 %v2297_v15  ;;  %v931_v42 = vsel %vm708_vm4, %v2506_v40, 0 }
 0x58e   : > { %v568_v48 = vpop.f32.mrb[4].mxu0 }
 0x58f   : > { %v2050_v49 = vpop.f32.mrb[5].mxu0 }
 0x590   : > { %v571_v50 = vpop.f32.mrb[6].mxu0 }
 0x591   : > { %v576_v51 = vpack.c.bf16 %v571_v50, %v568_v48  ;;  %v2051_v52 = vpop.f32.mrb[7].mxu0 }
 0x593   : > { %2073 = vmatmul.mubr.msk.bf16.vlgmr.msra.gmra.mrb[12].mxu0 %vm446_vm2, %v576_v51 }
 0x594   : > { %2084 = vmatprep.mubr.msk.bf16.mxu0 %vm2298_vm1, %v2297_v15 }
 0x598   : > { %v695_v53 = vpop.f32.mrb[8].mxu0 }
 0x599   : > { %v2062_v54 = vpop.f32.mrb[9].mxu0 }
 0x59a   : > { %v698_v56 = vpop.f32.mrb[10].mxu0 }
 0x59b   : > { %v702_v57 = vpack.c.bf16 %v698_v56, %v695_v53  ;;  %v2063_v58 = vpop.f32.mrb[11].mxu0 }
 0x59d   : > { %2067 = vmatmul.mubr.msk.bf16.vlgmr.msra.gmra.mrb[8].mxu1 %vm446_vm2, %v702_v57 }
 0x59e   : > { %2077 = vmatpush3.bf16.xpose.msra.mxu1 %v808_v59  ;;  %2078 = vmatprep.mubr.msk.bf16.mxu1 %vm2298_vm1, %v2297_v15 }
 0x59f   : > { %2088 = vmatprep.subr.bf16.mxu1 %v2297_v15 }
 0x5a5   : > { %2079 = vmatmul.mubr.msk.bf16.vlgmr.msra.gmra.mrb[12].mxu1 %vm446_vm2, %v801_v60 }
 0x5a6   : > { %2090 = vmatprep.mubr.msk.bf16.mxu1 %vm2298_vm1, %v2297_v15  ;;  %2089 = vmatpush3.bf16.msra.mxu1 %v931_v42 }
 0x5a7   : > { %2100 = vmatprep.subr.bf16.mxu1 %v2297_v15 }
 0x666   : > { %v793_v61 = vpop.f32.mrb[12].mxu0 }
 0x667   : > { %v2074_v62 = vpop.f32.mrb[13].mxu0 }
 0x668   : > { %v796_v63 = vpop.f32.mrb[14].mxu0 }
 0x669   : > { %v2075_v0 = vpop.f32.mrb[15].mxu0 }
 0x670   : > { %v746_v1 = vpop.f32.mrb[8].mxu1 }
 0x671   : > { %v2481_v2 = vadd.f32 %v793_v61, %v746_v1  ;;  %v2068_v3 = vpop.f32.mrb[9].mxu1 }
 0x672   : > { %v749_v4 = vpop.f32.mrb[10].mxu1 }
 0x673   : > { %v2483_v5 = vadd.f32 %v796_v63, %v749_v4  ;;  %v2069_v6 = vpop.f32.mrb[11].mxu1 }
 0x678   : > { %v844_v7 = vpop.f32.mrb[12].mxu1 }
 0x679   : > { %v851_v8 = vmul.f32 0.5, %v844_v7  ;;  %v2080_v9 = vpop.f32.mrb[13].mxu1 }
 0x67a   : > { %v847_v10 = vpop.f32.mrb[14].mxu1 }
 0x67b   : > { %v852_v11 = vmul.f32 0.5, %v847_v10  ;;  %v2081_v12 = vpop.f32.mrb[15].mxu1  ;;  %v853_v13 = vadd.f32 %v2437_v47, %v851_v8 }
 0x67d   : > { %v855_v14 = vsel %vm504_vm3, %v853_v13, -inf  ;;  %v854_v16 = vadd.f32 %v2437_v47, %v852_v11 }
 0x67e   : > { %856 = vmax.xlane.f32.xlu1 %v855_v14 }
 0x67f   : > { %v858_v17 = vsel %vm504_vm3, %v854_v16, -inf }
 0x680   : > { %859 = vmax.xlane.f32.xlu0 %v858_v17 }
 0x68f   : > { %878 = vrot.lane.b32.xlu1 %v2417_v41, %s2306_s15  ;;  %s2320_s15 = smov 68  }
 0x693   : > { %976 = vrot.lane.b32.xlu1 %v2417_v41, %s2307_s16 }
 0x70b   : > { %v857_v18 = vpop.xlane.xlu1 %856 }
 0x70c   : > { %v861_v19 = vsub.f32 %v853_v13, %v857_v18 }
 0x70d   : > { %v860_v20 = vpop.xlane.xlu0 %859 }
 0x70e   : > { %v863_v21 = vmul.f32 1.442695, %v861_v19  ;;  %v862_v22 = vsub.f32 %v854_v16, %v860_v20 }
 0x70f   : > { %v879_v23 = vpop.permute.xlu1 %878 }
 0x710   : > { %2239 = vpow2.f32 %v863_v21  ;;  %v865_v24 = vmul.f32 1.442695, %v862_v22  ;;  %2083 = vmatpush3.bf16.msra.mxu0 %v879_v23  ;;  %v1103_v23 = vrot.slane %v2506_v40, 2 }
 0x711   : > { %2094 = vmatprep.subr.bf16.mxu0 %v2297_v15 }
 0x712   : > { %2241 = vpow2.f32 %v865_v24  ;;  %v1108_v24 = vsel %vm708_vm4, %v1103_v23, 0 }
 0x713   : > { %v977_v38 = vpop.permute.xlu1 %976 }
 0x71a   : > { %v2240_v25 = vpop.eup %2239 }
 0x71b   : > { %v867_v26 = vsel %vm504_vm3, %v2240_v25, 0.0 }
 0x71c   : > { %v2242_v27 = vpop.eup %2241  ;;  %868 = vadd.xlane.f32.xlu0 %v867_v26 }
 0x71d   : > { %v870_v28 = vsel %vm504_vm3, %v2242_v27, 0.0 }
 0x720   : > { %871 = vadd.xlane.f32.xlu0 %v870_v28 }
 0x736   : > { %978 = vrot.lane.b32.xlu0 %v2417_v41, %s2308_s17 }
 0x7a9   : > { %v869_v29 = vpop.xlane.xlu0 %868 }
 0x7aa   : > { %2243 = vrcp.f32 %v869_v29 }
 0x7ad   : > { %v872_v30 = vpop.xlane.xlu0 %871 }
 0x7ae   : > { %2245 = vrcp.f32 %v872_v30 }
 0x7b1   : > { %v979_v35 = vpop.permute.xlu0 %978 }
 0x7b2   : > { %v984_v37 = vsel %vm446_vm2, %v979_v35, 0 }
 0x7b4   : > { %v2244_v31 = vpop.eup %2243 }
 0x7b5   : > { %v875_v33 = vmul.f32 %v2244_v31, %v2240_v25 }
 0x7b8   : > { %v2246_v32 = vpop.eup %2245 }
 0x7b9   : > { %v876_v34 = vmul.f32 %v2246_v32, %v2242_v27 }
 0x7bb   : > { %v877_v36 = vpack.c.bf16 %v876_v34, %v875_v33 }
 0x7bd   : > { %2085 = vmatmul.mubr.msk.bf16.vlgmr.msra.gmra.mrb[16].mxu0 %vm504_vm3, %v877_v36 }
 0x7be   : > { %2095 = vmatpush3.bf16.xpose.msra.mxu0 %v984_v37  ;;  %2096 = vmatprep.mubr.msk.bf16.mxu0 %vm2298_vm1, %v2297_v15 }
 0x7bf   : > { %2106 = vmatprep.subr.bf16.mxu0 %v2297_v15 }
 0x7c5   : > { %2097 = vmatmul.mubr.msk.bf16.vlgmr.msra.gmra.mrb[20].mxu0 %vm446_vm2, %v977_v38 }
 0x7c6   : > { %2108 = vmatprep.mubr.msk.bf16.mxu0 %vm2298_vm1, %v2297_v15  ;;  %2107 = vmatpush3.bf16.msra.mxu0 %v1108_v24 }
 0x7c7   : > { %2118 = vmatprep.subr.bf16.mxu0 %v2297_v15 }
 0x890   : > { %v918_v43 = vpop.f32.mrb[16].mxu0 }
 0x891   : > { %v2086_v44 = vpop.f32.mrb[17].mxu0 }
 0x892   : > { %v921_v45 = vpop.f32.mrb[18].mxu0 }
 0x893   : > { %v926_v46 = vpack.c.bf16 %v921_v45, %v918_v43  ;;  %v2087_v48 = vpop.f32.mrb[19].mxu0 }
 0x895   : > { %2091 = vmatmul.mubr.msk.bf16.vlgmr.msra.gmra.mrb[16].mxu1 %vm446_vm2, %v926_v46 }
 0x896   : > { %2102 = vmatprep.mubr.msk.bf16.mxu1 %vm2298_vm1, %v2297_v15 }
 0x898   : > { %v1020_v49 = vpop.f32.mrb[20].mxu0 }
 0x899   : > { %v1027_v50 = vmul.f32 0.5, %v1020_v49  ;;  %v2098_v51 = vpop.f32.mrb[21].mxu0 }
 0x89a   : > { %v1023_v52 = vpop.f32.mrb[22].mxu0 }
 0x89b   : > { %v1028_v53 = vmul.f32 0.5, %v1023_v52  ;;  %v2099_v54 = vpop.f32.mrb[23].mxu0  ;;  %v1029_v55 = vadd.f32 %v2437_v47, %v1027_v50 }
 0x89d   : > { %v1031_v56 = vsel %vm504_vm3, %v1029_v55, -inf  ;;  %v1030_v57 = vadd.f32 %v2437_v47, %v1028_v53 }
 0x89e   : > { %1032 = vmax.xlane.f32.xlu1 %v1031_v56 }
 0x89f   : > { %v1034_v58 = vsel %vm504_vm3, %v1030_v57, -inf }
 0x8a0   : > { %1035 = vmax.xlane.f32.xlu0 %v1034_v58 }
 0x92b   : > { %v1033_v59 = vpop.xlane.xlu1 %1032 }
 0x92c   : > { %v1037_v60 = vsub.f32 %v1029_v55, %v1033_v59 }
 0x92d   : > { %v1036_v61 = vpop.xlane.xlu0 %1035 }
 0x92e   : > { %v1039_v62 = vmul.f32 1.442695, %v1037_v60  ;;  %v1038_v63 = vsub.f32 %v1030_v57, %v1036_v61 }
 0x930   : > { %2247 = vpow2.f32 %v1039_v62  ;;  %v1041_v0 = vmul.f32 1.442695, %v1038_v63 }
 0x932   : > { %2249 = vpow2.f32 %v1041_v0 }
 0x93a   : > { %v2248_v1 = vpop.eup %2247 }
 0x93b   : > { %v1043_v3 = vsel %vm504_vm3, %v2248_v1, 0.0 }
 0x93c   : > { %v2250_v4 = vpop.eup %2249  ;;  %1044 = vadd.xlane.f32.xlu0 %v1043_v3 }
 0x93d   : > { %v1046_v6 = vsel %vm504_vm3, %v2250_v4, 0.0 }
 0x93e   : > { %1047 = vadd.xlane.f32.xlu1 %v1046_v6 }
 0x94f   : > { %1155 = vrot.lane.b32.xlu1 %v2417_v41, %s2309_s20 }
 0x952   : > { %1054 = vrot.lane.b32.xlu0 %v2417_v41, %s2310_s21 }
 0x953   : > { %1153 = vrot.lane.b32.xlu1 %v2417_v41, %s2311_s22 }
 0x968   : > { %v967_v7 = vpop.f32.mrb[16].mxu1 }
 0x969   : > { %v2524_v8 = vadd.f32 %v967_v7, %v2481_v2  ;;  %v2092_v9 = vpop.f32.mrb[17].mxu1  ;;  %v440_v7 = vld [vmem:[%s2674_s6 + $0x10] sm:$0xff] }
 0x96a   : > { %v970_v10 = vpop.f32.mrb[18].mxu1 }
 0x96b   : > { %v2527_v11 = vadd.f32 %v970_v10, %v2483_v5  ;;  %v2093_v12 = vpop.f32.mrb[19].mxu1 }
 0x9c9   : > { %v1045_v13 = vpop.xlane.xlu0 %1044 }
 0x9ca   : > { %2251 = vrcp.f32 %v1045_v13 }
 0x9cb   : > { %v1048_v14 = vpop.xlane.xlu1 %1047 }
 0x9cc   : > { %2253 = vrcp.f32 %v1048_v14 }
 0x9cd   : > { %v1055_v16 = vpop.permute.xlu0 %1054 }
 0x9ce   : > { %2101 = vmatpush3.bf16.msra.mxu1 %v1055_v16 }
 0x9cf   : > { %2112 = vmatprep.subr.bf16.mxu1 %v2297_v15  ;;  %v1156_v2 = vpop.permute.xlu1 %1155 }
 0x9d0   : > { %v1161_v22 = vsel %vm446_vm2, %v1156_v2, 0 }
 0x9d3   : > { %v1154_v5 = vpop.permute.xlu1 %1153 }
 0x9d4   : > { %v2252_v17 = vpop.eup %2251 }
 0x9d5   : > { %v1051_v19 = vmul.f32 %v2252_v17, %v2248_v1 }
 0x9d6   : > { %v2254_v18 = vpop.eup %2253 }
 0x9d7   : > { %v1052_v20 = vmul.f32 %v2254_v18, %v2250_v4 }
 0x9d9   : > { %v1053_v21 = vpack.c.bf16 %v1052_v20, %v1051_v19 }
 0x9db   : > { %2103 = vmatmul.mubr.msk.bf16.vlgmr.msra.gmra.mrb[20].mxu1 %vm504_vm3, %v1053_v21 }
 0x9dc   : > { %2113 = vmatpush3.bf16.xpose.msra.mxu1 %v1161_v22  ;;  %2114 = vmatprep.mubr.msk.bf16.mxu1 %vm2298_vm1, %v2297_v15 }
 0x9dd   : > { %2124 = vmatprep.subr.bf16.mxu1 %v2297_v15 }
 0x9e3   : > { %2115 = vmatmul.mubr.msk.bf16.vlgmr.msra.gmra.mrb[24].mxu1 %vm446_vm2, %v1154_v5 }
 0x9e4   : > { %2126 = vmatprep.mubr.msk.bf16.mxu1 %vm2298_vm1, %v2297_v15 }
 0xaae   : > { %v1094_v25 = vpop.f32.mrb[20].mxu1 }
 0xaaf   : > { %v2104_v26 = vpop.f32.mrb[21].mxu1 }
 0xab0   : > { %v1097_v27 = vpop.f32.mrb[22].mxu1 }
 0xab1   : > { %v1101_v28 = vpack.c.bf16 %v1097_v27, %v1094_v25  ;;  %v2105_v29 = vpop.f32.mrb[23].mxu1 }
 0xab3   : > { %2109 = vmatmul.mubr.msk.bf16.vlgmr.msra.gmra.mrb[24].mxu0 %vm446_vm2, %v1101_v28 }
 0xab4   : > { %2120 = vmatprep.mubr.msk.bf16.mxu0 %vm2298_vm1, %v2297_v15 }
 0xab6   : > { %v1197_v30 = vpop.f32.mrb[24].mxu1 }
 0xab7   : > { %v1204_v31 = vmul.f32 0.5, %v1197_v30  ;;  %v2116_v32 = vpop.f32.mrb[25].mxu1 }
 0xab8   : > { %v1200_v33 = vpop.f32.mrb[26].mxu1 }
 0xab9   : > { %v1205_v34 = vmul.f32 0.5, %v1200_v33  ;;  %v2117_v35 = vpop.f32.mrb[27].mxu1  ;;  %v1206_v36 = vadd.f32 %v2437_v47, %v1204_v31 }
 0xabb   : > { %v1208_v37 = vsel %vm504_vm3, %v1206_v36, -inf  ;;  %v1207_v38 = vadd.f32 %v2437_v47, %v1205_v34 }
 0xabc   : > { %1209 = vmax.xlane.f32.xlu1 %v1208_v37 }
 0xabd   : > { %v1211_v39 = vsel %vm504_vm3, %v1207_v38, -inf }
 0xabe   : > { %1212 = vmax.xlane.f32.xlu0 %v1211_v39 }
 0xacd   : > { %1231 = vrot.lane.b32.xlu1 %v2417_v41, %s2312_s23  ;;  %s319_s23 = scalar_lea.vmem %s2676_s8, %s1979_s29 }
 0xad1   : > { %1329 = vrot.lane.b32.xlu1 %v2417_v41, %s2313_s24 }
 0xb49   : > { %v1210_v40 = vpop.xlane.xlu1 %1209 }
 0xb4a   : > { %v1214_v42 = vsub.f32 %v1206_v36, %v1210_v40 }
 0xb4b   : > { %v1213_v43 = vpop.xlane.xlu0 %1212 }
 0xb4c   : > { %v1216_v44 = vmul.f32 1.442695, %v1214_v42  ;;  %v1215_v45 = vsub.f32 %v1207_v38, %v1213_v43 }
 0xb4d   : > { %v1232_v46 = vpop.permute.xlu1 %1231 }
 0xb4e   : > { %2255 = vpow2.f32 %v1216_v44  ;;  %v1218_v48 = vmul.f32 1.442695, %v1215_v45  ;;  %2119 = vmatpush3.bf16.msra.mxu0 %v1232_v46 }
 0xb4f   : > { %2130 = vmatprep.subr.bf16.mxu0 %v2297_v15 }
 0xb50   : > { %2257 = vpow2.f32 %v1218_v48 }
 0xb51   : > { %v1330_v6 = vpop.permute.xlu1 %1329 }
 0xb58   : > { %v2256_v49 = vpop.eup %2255 }
 0xb59   : > { %v1220_v50 = vsel %vm504_vm3, %v2256_v49, 0.0 }
 0xb5a   : > { %v2258_v51 = vpop.eup %2257  ;;  %1221 = vadd.xlane.f32.xlu0 %v1220_v50 }
 0xb5b   : > { %v1223_v52 = vsel %vm504_vm3, %v2258_v51, 0.0 }
 0xb5e   : > { %1224 = vadd.xlane.f32.xlu0 %v1223_v52 }
 0xb74   : > { %1331 = vrot.lane.b32.xlu0 %v2417_v41, %s2314_s25 }
 0xb86   : > { %v1144_v53 = vpop.f32.mrb[24].mxu0 }
 0xb87   : > { %v2555_v54 = vadd.f32 %v1144_v53, %v2524_v8  ;;  %v2110_v55 = vpop.f32.mrb[25].mxu0  ;;  %v2571_v8 = vpack.c.bf16 %v440_v7, %v440_v7 }
 0xb88   : > { %v1147_v56 = vpop.f32.mrb[26].mxu0 }
 0xb89   : > { %v2558_v57 = vadd.f32 %v1147_v56, %v2527_v11  ;;  %v2111_v58 = vpop.f32.mrb[27].mxu0  ;;  %v1284_v9 = vsel %vm708_vm4, %v2571_v8, 0  ;;  %v1456_v53 = vrot.slane %v2571_v8, 2 }
 0xb8a   : > { %2125 = vmatpush3.bf16.msra.mxu1 %v1284_v9 }
 0xb8b   : > { %2136 = vmatprep.subr.bf16.mxu1 %v2297_v15 }
 0xbe7   : > { %v1222_v59 = vpop.xlane.xlu0 %1221 }
 0xbe8   : > { %2259 = vrcp.f32 %v1222_v59 }
 0xbeb   : > { %v1225_v60 = vpop.xlane.xlu0 %1224 }
 0xbec   : > { %2261 = vrcp.f32 %v1225_v60 }
 0xbef   : > { %v1332_v1 = vpop.permute.xlu0 %1331 }
 0xbf0   : > { %v1337_v4 = vsel %vm446_vm2, %v1332_v1, 0 }
 0xbf2   : > { %v2260_v61 = vpop.eup %2259 }
 0xbf3   : > { %v1228_v63 = vmul.f32 %v2260_v61, %v2256_v49 }
 0xbf6   : > { %v2262_v62 = vpop.eup %2261 }
 0xbf7   : > { %v1229_v0 = vmul.f32 %v2262_v62, %v2258_v51 }
 0xbf9   : > { %v1230_v3 = vpack.c.bf16 %v1229_v0, %v1228_v63 }
 0xbfb   : > { %2121 = vmatmul.mubr.msk.bf16.vlgmr.msra.gmra.mrb[28].mxu0 %vm504_vm3, %v1230_v3 }
 0xbfc   : > { %2131 = vmatpush3.bf16.xpose.msra.mxu0 %v1337_v4  ;;  %2132 = vmatprep.mubr.msk.bf16.mxu0 %vm2298_vm1, %v2297_v15 }
 0xbfd   : > { %2142 = vmatprep.subr.bf16.mxu0 %v2297_v15 }
 0xc03   : > { %2133 = vmatmul.mubr.msk.bf16.vlgmr.msra.gmra.mrb[32].mxu0 %vm446_vm2, %v1330_v6 }
 0xc04   : > { %2144 = vmatprep.mubr.msk.bf16.mxu0 %vm2298_vm1, %v2297_v15 }
 0xcce   : > { %v1271_v10 = vpop.f32.mrb[28].mxu0 }
 0xccf   : > { %v2122_v11 = vpop.f32.mrb[29].mxu0 }
 0xcd0   : > { %v1274_v12 = vpop.f32.mrb[30].mxu0 }
 0xcd1   : > { %v1279_v13 = vpack.c.bf16 %v1274_v12, %v1271_v10  ;;  %v2123_v14 = vpop.f32.mrb[31].mxu0 }
 0xcd3   : > { %2127 = vmatmul.mubr.msk.bf16.vlgmr.msra.gmra.mrb[28].mxu1 %vm446_vm2, %v1279_v13 }
 0xcd4   : > { %2138 = vmatprep.mubr.msk.bf16.mxu1 %vm2298_vm1, %v2297_v15 }
 0xcd6   : > { %v1373_v16 = vpop.f32.mrb[32].mxu0 }
 0xcd7   : > { %v1380_v17 = vmul.f32 0.5, %v1373_v16  ;;  %v2134_v18 = vpop.f32.mrb[33].mxu0 }
 0xcd8   : > { %v1376_v19 = vpop.f32.mrb[34].mxu0 }
 0xcd9   : > { %v1381_v20 = vmul.f32 0.5, %v1376_v19  ;;  %v2135_v2 = vpop.f32.mrb[35].mxu0  ;;  %v1382_v21 = vadd.f32 %v2437_v47, %v1380_v17 }
 0xcdb   : > { %v1384_v22 = vsel %vm504_vm3, %v1382_v21, -inf  ;;  %v1383_v5 = vadd.f32 %v2437_v47, %v1381_v20 }
 0xcdc   : > { %1385 = vmax.xlane.f32.xlu1 %v1384_v22 }
 0xcdd   : > { %v1387_v23 = vsel %vm504_vm3, %v1383_v5, -inf }
 0xcde   : > { %1388 = vmax.xlane.f32.xlu0 %v1387_v23 }
 0xd69   : > { %v1386_v24 = vpop.xlane.xlu1 %1385 }
 0xd6a   : > { %v1390_v25 = vsub.f32 %v1382_v21, %v1386_v24 }
 0xd6b   : > { %v1389_v26 = vpop.xlane.xlu0 %1388 }
 0xd6c   : > { %v1392_v27 = vmul.f32 1.442695, %v1390_v25  ;;  %v1391_v28 = vsub.f32 %v1383_v5, %v1389_v26 }
 0xd6e   : > { %2263 = vpow2.f32 %v1392_v27  ;;  %v1394_v29 = vmul.f32 1.442695, %v1391_v28 }
 0xd70   : > { %2265 = vpow2.f32 %v1394_v29 }
 0xd78   : > { %v2264_v30 = vpop.eup %2263 }
 0xd79   : > { %v1396_v31 = vsel %vm504_vm3, %v2264_v30, 0.0 }
 0xd7a   : > { %v2266_v32 = vpop.eup %2265  ;;  %1397 = vadd.xlane.f32.xlu0 %v1396_v31 }
 0xd7b   : > { %v1399_v33 = vsel %vm504_vm3, %v2266_v32, 0.0 }
 0xd7c   : > { %1400 = vadd.xlane.f32.xlu1 %v1399_v33 }
 0xd8d   : > { %1508 = vrot.lane.b32.xlu1 %v2417_v41, %s2315_s9 }
 0xd90   : > { %1407 = vrot.lane.b32.xlu0 %v2417_v41, %s2316_s11 }
 0xd91   : > { %1506 = vrot.lane.b32.xlu1 %v2417_v41, %s2317_s12 }
 0xda6   : > { %v1320_v34 = vpop.f32.mrb[28].mxu1 }
 0xda7   : > { %v2589_v35 = vadd.f32 %v1320_v34, %v2555_v54  ;;  %v2128_v36 = vpop.f32.mrb[29].mxu1  ;;  %v1461_v54 = vsel %vm708_vm4, %v1456_v53, 0  ;;  %v441_v34 = vld [vmem:[%s2674_s6 + $0x18] sm:$0xff] }
 0xda8   : > { %v1323_v37 = vpop.f32.mrb[30].mxu1  ;;  %2143 = vmatpush3.bf16.msra.mxu0 %v1461_v54 }
 0xda9   : > { %v2592_v38 = vadd.f32 %v1323_v37, %v2558_v57  ;;  %v2129_v39 = vpop.f32.mrb[31].mxu1  ;;  %2154 = vmatprep.subr.bf16.mxu0 %v2297_v15 }
 0xe07   : > { %v1398_v40 = vpop.xlane.xlu0 %1397 }
 0xe08   : > { %2267 = vrcp.f32 %v1398_v40 }
 0xe09   : > { %v1401_v42 = vpop.xlane.xlu1 %1400 }
 0xe0a   : > { %2269 = vrcp.f32 %v1401_v42 }
 0xe0b   : > { %v1408_v43 = vpop.permute.xlu0 %1407 }
 0xe0c   : > { %2137 = vmatpush3.bf16.msra.mxu1 %v1408_v43 }
 0xe0d   : > { %2148 = vmatprep.subr.bf16.mxu1 %v2297_v15  ;;  %v1509_v49 = vpop.permute.xlu1 %1508 }
 0xe0e   : > { %v1514_v51 = vsel %vm446_vm2, %v1509_v49, 0 }
 0xe11   : > { %v1507_v52 = vpop.permute.xlu1 %1506 }
 0xe12   : > { %v2268_v44 = vpop.eup %2267 }
 0xe13   : > { %v1404_v46 = vmul.f32 %v2268_v44, %v2264_v30 }
 0xe14   : > { %v2270_v45 = vpop.eup %2269 }
 0xe15   : > { %v1405_v48 = vmul.f32 %v2270_v45, %v2266_v32 }
 0xe17   : > { %v1406_v50 = vpack.c.bf16 %v1405_v48, %v1404_v46 }
 0xe19   : > { %2139 = vmatmul.mubr.msk.bf16.vlgmr.msra.gmra.mrb[32].mxu1 %vm504_vm3, %v1406_v50 }
 0xe1a   : > { %2149 = vmatpush3.bf16.xpose.msra.mxu1 %v1514_v51  ;;  %2150 = vmatprep.mubr.msk.bf16.mxu1 %vm2298_vm1, %v2297_v15 }
 0xe1b   : > { %2160 = vmatprep.subr.bf16.mxu1 %v2297_v15 }
 0xe21   : > { %2151 = vmatmul.mubr.msk.bf16.vlgmr.msra.gmra.mrb[36].mxu1 %vm446_vm2, %v1507_v52 }
 0xe22   : > { %2162 = vmatprep.mubr.msk.bf16.mxu1 %vm2298_vm1, %v2297_v15 }
 0xeec   : > { %v1447_v55 = vpop.f32.mrb[32].mxu1 }
 0xeed   : > { %v2140_v56 = vpop.f32.mrb[33].mxu1 }
 0xeee   : > { %v1450_v57 = vpop.f32.mrb[34].mxu1 }
 0xeef   : > { %v1454_v58 = vpack.c.bf16 %v1450_v57, %v1447_v55  ;;  %v2141_v59 = vpop.f32.mrb[35].mxu1 }
 0xef1   : > { %2145 = vmatmul.mubr.msk.bf16.vlgmr.msra.gmra.mrb[36].mxu0 %vm446_vm2, %v1454_v58 }
 0xef2   : > { %2156 = vmatprep.mubr.msk.bf16.mxu0 %vm2298_vm1, %v2297_v15 }
 0xef4   : > { %v1550_v60 = vpop.f32.mrb[36].mxu1 }
 0xef5   : > { %v1557_v61 = vmul.f32 0.5, %v1550_v60  ;;  %v2152_v62 = vpop.f32.mrb[37].mxu1 }
 0xef6   : > { %v1553_v63 = vpop.f32.mrb[38].mxu1 }
 0xef7   : > { %v1558_v0 = vmul.f32 0.5, %v1553_v63  ;;  %v2153_v1 = vpop.f32.mrb[39].mxu1  ;;  %v1559_v3 = vadd.f32 %v2437_v47, %v1557_v61 }
 0xef9   : > { %v1561_v4 = vsel %vm504_vm3, %v1559_v3, -inf  ;;  %v1560_v6 = vadd.f32 %v2437_v47, %v1558_v0 }
 0xefa   : > { %1562 = vmax.xlane.f32.xlu1 %v1561_v4 }
 0xefb   : > { %v1564_v7 = vsel %vm504_vm3, %v1560_v6, -inf }
 0xefc   : > { %1565 = vmax.xlane.f32.xlu0 %v1564_v7 }
 0xf0b   : > { %1584 = vrot.lane.b32.xlu1 %v2417_v41, %s2318_s13 }
 0xf0f   : > { %1682 = vrot.lane.b32.xlu1 %v2417_v41, %s2319_s14 }
 0xf87   : > { %v1563_v8 = vpop.xlane.xlu1 %1562 }
 0xf88   : > { %v1567_v9 = vsub.f32 %v1559_v3, %v1563_v8 }
 0xf89   : > { %v1566_v10 = vpop.xlane.xlu0 %1565 }
 0xf8a   : > { %v1569_v11 = vmul.f32 1.442695, %v1567_v9  ;;  %v1568_v12 = vsub.f32 %v1560_v6, %v1566_v10 }
 0xf8b   : > { %v1585_v13 = vpop.permute.xlu1 %1584 }
 0xf8c   : > { %2271 = vpow2.f32 %v1569_v11  ;;  %v1571_v14 = vmul.f32 1.442695, %v1568_v12  ;;  %2155 = vmatpush3.bf16.msra.mxu0 %v1585_v13 }
 0xf8d   : > { %2166 = vmatprep.subr.bf16.mxu0 %v2297_v15 }
 0xf8e   : > { %2273 = vpow2.f32 %v1571_v14 }
 0xf8f   : > { %v1683_v33 = vpop.permute.xlu1 %1682 }
 0xf96   : > { %v2272_v16 = vpop.eup %2271 }
 0xf97   : > { %v1573_v17 = vsel %vm504_vm3, %v2272_v16, 0.0 }
 0xf98   : > { %v2274_v18 = vpop.eup %2273  ;;  %1574 = vadd.xlane.f32.xlu0 %v1573_v17 }
 0xf99   : > { %v1576_v19 = vsel %vm504_vm3, %v2274_v18, 0.0 }
 0xf9c   : > { %1577 = vadd.xlane.f32.xlu0 %v1576_v19 }
 0xfb2   : > { %1684 = vrot.lane.b32.xlu0 %v2417_v41, %s2320_s15 }
 0xfc4   : > { %v1497_v20 = vpop.f32.mrb[36].mxu0 }
 0xfc5   : > { %v2620_v2 = vadd.f32 %v1497_v20, %v2589_v35  ;;  %v2146_v21 = vpop.f32.mrb[37].mxu0  ;;  %v1631_v35 = vpack.c.bf16 %v441_v34, %v441_v34 }
 0xfc6   : > { %v1500_v22 = vpop.f32.mrb[38].mxu0 }
 0xfc7   : > { %v2623_v5 = vadd.f32 %v1500_v22, %v2592_v38  ;;  %v2147_v23 = vpop.f32.mrb[39].mxu0  ;;  %v1637_v36 = vsel %vm708_vm4, %v1631_v35, 0 }
 0xfc8   : > { %2161 = vmatpush3.bf16.msra.mxu1 %v1637_v36 }
 0xfc9   : > { %2172 = vmatprep.subr.bf16.mxu1 %v2297_v15 }
0x1025   : > { %v1575_v24 = vpop.xlane.xlu0 %1574 }
0x1026   : > { %2275 = vrcp.f32 %v1575_v24  ;;  %v2287_v24 = vld [vmem:[%s2383_s10] sm:$0xff] }
0x1029   : > { %v1578_v25 = vpop.xlane.xlu0 %1577 }
0x102a   : > { %2277 = vrcp.f32 %v1578_v25 }
0x102d   : > { %v1685_v30 = vpop.permute.xlu0 %1684 }
0x102e   : > { %v1690_v32 = vsel %vm446_vm2, %v1685_v30, 0 }
0x1030   : > { %v2276_v26 = vpop.eup %2275 }
0x1031   : > { %v1581_v28 = vmul.f32 %v2276_v26, %v2272_v16 }
0x1034   : > { %v2278_v27 = vpop.eup %2277 }
0x1035   : > { %v1582_v29 = vmul.f32 %v2278_v27, %v2274_v18 }
0x1037   : > { %v1583_v31 = vpack.c.bf16 %v1582_v29, %v1581_v28  ;;  %v2288_v29 = vld [vmem:[%s2383_s10 + $0x8] sm:$0xff] }
0x1039   : > { %2157 = vmatmul.mubr.msk.bf16.vlgmr.msra.gmra.mrb[40].mxu0 %vm504_vm3, %v1583_v31 }
0x103a   : > { %2167 = vmatpush3.bf16.xpose.msra.mxu0 %v1690_v32  ;;  %2168 = vmatprep.mubr.msk.bf16.mxu0 %vm2298_vm1, %v2297_v15 }
0x103b   : > { %2178 = vmatprep.subr.bf16.mxu0 %v2297_v15 }
0x1041   : > { %2169 = vmatmul.mubr.msk.bf16.vlgmr.msra.gmra.mrb[44].mxu0 %vm446_vm2, %v1683_v33 }
0x1042   : > { %2180 = vmatprep.mubr.msk.bf16.mxu0 %vm2298_vm1, %v2297_v15 }
0x110c   : > { %v1624_v37 = vpop.f32.mrb[40].mxu0 }
0x110d   : > { %v2158_v38 = vpop.f32.mrb[41].mxu0 }
0x110e   : > { %v1627_v39 = vpop.f32.mrb[42].mxu0 }
0x110f   : > { %v1632_v40 = vpack.c.bf16 %v1627_v39, %v1624_v37  ;;  %v2159_v42 = vpop.f32.mrb[43].mxu0 }
0x1111   : > { %2163 = vmatmul.mubr.msk.bf16.vlgmr.msra.gmra.mrb[40].mxu1 %vm446_vm2, %v1632_v40 }
0x1112   : > { %2174 = vmatprep.mubr.msk.bf16.mxu1 %vm2298_vm1, %v2297_v15 }
0x1114   : > { %v1726_v43 = vpop.f32.mrb[44].mxu0 }
0x1115   : > { %v1733_v44 = vmul.f32 0.5, %v1726_v43  ;;  %v2170_v45 = vpop.f32.mrb[45].mxu0 }
0x1116   : > { %v1729_v46 = vpop.f32.mrb[46].mxu0 }
0x1117   : > { %v1734_v48 = vmul.f32 0.5, %v1729_v46  ;;  %v2171_v49 = vpop.f32.mrb[47].mxu0  ;;  %v1735_v50 = vadd.f32 %v2437_v47, %v1733_v44 }
0x1119   : > { %v1737_v51 = vsel %vm504_vm3, %v1735_v50, -inf  ;;  %v1736_v52 = vadd.f32 %v2437_v47, %v1734_v48  ;;  %v1809_v47 = vrot.slane %v1631_v35, 2 }
0x111a   : > { %1738 = vmax.xlane.f32.xlu1 %v1737_v51 }
0x111b   : > { %v1740_v53 = vsel %vm504_vm3, %v1736_v52, -inf  ;;  %v1814_v63 = vsel %vm708_vm4, %v1809_v47, 0 }
0x111c   : > { %1741 = vmax.xlane.f32.xlu0 %v1740_v53  ;;  %2179 = vmatpush3.bf16.msra.mxu0 %v1814_v63 }
0x11a7   : > { %v1739_v54 = vpop.xlane.xlu1 %1738 }
0x11a8   : > { %v1743_v55 = vsub.f32 %v1735_v50, %v1739_v54 }
0x11a9   : > { %v1742_v56 = vpop.xlane.xlu0 %1741 }
0x11aa   : > { %v1745_v15 = vmul.f32 1.442695, %v1743_v55  ;;  %v1744_v57 = vsub.f32 %v1736_v52, %v1742_v56 }
0x11ac   : > { %2279 = vpow2.f32 %v1745_v15  ;;  %v1747_v58 = vmul.f32 1.442695, %v1744_v57 }
0x11ae   : > { %2281 = vpow2.f32 %v1747_v58 }
0x11b6   : > { %v2280_v59 = vpop.eup %2279 }
0x11b7   : > { %v1749_v60 = vsel %vm504_vm3, %v2280_v59, 0.0 }
0x11b8   : > { %v2282_v61 = vpop.eup %2281  ;;  %1750 = vadd.xlane.f32.xlu0 %v1749_v60 }
0x11b9   : > { %v1752_v62 = vsel %vm504_vm3, %v2282_v61, 0.0 }
0x11ba   : > { %1753 = vadd.xlane.f32.xlu1 %v1752_v62 }
0x11ce   : > { %1760 = vrot.lane.b32.xlu0 %v2417_v41, %s2321_s18 }
0x11e4   : > { %v1673_v0 = vpop.f32.mrb[40].mxu1 }
0x11e5   : > { %v1680_v1 = vadd.f32 %v1673_v0, %v2620_v2  ;;  %v2164_v3 = vpop.f32.mrb[41].mxu1 }
0x11e6   : > { %v1676_v4 = vpop.f32.mrb[42].mxu1 }
0x11e7   : > { %v1681_v6 = vadd.f32 %v1676_v4, %v2623_v5  ;;  %v2165_v7 = vpop.f32.mrb[43].mxu1  ;;  %v1976_v5 = vld [vmem:[%s2675_s7] ss:$0 sm:$0xff] }
0x1245   : > { %v1751_v8 = vpop.xlane.xlu0 %1750 }
0x1246   : > { %2283 = vrcp.f32 %v1751_v8 }
0x1247   : > { %v1754_v9 = vpop.xlane.xlu1 %1753 }
0x1248   : > { %2285 = vrcp.f32 %v1754_v9 }
0x1249   : > { %v1761_v10 = vpop.permute.xlu0 %1760 }
0x124a   : > { %2173 = vmatpush3.bf16.msra.mxu1 %v1761_v10 }
0x1250   : > { %v2284_v11 = vpop.eup %2283 }
0x1251   : > { %v1757_v12 = vmul.f32 %v2284_v11, %v2280_v59 }
0x1252   : > { %v2286_v41 = vpop.eup %2285 }
0x1253   : > { %v1758_v13 = vmul.f32 %v2286_v41, %v2282_v61 }
0x1255   : > { %v1759_v14 = vpack.c.bf16 %v1758_v13, %v1757_v12 }
0x1257   : > { %2175 = vmatmul.mubr.msk.bf16.vlgmr.msra.gmra.mrb[44].mxu1 %vm504_vm3, %v1759_v14 }
0x132a   : > { %v1800_v16 = vpop.f32.mrb[44].mxu1 }
0x132b   : > { %v2176_v17 = vpop.f32.mrb[45].mxu1 }
0x132c   : > { %v1803_v18 = vpop.f32.mrb[46].mxu1 }
0x132d   : > { %v1807_v19 = vpack.c.bf16 %v1803_v18, %v1800_v16  ;;  %v2177_v20 = vpop.f32.mrb[47].mxu1 }
0x132f   : > { %2181 = vmatmul.mubr.msk.bf16.vlgmr.msra.gmra.mrb[48].mxu0 %vm446_vm2, %v1807_v19 }
0x1402   : > { %v1850_v2 = vpop.f32.mrb[48].mxu0 }
0x1403   : > { %v1857_v21 = vadd.f32 %v1850_v2, %v1680_v1  ;;  %v2182_v22 = vpop.f32.mrb[49].mxu0 }
0x1404   : > { %v1853_v23 = vpop.f32.mrb[50].mxu0 }
0x1405   : > { %v1859_v25 = vadd.f32 %v2287_v24, %v1857_v21  ;;  %v1858_v26 = vadd.f32 %v1853_v23, %v1681_v6  ;;  %v2183_v27 = vpop.f32.mrb[51].mxu0 }
0x1407   : > { %v1868_v28 = vadd.f32 %v1976_v5, %v1859_v25  ;;  %v1860_v30 = vadd.f32 %v2288_v29, %v1858_v26 }
0x1409   : > { %1870 = vst.msk [vmem:[%s319_s23] sm:$0xff] %vm325_vm0, %v1868_v28  ;;  %v1869_v31 = vadd.f32 %v1976_v5, %v1860_v30 }
0x140b   : > { %1871 = vst.msk [vmem:[%s319_s23 + $0x8] sm:$0xff] %vm325_vm0, %v1869_v31 }
0x140c PF: > { %s18_s27 = sadd.s32 1, %s2295_s27  }
0x140d   : > { %p15_p4 = scmp.ge.s32.totalorder %s18_s27, 4  }
0x140f   :  { %17 = sbr.rel (!%p15_p4) target bundleno = 1 (0x1), region = 85 }

// kernel: _lambda_.22
= control target key start
LH: loop header
LB: loop body
LE: loop exit
PB: predicated region body
PF: predicated region fallthrough
CT: control target
= control target key end

     0   :  { %vm44_vm0 = vcmask 261120   ;;  %s186_s1 = inlined_call_operand.vmem [shape: bf16[32,32], index: 1, kind: input, shape index: {}]   ;;  %s187_s0 = inlined_call_operand.vmem [shape: f32[32,32], index: 0, kind: input, shape index: {}]   ;;  %s188_s2 = inlined_call_operand.vmem [shape: f32[1,32], index: 2, kind: input, shape index: {}]   ;;  %s189_s3 = inlined_call_operand.vmem [shape: f32[32,32], index: 3, kind: output, shape index: {}]  }
   0x1   :  { %v125_v0 = vld [vmem:[%s186_s1] sm:$0xff]   ;;  %v126_v1 = vld [vmem:[%s186_s1 + $0x8] sm:$0xff]   ;;  %v17_v5 = vld [vmem:[%s187_s0 + $0x10] sm:$0xff] }
   0x2   :  { %117 = vmatprep.subr.bf16.mxu0 %v125_v0  ;;  %v15_v2 = vld [vmem:[%s187_s0] sm:$0xff]  ;;  %v16_v3 = vld [vmem:[%s187_s0 + $0x8] sm:$0xff]  ;;  %v18_v6 = vld [vmem:[%s187_s0 + $0x18] sm:$0xff] }
   0x3   :  { %118 = vmatpush3.bf16.msra.mxu0 %v125_v0  ;;  %v19_v4 = vpack.c.bf16 %v16_v3, %v15_v2  ;;  %v20_v7 = vpack.c.bf16 %v18_v6, %v17_v5  ;;  %v108_v8 = vld [vmem:[%s188_s2] ss:$0 sm:$0xff] }
   0x4   :  { %119 = vmatprep.subr.bf16.mxu0 %v126_v1 }
   0x5   :  { %121 = vmatprep.mubr.msk.bf16.mxu0 %vm44_vm0, %v19_v4 }
   0x7   :  { %120 = vmatpush3.bf16.msra.mxu0 %v126_v1 }
   0xa   :  { %122 = vmatmul.mubr.msk.bf16.vlgmr.msra.gmra.mrb[0].mxu0 %vm44_vm0, %v20_v7 }
  0xdd   :  { %v123_v9 = vpop.f32.mrb[0].mxu0 }
  0xde   :  { %v94_v10 = vadd.f32 %v123_v9, %v108_v8  ;;  %v85_v11 = vpop.f32.mrb[1].mxu0 }
  0xdf   :  { %v86_v12 = vadd.f32 %v108_v8, %v85_v11  ;;  %v124_v13 = vpop.f32.mrb[2].mxu0 }
  0xe0   :  { %102 = vst.msk [vmem:[%s189_s3 + $0x10] sm:$0xff] %vm44_vm0, %v94_v10  ;;  %v97_v14 = vadd.f32 %v124_v13, %v108_v8  ;;  %v88_v15 = vpop.f32.mrb[3].mxu0 }
  0xe1   :  { %100 = vst.msk [vmem:[%s189_s3] sm:$0xff] %vm44_vm0, %v86_v12  ;;  %v89_v16 = vadd.f32 %v108_v8, %v88_v15 }
  0xe2   :  { %103 = vst.msk [vmem:[%s189_s3 + $0x18] sm:$0xff] %vm44_vm0, %v97_v14 }
  0xe3   :  { %101 = vst.msk [vmem:[%s189_s3 + $0x8] sm:$0xff] %vm44_vm0, %v89_v16 }

// kernel: _lambda_.21
= control target key start
LH: loop header
LB: loop body
LE: loop exit
PB: predicated region body
PF: predicated region fallthrough
CT: control target
= control target key end

     0   :  { %vm39_vm0 = vcmask 261120   ;;  %v1966_v44 = vmov 0   ;;  %s2599_s0 = inlined_call_operand.vmem [shape: f32[32,32], index: 0, kind: input, shape index: {}]   ;;  %s2600_s3 = inlined_call_operand.vmem [shape: bf16[32,1024], index: 3, kind: input, shape index: {}]   ;;  %s2601_s1 = inlined_call_operand.vmem [shape: f32[1,32], index: 1, kind: input, shape index: {}, may-alias: {1,7}]   ;;  %s2602_s2 = inlined_call_operand.vmem [shape: f32[1,32], index: 2, kind: input, shape index: {}, may-alias: {2,8}]   ;;  %s2603_s5 = inlined_call_operand.vmem [shape: bf16[1024,32], index: 5, kind: input, shape index: {}]   ;;  %s2604_s4 = inlined_call_operand.vmem [shape: f32[1,1024], index: 4, kind: input, shape index: {}]   ;;  %s2605_s6 = inlined_call_operand.vmem [shape: f32[1,32], index: 6, kind: input, shape index: {}]   ;;  %s2606_s7 = inlined_call_operand.vmem [shape: f32[1,32], index: 7, kind: input, shape index: {}, may-alias: {1,7}]   ;;  %s2607_s8 = inlined_call_operand.vmem [shape: f32[1,32], index: 8, kind: input, shape index: {}, may-alias: {2,8}]   ;;  %s2608_s9 = inlined_call_operand.vmem [shape: f32[32,32], index: 9, kind: output, shape index: {}]  }
   0x1   :  { %v33_v0 = vld [vmem:[%s2599_s0] sm:$0xff]  ;;  %v35_v1 = vld [vmem:[%s2599_s0 + $0x10] sm:$0xff]  ;;  %v34_v2 = vld [vmem:[%s2599_s0 + $0x8] sm:$0xff]  ;;  %291 = vmatprep.mubr.bf16.mxu0 %v1966_v44  ;;  %344 = vmatprep.mubr.bf16.mxu1 %v1966_v44 }
   0x2   :  { %v40_v3 = vsel %vm39_vm0, %v33_v0, 0.0  ;;  %v46_v4 = vsel %vm39_vm0, %v35_v1, 0.0  ;;  %v36_v5 = vld [vmem:[%s2599_s0 + $0x18] sm:$0xff]  ;;  %v43_v6 = vsel %vm39_vm0, %v34_v2, 0.0  ;;  %v115_v28 = vld [vmem:[%s2600_s3] sm:$0xff]  ;;  %v116_v30 = vld [vmem:[%s2600_s3 + $0x8] sm:$0xff] }
   0x3   :  { %41 = vadd.xlane.f32.xlu0 %v40_v3  ;;  %47 = vadd.xlane.f32.xlu1 %v46_v4  ;;  %v49_v7 = vsel %vm39_vm0, %v36_v5, 0.0  ;;  %v119_v29 = vld [vmem:[%s2600_s3 + $0x20] sm:$0xff]  ;;  %v120_v32 = vld [vmem:[%s2600_s3 + $0x28] sm:$0xff]  ;;  %v117_v45 = vld [vmem:[%s2600_s3 + $0x10] sm:$0xff] }
   0x4   :  { %v1519_v31 = vcombine.high %v115_v28, %v119_v29  ;;  %v1521_v33 = vcombine.high %v116_v30, %v120_v32  ;;  %v1518_v34 = vcombine.low %v115_v28, %v119_v29  ;;  %v1520_v35 = vcombine.low %v116_v30, %v120_v32  ;;  %v123_v36 = vld [vmem:[%s2600_s3 + $0x40] sm:$0xff]  ;;  %v124_v38 = vld [vmem:[%s2600_s3 + $0x48] sm:$0xff]  ;;  %v121_v46 = vld [vmem:[%s2600_s3 + $0x30] sm:$0xff] }
   0x5   :  { %v127_v37 = vld [vmem:[%s2600_s3 + $0x60] sm:$0xff]  ;;  %v128_v40 = vld [vmem:[%s2600_s3 + $0x68] sm:$0xff]  ;;  %v118_v47 = vld [vmem:[%s2600_s3 + $0x18] sm:$0xff]  ;;  %v1523_v48 = vcombine.high %v117_v45, %v121_v46  ;;  %v1522_v50 = vcombine.low %v117_v45, %v121_v46 }
   0x6   :  { %259 = vmatprep.subr.bf16.mxu0 %v1519_v31  ;;  %312 = vmatprep.subr.bf16.mxu1 %v1521_v33  ;;  %v1527_v39 = vcombine.high %v123_v36, %v127_v37  ;;  %v1529_v41 = vcombine.high %v124_v38, %v128_v40  ;;  %v1526_v42 = vcombine.low %v123_v36, %v127_v37  ;;  %v122_v49 = vld [vmem:[%s2600_s3 + $0x38] sm:$0xff]  ;;  %v1516_v3 = vld [vmem:[%s2601_s1] ss:$0 sm:$0xff]  ;;  %v1758_v33 = vld [vmem:[%s2603_s5 + $0x48] sm:$0xff]  }
   0x7   :  { %44 = vadd.xlane.f32.xlu0 %v43_v6  ;;  %50 = vadd.xlane.f32.xlu1 %v49_v7  ;;  %v1528_v43 = vcombine.low %v124_v38, %v128_v40  ;;  %v1524_v51 = vcombine.low %v118_v47, %v122_v49  ;;  %v1525_v52 = vcombine.high %v118_v47, %v122_v49  ;;  %v1754_v29 = vld [vmem:[%s2603_s5 + $0x40] sm:$0xff]   ;;  %v1761_v36 = vld [vmem:[%s2603_s5 + $0x88] sm:$0xff]   ;;  %v1762_v37 = vld [vmem:[%s2603_s5 + $0x50] sm:$0xff]  }
   0x8   :  { %260 = vmatpush1.bf16.msra.mxu0 %v1518_v34  ;;  %313 = vmatpush1.bf16.msra.mxu1 %v1520_v35  ;;  %v1755_v30 = vld [vmem:[%s2603_s5 + $0xc0] sm:$0xff]   ;;  %v1759_v34 = vld [vmem:[%s2603_s5 + $0xc8] sm:$0xff]   ;;  %v1763_v38 = vld [vmem:[%s2603_s5 + $0xd0] sm:$0xff]  }
   0x9   :  { %261 = vmatprep.subr.bf16.mxu0 %v1527_v39  ;;  %314 = vmatprep.subr.bf16.mxu1 %v1529_v41  ;;  %v1756_v31 = vld [vmem:[%s2603_s5] sm:$0xff]   ;;  %v1760_v35 = vld [vmem:[%s2603_s5 + $0x8] sm:$0xff]   ;;  %v1764_v39 = vld [vmem:[%s2603_s5 + $0x10] sm:$0xff]  }
   0xa   :  { %v1757_v32 = vld [vmem:[%s2603_s5 + $0x80] sm:$0xff]   ;;  %v1765_v40 = vld [vmem:[%s2603_s5 + $0x90] sm:$0xff]   ;;  %v1766_v41 = vld [vmem:[%s2603_s5 + $0x58] sm:$0xff]  }
   0xb   :  { %v1770_v45 = vld [vmem:[%s2603_s5 + $0x60] sm:$0xff]   ;;  %v1774_v49 = vld [vmem:[%s2603_s5 + $0x68] sm:$0xff]  }
   0xc   :  { %262 = vmatpush1.bf16.msra.mxu0 %v1526_v42  ;;  %315 = vmatpush1.bf16.msra.mxu1 %v1528_v43  ;;  %v1767_v42 = vld [vmem:[%s2603_s5 + $0xd8] sm:$0xff]   ;;  %v1771_v46 = vld [vmem:[%s2603_s5 + $0xe0] sm:$0xff]  }
   0xd   :  { %365 = vmatprep.subr.bf16.mxu0 %v1523_v48  ;;  %418 = vmatprep.subr.bf16.mxu1 %v1525_v52  ;;  %v1768_v43 = vld [vmem:[%s2603_s5 + $0x18] sm:$0xff]   ;;  %v1772_v47 = vld [vmem:[%s2603_s5 + $0x20] sm:$0xff]   ;;  %v1777_v52 = vld [vmem:[%s2603_s5 + $0xa8] sm:$0xff]  }
   0xe   :  { %v1773_v48 = vld [vmem:[%s2603_s5 + $0xa0] sm:$0xff]  }
  0x90   :  { %v42_v8 = vpop.xlane.xlu0 %41  ;;  %v48_v9 = vpop.xlane.xlu1 %47 }
  0x91   :  { %v53_v10 = vmul.f32 0.03125, %v42_v8  ;;  %v55_v11 = vmul.f32 0.03125, %v48_v9  ;;  %v1517_v8 = vld [vmem:[%s2602_s2] ss:$0 sm:$0xff] }
  0x93   :  { %v2033_v12 = vsub.f32 %v33_v0, %v53_v10  ;;  %v2035_v13 = vsub.f32 %v35_v1, %v55_v11  ;;  %v125_v11 = vld [vmem:[%s2600_s3 + $0x50] sm:$0xff] }
  0x94   :  { %v45_v14 = vpop.xlane.xlu0 %44  ;;  %v51_v15 = vpop.xlane.xlu1 %50 }
  0x95   :  { %v54_v16 = vmul.f32 0.03125, %v45_v14  ;;  %v56_v17 = vmul.f32 0.03125, %v51_v15  ;;  %v61_v18 = vmul.f32 %v2033_v12, %v2033_v12  ;;  %v63_v19 = vmul.f32 %v2035_v13, %v2035_v13 }
  0x97   :  { %v2041_v20 = vsub.f32 %v34_v2, %v54_v16  ;;  %v2043_v21 = vsub.f32 %v36_v5, %v56_v17  ;;  %v65_v22 = vsel %vm39_vm0, %v61_v18, 0.0  ;;  %v71_v23 = vsel %vm39_vm0, %v63_v19, 0.0  ;;  %v129_v17 = vld [vmem:[%s2600_s3 + $0x70] sm:$0xff]  ;;  %v126_v18 = vld [vmem:[%s2600_s3 + $0x58] sm:$0xff] }
  0x98   :  { %66 = vadd.xlane.f32.xlu0 %v65_v22  ;;  %v130_v19 = vld [vmem:[%s2600_s3 + $0x78] sm:$0xff] }
  0x99   :  { %v62_v24 = vmul.f32 %v2041_v20, %v2041_v20  ;;  %v64_v25 = vmul.f32 %v2043_v21, %v2043_v21 }
  0x9b   :  { %v68_v26 = vsel %vm39_vm0, %v62_v24, 0.0  ;;  %v74_v27 = vsel %vm39_vm0, %v64_v25, 0.0  ;;  %v1530_v25 = vcombine.low %v125_v11, %v129_v17 }
  0x9c   :  { %72 = vadd.xlane.f32.xlu0 %v71_v23  ;;  %69 = vadd.xlane.f32.xlu1 %v68_v26  ;;  %v1531_v23 = vcombine.high %v125_v11, %v129_v17  ;;  %v1532_v26 = vcombine.low %v126_v18, %v130_v19 }
  0xa0   :  { %75 = vadd.xlane.f32.xlu1 %v74_v27 }
 0x125   :  { %v67_v53 = vpop.xlane.xlu0 %66 }
 0x126   :  { %v77_v54 = vmul.f32 0.03125, %v67_v53  ;;  %v1778_v53 = vld [vmem:[%s2603_s5 + $0x70] sm:$0xff]  }
 0x128   :  { %v81_v55 = vadd.f32 1e-05, %v77_v54  ;;  %v1779_v54 = vld [vmem:[%s2603_s5 + $0xf0] sm:$0xff]  }
 0x129   :  { %v70_v56 = vpop.xlane.xlu1 %69  ;;  %v73_v57 = vpop.xlane.xlu0 %72 }
 0x12a   :  { %1818 = vrsqrt.f32 %v81_v55  ;;  %v78_v58 = vmul.f32 0.03125, %v70_v56  ;;  %v79_v59 = vmul.f32 0.03125, %v73_v57  ;;  %v1780_v55 = vld [vmem:[%s2603_s5 + $0x30] sm:$0xff]   ;;  %v1782_v57 = vld [vmem:[%s2603_s5 + $0x78] sm:$0xff]  }
 0x12b   :  { %v1781_v56 = vld [vmem:[%s2603_s5 + $0xb0] sm:$0xff]  }
 0x12c   :  { %v82_v60 = vadd.f32 1e-05, %v78_v58  ;;  %v83_v61 = vadd.f32 1e-05, %v79_v59  ;;  %v1783_v58 = vld [vmem:[%s2603_s5 + $0xf8] sm:$0xff]  }
 0x12d   :  { %v76_v62 = vpop.xlane.xlu1 %75  ;;  %v1784_v59 = vld [vmem:[%s2603_s5 + $0x38] sm:$0xff]  }
 0x12e   :  { %1820 = vrsqrt.f32 %v82_v60  ;;  %v80_v63 = vmul.f32 0.03125, %v76_v62  ;;  %v1785_v60 = vld [vmem:[%s2603_s5 + $0xb8] sm:$0xff]   ;;  %v1787_v62 = vld [vmem:[%s2603_s5 + $0x1c0] sm:$0xff]  }
 0x12f   :  { %1822 = vrsqrt.f32 %v83_v61  ;;  %v1786_v61 = vld [vmem:[%s2603_s5 + $0x140] sm:$0xff]  }
 0x130   :  { %v84_v0 = vadd.f32 1e-05, %v80_v63  ;;  %v133_v63 = vlaneseq }
 0x132   :  { %1824 = vrsqrt.f32 %v84_v0  ;;  %v2229_v0 = vshrl.u32 %v133_v63, 7 }
 0x134   :  { %v1819_v1 = vpop.eup %1818 }
 0x135   :  { %v89_v2 = vmul.f32 %v1819_v1, %v2033_v12  ;;  %v135_v1 = vsub.s32 0, %v2229_v0 }
 0x137   :  { %v99_v6 = vmul.f32 %v1516_v3, %v89_v2  ;;  %v143_v2 = vsub.s32 2, %v2229_v0 }
 0x138   :  { %v1821_v4 = vpop.eup %1820 }
 0x139   :  { %v90_v5 = vmul.f32 %v1821_v4, %v2041_v20  ;;  %v1823_v7 = vpop.eup %1822  ;;  %v109_v15 = vadd.f32 %v1517_v8, %v99_v6  ;;  %v139_v4 = vsub.s32 1, %v2229_v0 }
 0x13a   :  { %v91_v12 = vmul.f32 %v1823_v7, %v2035_v13  ;;  %v1533_v13 = vcombine.high %v126_v18, %v130_v19 }
 0x13b   :  { %v100_v9 = vmul.f32 %v1516_v3, %v90_v5  ;;  %v147_v5 = vsub.s32 3, %v2229_v0 }
 0x13c   :  { %v1825_v10 = vpop.eup %1824 }
 0x13d   :  { %v92_v14 = vmul.f32 %v1825_v10, %v2043_v21  ;;  %v110_v16 = vadd.f32 %v1517_v8, %v100_v9  ;;  %v101_v21 = vmul.f32 %v1516_v3, %v91_v12 }
 0x13f   :  { %v113_v20 = vpack.c.bf16 %v110_v16, %v109_v15  ;;  %v102_v22 = vmul.f32 %v1516_v3, %v92_v14  ;;  %v111_v27 = vadd.f32 %v1517_v8, %v101_v21  ;;  %v2236_v3 = vld [vmem:[%s2604_s4] sm:$0xff] }
 0x140   :  { %v136_v6 = vrot.slane %v2236_v3, %v135_v1  ;;  %v2242_v7 = vrot.slane %v2236_v3, %v143_v2  ;;  %v2248_v9 = vrot.slane %v2236_v3, %v147_v5  ;;  %v159_v1 = vsub.s32 6, %v2229_v0 }
 0x141   :  { %1534 = vmatmul.mubr.msk.bf16.vlgmr.msra.gmra.mrb[0].mxu0 %vm39_vm0, %v113_v20  ;;  %1536 = vmatmul.mubr.msk.bf16.vlgmr.msra.gmra.mrb[0].mxu1 %vm39_vm0, %v113_v20  ;;  %v112_v24 = vadd.f32 %v1517_v8, %v102_v22  ;;  %v2245_v8 = vrot.slane %v2236_v3, %v139_v4  ;;  %v155_v2 = vsub.s32 5, %v2229_v0 }
 0x142   :  { %301 = vmatprep.mubr.bf16.mxu0 %v1966_v44  ;;  %354 = vmatprep.mubr.bf16.mxu1 %v1966_v44 }
 0x143   :  { %366 = vmatpush1.bf16.msra.mxu0 %v1522_v50  ;;  %419 = vmatpush1.bf16.msra.mxu1 %v1524_v51  ;;  %v114_v28 = vpack.c.bf16 %v112_v24, %v111_v27  ;;  %v1775_v50 = vld [vmem:[%s2603_s5 + $0xe8] sm:$0xff]  }
 0x144   :  { %367 = vmatprep.subr.bf16.mxu0 %v1531_v23  ;;  %420 = vmatprep.subr.bf16.mxu1 %v1533_v13  ;;  %v1776_v51 = vld [vmem:[%s2603_s5 + $0x28] sm:$0xff]  }
 0x147   :  { %368 = vmatpush1.bf16.msra.mxu0 %v1530_v25  ;;  %421 = vmatpush1.bf16.msra.mxu1 %v1532_v26 }
 0x148   :  { %1641 = vmatprep.subr.bf16.mxu0 %v1754_v29  ;;  %1669 = vmatprep.subr.bf16.mxu1 %v1755_v30 }
 0x149   :  { %1535 = vmatmul.mubr.msk.bf16.gmra.mrb[4].mxu0 %vm39_vm0, %v114_v28  ;;  %1537 = vmatmul.mubr.msk.bf16.gmra.mrb[4].mxu1 %vm39_vm0, %v114_v28 }
 0x14a   :  { %397 = vmatprep.mubr.bf16.mxu0 %v1966_v44  ;;  %450 = vmatprep.mubr.bf16.mxu1 %v1966_v44 }
 0x151   :  { %1538 = vmatmul.mubr.msk.bf16.vlgmr.msra.gmra.mrb[8].mxu0 %vm39_vm0, %v113_v20  ;;  %1540 = vmatmul.mubr.msk.bf16.vlgmr.msra.gmra.mrb[8].mxu1 %vm39_vm0, %v113_v20 }
 0x152   :  { %407 = vmatprep.mubr.bf16.mxu0 %v1966_v44  ;;  %460 = vmatprep.mubr.bf16.mxu1 %v1966_v44  ;;  %v1769_v44 = vld [vmem:[%s2603_s5 + $0x98] sm:$0xff]  }
 0x153   :  { %1642 = vmatpush3.bf16.msra.mxu0 %v1756_v31  ;;  %1670 = vmatpush3.bf16.msra.mxu1 %v1757_v32 }
 0x154   :  { %1643 = vmatprep.subr.bf16.mxu0 %v1758_v33  ;;  %1671 = vmatprep.subr.bf16.mxu1 %v1759_v34 }
 0x157   :  { %1644 = vmatpush3.bf16.msra.mxu0 %v1760_v35  ;;  %1672 = vmatpush3.bf16.msra.mxu1 %v1761_v36 }
 0x158   :  { %1645 = vmatprep.subr.bf16.mxu0 %v1762_v37  ;;  %1673 = vmatprep.subr.bf16.mxu1 %v1763_v38 }
 0x159   :  { %1539 = vmatmul.mubr.msk.bf16.gmra.mrb[12].mxu0 %vm39_vm0, %v114_v28  ;;  %1541 = vmatmul.mubr.msk.bf16.gmra.mrb[12].mxu1 %vm39_vm0, %v114_v28 }
 0x15b   :  { %1646 = vmatpush3.bf16.msra.mxu0 %v1764_v39  ;;  %1674 = vmatpush3.bf16.msra.mxu1 %v1765_v40 }
 0x15c   :  { %1647 = vmatprep.subr.bf16.mxu0 %v1766_v41  ;;  %1675 = vmatprep.subr.bf16.mxu1 %v1767_v42 }
 0x15f   :  { %1648 = vmatpush3.bf16.msra.mxu0 %v1768_v43  ;;  %1676 = vmatpush3.bf16.msra.mxu1 %v1769_v44 }
 0x160   :  { %1649 = vmatprep.subr.bf16.mxu0 %v1770_v45  ;;  %1677 = vmatprep.subr.bf16.mxu1 %v1771_v46 }
 0x163   :  { %1650 = vmatpush3.bf16.msra.mxu0 %v1772_v47  ;;  %1678 = vmatpush3.bf16.msra.mxu1 %v1773_v48 }
 0x164   :  { %1651 = vmatprep.subr.bf16.mxu0 %v1774_v49  ;;  %1679 = vmatprep.subr.bf16.mxu1 %v1775_v50 }
 0x167   :  { %1652 = vmatpush3.bf16.msra.mxu0 %v1776_v51  ;;  %1680 = vmatpush3.bf16.msra.mxu1 %v1777_v52 }
 0x168   :  { %1653 = vmatprep.subr.bf16.mxu0 %v1778_v53  ;;  %1681 = vmatprep.subr.bf16.mxu1 %v1779_v54 }
 0x16b   :  { %1654 = vmatpush3.bf16.msra.mxu0 %v1780_v55  ;;  %1682 = vmatpush3.bf16.msra.mxu1 %v1781_v56 }
 0x16c   :  { %1655 = vmatprep.subr.bf16.mxu0 %v1782_v57  ;;  %1683 = vmatprep.subr.bf16.mxu1 %v1783_v58 }
 0x16f   :  { %1656 = vmatpush3.bf16.msra.mxu0 %v1784_v59  ;;  %1684 = vmatpush3.bf16.msra.mxu1 %v1785_v60  ;;  %v151_v59 = vsub.s32 4, %v2229_v0 }
 0x170   :  { %1697 = vmatprep.subr.bf16.mxu0 %v1786_v61  ;;  %1725 = vmatprep.subr.bf16.mxu1 %v1787_v62 }
 0x214   :  { %v293_v10 = vpop.f32.mrb[0].mxu0  ;;  %v346_v11 = vpop.f32.mrb[0].mxu1 }
 0x215   :  { %v2250_v12 = vadd.f32 %v293_v10, %v136_v6  ;;  %v2253_v14 = vadd.f32 %v346_v11, %v2242_v7  ;;  %v295_v15 = vpop.f32.mrb[1].mxu0  ;;  %v348_v16 = vpop.f32.mrb[1].mxu1  ;;  %v163_v11 = vsub.s32 7, %v2229_v0 }
 0x216   :  { %v2256_v17 = vadd.f32 %v295_v15, %v2245_v8  ;;  %v2259_v18 = vadd.f32 %v348_v16, %v2248_v9  ;;  %v297_v19 = vpop.f32.mrb[2].mxu0  ;;  %v350_v20 = vpop.f32.mrb[2].mxu1 }
 0x217   :  { %v1542_v22 = vmul.f32 -1.442695, %v2250_v12  ;;  %v1544_v23 = vmul.f32 -1.442695, %v2253_v14  ;;  %v2263_v13 = vadd.f32 %v297_v19, %v136_v6  ;;  %v2266_v21 = vadd.f32 %v350_v20, %v2242_v7  ;;  %v299_v24 = vpop.f32.mrb[3].mxu0  ;;  %v352_v25 = vpop.f32.mrb[3].mxu1 }
 0x218   :  { %v1543_v26 = vmul.f32 -1.442695, %v2256_v17  ;;  %v1545_v27 = vmul.f32 -1.442695, %v2259_v18  ;;  %v2271_v28 = vadd.f32 %v299_v24, %v2245_v8  ;;  %v2274_v29 = vadd.f32 %v352_v25, %v2248_v9 }
 0x219   :  { %1826 = vpow2.f32 %v1542_v22  ;;  %v1550_v30 = vmul.f32 -1.442695, %v2263_v13  ;;  %v1552_v31 = vmul.f32 -1.442695, %v2266_v21 }
 0x21a   :  { %1828 = vpow2.f32 %v1544_v23  ;;  %v1551_v32 = vmul.f32 -1.442695, %v2271_v28  ;;  %v1553_v33 = vmul.f32 -1.442695, %v2274_v29 }
 0x21b   :  { %1830 = vpow2.f32 %v1543_v26  ;;  %v2309_v26 = vrot.slane %v2236_v3, %v151_v59 }
 0x21c   :  { %1832 = vpow2.f32 %v1545_v27  ;;  %v303_v34 = vpop.f32.mrb[4].mxu0  ;;  %v356_v35 = vpop.f32.mrb[4].mxu1 }
 0x21d   :  { %1834 = vpow2.f32 %v1550_v30  ;;  %v2280_v36 = vadd.f32 %v303_v34, %v136_v6  ;;  %v2283_v37 = vadd.f32 %v356_v35, %v2242_v7  ;;  %v305_v38 = vpop.f32.mrb[5].mxu0  ;;  %v358_v39 = vpop.f32.mrb[5].mxu1  ;;  %v2312_v30 = vrot.slane %v2236_v3, %v159_v1 }
 0x21e   :  { %1836 = vpow2.f32 %v1552_v31  ;;  %v2286_v40 = vadd.f32 %v305_v38, %v2245_v8  ;;  %v2289_v41 = vadd.f32 %v358_v39, %v2248_v9  ;;  %v307_v42 = vpop.f32.mrb[6].mxu0  ;;  %v360_v43 = vpop.f32.mrb[6].mxu1  ;;  %v2315_v31 = vrot.slane %v2236_v3, %v155_v2 }
 0x21f   :  { %1838 = vpow2.f32 %v1551_v32  ;;  %v1558_v44 = vmul.f32 -1.442695, %v2280_v36  ;;  %v1560_v45 = vmul.f32 -1.442695, %v2283_v37  ;;  %v2293_v46 = vadd.f32 %v307_v42, %v136_v6  ;;  %v309_v47 = vpop.f32.mrb[7].mxu0  ;;  %v362_v48 = vpop.f32.mrb[7].mxu1 }
 0x220   :  { %1840 = vpow2.f32 %v1553_v33  ;;  %v1559_v49 = vmul.f32 -1.442695, %v2286_v40  ;;  %v1561_v50 = vmul.f32 -1.442695, %v2289_v41  ;;  %v2303_v20 = vadd.f32 %v360_v43, %v2242_v7 }
 0x221   :  { %1842 = vpow2.f32 %v1558_v44  ;;  %v1566_v51 = vmul.f32 -1.442695, %v2293_v46  ;;  %v2306_v25 = vadd.f32 %v309_v47, %v2245_v8  ;;  %v2318_v33 = vrot.slane %v2236_v3, %v163_v11 }
 0x222   :  { %1844 = vpow2.f32 %v1560_v45  ;;  %v1568_v35 = vmul.f32 -1.442695, %v2303_v20  ;;  %v2322_v38 = vadd.f32 %v362_v48, %v2248_v9 }
 0x223   :  { %v1827_v52 = vpop.eup %1826  ;;  %1846 = vpow2.f32 %v1559_v49  ;;  %v1567_v44 = vmul.f32 -1.442695, %v2306_v25 }
 0x224   :  { %v1829_v53 = vpop.eup %1828  ;;  %v567_v54 = vadd.f32 1.0, %v1827_v52  ;;  %1848 = vpow2.f32 %v1561_v50  ;;  %v399_v55 = vpop.f32.mrb[8].mxu0  ;;  %v1569_v2 = vmul.f32 -1.442695, %v2322_v38 }
 0x225   :  { %v452_v56 = vpop.f32.mrb[8].mxu1  ;;  %v1831_v57 = vpop.eup %1830  ;;  %v569_v58 = vadd.f32 1.0, %v1829_v53  ;;  %1850 = vpow2.f32 %v1566_v51  ;;  %v2326_v45 = vadd.f32 %v399_v55, %v2309_v26 }
 0x226   :  { %v401_v60 = vpop.f32.mrb[9].mxu0  ;;  %v454_v61 = vpop.f32.mrb[9].mxu1  ;;  %1852 = vrcp.f32 %v567_v54  ;;  %v568_v63 = vadd.f32 1.0, %v1831_v57  ;;  %v2331_v51 = vadd.f32 %v452_v56, %v2312_v30 }
 0x227   :  { %v1833_v62 = vpop.eup %1832  ;;  %v403_v4 = vpop.f32.mrb[10].mxu0  ;;  %1854 = vrcp.f32 %v569_v58  ;;  %v2334_v9 = vadd.f32 %v401_v60, %v2315_v31  ;;  %v2341_v55 = vadd.f32 %v454_v61, %v2318_v33 }
 0x228   :  { %v456_v5 = vpop.f32.mrb[10].mxu1  ;;  %v1835_v6 = vpop.eup %1834  ;;  %v570_v10 = vadd.f32 1.0, %v1833_v62  ;;  %1856 = vrcp.f32 %v568_v63  ;;  %v2344_v57 = vadd.f32 %v403_v4, %v2309_v26 }
 0x229   :  { %v405_v15 = vpop.f32.mrb[11].mxu0  ;;  %v1837_v16 = vpop.eup %1836  ;;  %v575_v19 = vadd.f32 1.0, %v1835_v6  ;;  %v2351_v62 = vadd.f32 %v456_v5, %v2312_v30  ;;  %v1546_v6 = vmul.f32 -1.442695, %v2326_v45  ;;  %v1547_v5 = vmul.f32 -1.442695, %v2334_v9 }
 0x22a   :  { %v458_v22 = vpop.f32.mrb[11].mxu1  ;;  %v1839_v23 = vpop.eup %1838  ;;  %1858 = vrcp.f32 %v570_v10  ;;  %v577_v24 = vadd.f32 1.0, %v1837_v16  ;;  %v2354_v63 = vadd.f32 %v405_v15, %v2315_v31  ;;  %v1548_v10 = vmul.f32 -1.442695, %v2331_v51 }
 0x22b   :  { %v1841_v27 = vpop.eup %1840  ;;  %1860 = vrcp.f32 %v575_v19  ;;  %v576_v0 = vadd.f32 1.0, %v1839_v23  ;;  %v1549_v16 = vmul.f32 -1.442695, %v2341_v55  ;;  %v2364_v15 = vadd.f32 %v458_v22, %v2318_v33 }
 0x22c   :  { %v1843_v7 = vpop.eup %1842  ;;  %1862 = vrcp.f32 %v577_v24  ;;  %v578_v32 = vadd.f32 1.0, %v1841_v27  ;;  %v409_v39 = vpop.f32.mrb[12].mxu0  ;;  %v1554_v23 = vmul.f32 -1.442695, %v2344_v57  ;;  %v1556_v24 = vmul.f32 -1.442695, %v2351_v62 }
 0x22d   :  { %v1845_v8 = vpop.eup %1844  ;;  %1864 = vrcp.f32 %v576_v0  ;;  %v583_v34 = vadd.f32 1.0, %v1843_v7  ;;  %v462_v47 = vpop.f32.mrb[12].mxu1  ;;  %v1555_v27 = vmul.f32 -1.442695, %v2354_v63 }
 0x22e   :  { %v1847_v42 = vpop.eup %1846  ;;  %1866 = vrcp.f32 %v578_v32  ;;  %v585_v43 = vadd.f32 1.0, %v1845_v8  ;;  %v2328_v3 = vpop.f32.mrb[13].mxu0  ;;  %v2372_v8 = vadd.f32 %v409_v39, %v2309_v26 }
 0x22f   :  { %v1849_v49 = vpop.eup %1848  ;;  %1868 = vrcp.f32 %v583_v34  ;;  %v584_v50 = vadd.f32 1.0, %v1847_v42  ;;  %v2336_v48 = vpop.f32.mrb[13].mxu1  ;;  %v2377_v42 = vadd.f32 %v462_v47, %v2312_v30 }
 0x230   :  { %v2338_v52 = vpop.f32.mrb[14].mxu0  ;;  %v1851_v53 = vpop.eup %1850  ;;  %1870 = vrcp.f32 %v585_v43  ;;  %v586_v54 = vadd.f32 1.0, %v1849_v49 }
 0x231   :  { %v2346_v58 = vpop.f32.mrb[14].mxu1  ;;  %v2348_v56 = vpop.f32.mrb[15].mxu0  ;;  %1872 = vrcp.f32 %v584_v50  ;;  %v591_v60 = vadd.f32 1.0, %v1851_v53 }
 0x232   :  { %v1853_v59 = vpop.eup %1852  ;;  %v2356_v1 = vpop.f32.mrb[15].mxu1  ;;  %1874 = vrcp.f32 %v586_v54 }
 0x233   :  { %v1855_v61 = vpop.eup %1854  ;;  %1876 = vrcp.f32 %v591_v60  ;;  %v663_v7 = vmul.f32 %v1853_v59, %v2250_v12  ;;  %v1790_v59 = vld [vmem:[%s2603_s5 + $0x148] sm:$0xff]  }
 0x234   :  { %v1857_v4 = vpop.eup %1856  ;;  %1878 = vpow2.f32 %v1568_v35  ;;  %v665_v22 = vmul.f32 %v1855_v61, %v2253_v14  ;;  %v1564_v61 = vmul.f32 -1.442695, %v2377_v42 }
 0x235   :  { %v1859_v11 = vpop.eup %1858  ;;  %1880 = vpow2.f32 %v1567_v44  ;;  %v664_v44 = vmul.f32 %v1857_v4, %v2256_v17  ;;  %v1788_v17 = vld [vmem:[%s2603_s5 + $0x100] sm:$0xff]  }
 0x236   :  { %v1861_v19 = vpop.eup %1860  ;;  %1882 = vpow2.f32 %v1569_v2  ;;  %v666_v39 = vmul.f32 %v1859_v11, %v2259_v18  ;;  %v1791_v2 = vld [vmem:[%s2603_s5 + $0x1c8] sm:$0xff]  }
 0x237   :  { %v1863_v0 = vpop.eup %1862  ;;  %v671_v32 = vmul.f32 %v1861_v19, %v2263_v13  ;;  %1884 = vpow2.f32 %v1546_v6 }
 0x238   :  { %v1865_v34 = vpop.eup %1864  ;;  %v673_v35 = vmul.f32 %v1863_v0, %v2266_v21  ;;  %1886 = vpow2.f32 %v1548_v10  ;;  %v1557_v21 = vmul.f32 -1.442695, %v2364_v15 }
 0x239   :  { %v1867_v43 = vpop.eup %1866  ;;  %v695_v49 = vpack.c.bf16 %v671_v32, %v663_v7  ;;  %v672_v12 = vmul.f32 %v1865_v34, %v2271_v28  ;;  %1888 = vpow2.f32 %v1547_v5  ;;  %v1562_v28 = vmul.f32 -1.442695, %v2372_v8  ;;  %v1792_v5 = vld [vmem:[%s2603_s5 + $0x108] sm:$0xff]  }
 0x23a   :  { %v1869_v13 = vpop.eup %1868  ;;  %v697_v50 = vpack.c.bf16 %v673_v35, %v665_v22  ;;  %v674_v53 = vmul.f32 %v1867_v43, %v2274_v29  ;;  %1890 = vpow2.f32 %v1549_v16  ;;  %v1789_v29 = vld [vmem:[%s2603_s5 + $0x180] sm:$0xff]   ;;  %v1796_v35 = vld [vmem:[%s2603_s5 + $0x110] sm:$0xff]  }
 0x23b   :  { %v2383_v14 = vpop.eup %1870  ;;  %v696_v47 = vpack.c.bf16 %v672_v12, %v664_v44  ;;  %1892 = vpow2.f32 %v1554_v23  ;;  %v2405_v10 = vmul.f32 %v1869_v13, %v2280_v36  ;;  %v1793_v36 = vld [vmem:[%s2603_s5 + $0x188] sm:$0xff]   ;;  %v1798_v12 = vld [vmem:[%s2603_s5 + $0x158] sm:$0xff]  }
 0x23c   :  { %v2389_v54 = vpop.eup %1872  ;;  %v698_v18 = vpack.c.bf16 %v674_v53, %v666_v39  ;;  %1894 = vpow2.f32 %v1556_v24 }
 0x23d   :  { %v2398_v60 = vpop.eup %1874  ;;  %1262 = vmatprep.mubr.bf16.mxu0 %v696_v47  ;;  %1896 = vpow2.f32 %v1555_v27  ;;  %v1795_v27 = vld [vmem:[%s2603_s5 + $0x1d0] sm:$0xff]  }
 0x23e   :  { %v1877_v4 = vpop.eup %1876  ;;  %1311 = vmatprep.mubr.bf16.mxu1 %v698_v18  ;;  %1263 = vmatmul.mubr.bf16.vlgmr.msra.gmra.mrb[16].mxu0 %v695_v49  ;;  %1898 = vpow2.f32 %v1557_v21  ;;  %v1797_v49 = vld [vmem:[%s2603_s5 + $0x190] sm:$0xff]   ;;  %v1800_v18 = vld [vmem:[%s2603_s5 + $0x118] sm:$0xff]  }
 0x23f   :  { %v1879_v6 = vpop.eup %1878  ;;  %v2408_v11 = vmul.f32 %v1877_v4, %v2293_v46  ;;  %1312 = vmatmul.mubr.bf16.vlgmr.msra.gmra.mrb[16].mxu1 %v697_v50  ;;  %1698 = vmatpush3.bf16.msra.mxu0 %v1788_v17  ;;  %1900 = vpow2.f32 %v1562_v28  ;;  %v1794_v46 = vld [vmem:[%s2603_s5 + $0x150] sm:$0xff]   ;;  %v1799_v50 = vld [vmem:[%s2603_s5 + $0x1d8] sm:$0xff]   ;;  %v2438_v28 = vadd.f32 %v2328_v3, %v2315_v31  ;;  %v1802_v3 = vld [vmem:[%s2603_s5 + $0x160] sm:$0xff]  }
 0x240   :  { %v1881_v16 = vpop.eup %1880  ;;  %v593_v19 = vadd.f32 1.0, %v1879_v6  ;;  %1726 = vmatpush3.bf16.msra.mxu1 %v1789_v29  ;;  %1699 = vmatprep.subr.bf16.mxu0 %v1790_v59  ;;  %1902 = vpow2.f32 %v1564_v61  ;;  %v2445_v61 = vadd.f32 %v2336_v48, %v2318_v33  ;;  %v1803_v48 = vld [vmem:[%s2603_s5 + $0x1e0] sm:$0xff]  }
 0x241   :  { %v1883_v23 = vpop.eup %1882  ;;  %v592_v24 = vadd.f32 1.0, %v1881_v16  ;;  %1727 = vmatprep.subr.bf16.mxu1 %v1791_v2  ;;  %v703_v0 = vpack.c.bf16 %v2408_v11, %v2405_v10  ;;  %v1801_v2 = vld [vmem:[%s2603_s5 + $0x198] sm:$0xff]  }
 0x242   :  { %v1885_v7 = vpop.eup %1884  ;;  %1904 = vrcp.f32 %v593_v19  ;;  %v594_v32 = vadd.f32 1.0, %v1883_v23 }
 0x243   :  { %v1887_v34 = vpop.eup %1886  ;;  %1906 = vrcp.f32 %v592_v24  ;;  %v571_v22 = vadd.f32 1.0, %v1885_v7  ;;  %1700 = vmatpush3.bf16.msra.mxu0 %v1792_v5  ;;  %v2455_v5 = vadd.f32 %v2338_v52, %v2309_v26  ;;  %v1563_v26 = vmul.f32 -1.442695, %v2438_v28  ;;  %v1804_v52 = vld [vmem:[%s2603_s5 + $0x120] sm:$0xff]  }
 0x244   :  { %v1889_v43 = vpop.eup %1888  ;;  %1908 = vrcp.f32 %v594_v32  ;;  %v573_v44 = vadd.f32 1.0, %v1887_v34  ;;  %1728 = vmatpush3.bf16.msra.mxu1 %v1793_v36  ;;  %1701 = vmatprep.subr.bf16.mxu0 %v1794_v46  ;;  %v2464_v36 = vadd.f32 %v2346_v58, %v2312_v30  ;;  %v2468_v46 = vadd.f32 %v2348_v56, %v2315_v31  ;;  %v1805_v31 = vld [vmem:[%s2603_s5 + $0x1a0] sm:$0xff]   ;;  %v1806_v58 = vld [vmem:[%s2603_s5 + $0x168] sm:$0xff]  }
 0x245   :  { %v1891_v13 = vpop.eup %1890  ;;  %1910 = vrcp.f32 %v571_v22  ;;  %v572_v39 = vadd.f32 1.0, %v1889_v43  ;;  %1729 = vmatprep.subr.bf16.mxu1 %v1795_v27  ;;  %v1565_v27 = vmul.f32 -1.442695, %v2445_v61  ;;  %v2479_v30 = vadd.f32 %v2356_v1, %v2318_v33  ;;  %v1807_v33 = vld [vmem:[%s2603_s5 + $0x1e8] sm:$0xff]  }
 0x246   :  { %v1893_v53 = vpop.eup %1892  ;;  %1912 = vrcp.f32 %v573_v44  ;;  %v574_v21 = vadd.f32 1.0, %v1891_v13  ;;  %v681_v7 = vmul.f32 %v2383_v14, %v2283_v37  ;;  %v1570_v34 = vmul.f32 -1.442695, %v2455_v5 }
 0x247   :  { %v1895_v47 = vpop.eup %1894  ;;  %1914 = vrcp.f32 %v572_v39  ;;  %v579_v17 = vadd.f32 1.0, %v1893_v53  ;;  %1702 = vmatpush3.bf16.msra.mxu0 %v1796_v35  ;;  %v680_v22 = vmul.f32 %v2389_v54, %v2286_v40  ;;  %v1572_v43 = vmul.f32 -1.442695, %v2464_v36 }
 0x248   :  { %v1897_v29 = vpop.eup %1896  ;;  %1916 = vrcp.f32 %v574_v21  ;;  %v581_v59 = vadd.f32 1.0, %v1895_v47  ;;  %1730 = vmatpush3.bf16.msra.mxu1 %v1797_v49  ;;  %1703 = vmatprep.subr.bf16.mxu0 %v1798_v12  ;;  %v1571_v44 = vmul.f32 -1.442695, %v2468_v46  ;;  %v1573_v13 = vmul.f32 -1.442695, %v2479_v30 }
 0x249   :  { %v1899_v4 = vpop.eup %1898  ;;  %1918 = vrcp.f32 %v579_v17  ;;  %v580_v6 = vadd.f32 1.0, %v1897_v29  ;;  %1731 = vmatprep.subr.bf16.mxu1 %v1799_v50  ;;  %v1811_v50 = vld [vmem:[%s2603_s5 + $0x1f0] sm:$0xff]  }
 0x24a   :  { %v2460_v16 = vpop.eup %1900  ;;  %1920 = vrcp.f32 %v581_v59  ;;  %v582_v19 = vadd.f32 1.0, %v1899_v4 }
 0x24b   :  { %v2470_v23 = vpop.eup %1902  ;;  %1922 = vrcp.f32 %v580_v6  ;;  %1704 = vmatpush3.bf16.msra.mxu0 %v1800_v18  ;;  %v1812_v18 = vld [vmem:[%s2603_s5 + $0x130] sm:$0xff]  }
 0x24c   :  { %v1905_v24 = vpop.eup %1904  ;;  %1924 = vrcp.f32 %v582_v19  ;;  %1732 = vmatpush3.bf16.msra.mxu1 %v1801_v2  ;;  %1705 = vmatprep.subr.bf16.mxu0 %v1802_v3  ;;  %v589_v19 = vadd.f32 1.0, %v2470_v23 }
 0x24d   :  { %v1907_v56 = vpop.eup %1906  ;;  %v689_v32 = vmul.f32 %v1905_v24, %v2303_v20  ;;  %1733 = vmatprep.subr.bf16.mxu1 %v1803_v48  ;;  %v682_v20 = vmul.f32 %v2398_v60, %v2289_v41  ;;  %1926 = vpow2.f32 %v1563_v26  ;;  %v1809_v41 = vld [vmem:[%s2603_s5 + $0x1a8] sm:$0xff]  }
 0x24e   :  { %v1909_v1 = vpop.eup %1908  ;;  %v688_v35 = vmul.f32 %v1907_v56, %v2306_v25  ;;  %1928 = vpow2.f32 %v1565_v27  ;;  %v1808_v25 = vld [vmem:[%s2603_s5 + $0x128] sm:$0xff]  }
 0x24f   :  { %v1911_v37 = vpop.eup %1910  ;;  %v690_v14 = vmul.f32 %v1909_v1, %v2322_v38  ;;  %v705_v49 = vpack.c.bf16 %v689_v32, %v681_v7  ;;  %1706 = vmatpush3.bf16.msra.mxu0 %v1804_v52  ;;  %1930 = vpow2.f32 %v1570_v34  ;;  %v1810_v38 = vld [vmem:[%s2603_s5 + $0x170] sm:$0xff]   ;;  %v1817_v52 = vld [vmem:[%s2603_s5 + $0x1b8] sm:$0xff]  }
 0x250   :  { %v1913_v12 = vpop.eup %1912  ;;  %v704_v40 = vpack.c.bf16 %v688_v35, %v680_v22  ;;  %1734 = vmatpush3.bf16.msra.mxu1 %v1805_v31  ;;  %1707 = vmatprep.subr.bf16.mxu0 %v1806_v58  ;;  %1932 = vpow2.f32 %v1572_v43  ;;  %v667_v47 = vmul.f32 %v1911_v37, %v2326_v45  ;;  %v1813_v45 = vld [vmem:[%s2603_s5 + $0x1b0] sm:$0xff]  }
 0x251   :  { %v1915_v54 = vpop.eup %1914  ;;  %v706_v39 = vpack.c.bf16 %v690_v14, %v682_v20  ;;  %1735 = vmatprep.subr.bf16.mxu1 %v1807_v33  ;;  %1934 = vpow2.f32 %v1571_v44  ;;  %v669_v59 = vmul.f32 %v1913_v12, %v2331_v51  ;;  %v587_v51 = vadd.f32 1.0, %v2460_v16 }
 0x252   :  { %v1917_v60 = vpop.eup %1916  ;;  %1270 = vmatprep.mubr.bf16.mxu0 %v704_v40  ;;  %1936 = vpow2.f32 %v1573_v13  ;;  %v668_v11 = vmul.f32 %v1915_v54, %v2334_v9  ;;  %v1816_v9 = vld [vmem:[%s2603_s5 + $0x138] sm:$0xff]  }
 0x253   :  { %v1919_v53 = vpop.eup %1918  ;;  %1319 = vmatprep.mubr.bf16.mxu1 %v706_v39  ;;  %1271 = vmatmul.mubr.bf16.gmra.mrb[20].mxu0 %v703_v0  ;;  %v670_v4 = vmul.f32 %v1917_v60, %v2341_v55  ;;  %1938 = vrcp.f32 %v587_v51 }
 0x254   :  { %v1921_v21 = vpop.eup %1920  ;;  %v675_v17 = vmul.f32 %v1919_v53, %v2344_v57  ;;  %1320 = vmatmul.mubr.bf16.gmra.mrb[20].mxu1 %v705_v49  ;;  %1708 = vmatpush3.bf16.msra.mxu0 %v1808_v25  ;;  %v1814_v57 = vld [vmem:[%s2603_s5 + $0x178] sm:$0xff]   ;;  %1940 = vrcp.f32 %v589_v19 }
 0x255   :  { %v1923_v29 = vpop.eup %1922  ;;  %v677_v2 = vmul.f32 %v1921_v21, %v2351_v62  ;;  %1736 = vmatpush3.bf16.msra.mxu1 %v1809_v41  ;;  %1709 = vmatprep.subr.bf16.mxu0 %v1810_v38  ;;  %v1815_v62 = vld [vmem:[%s2603_s5 + $0x1f8] sm:$0xff]  }
 0x256   :  { %v1925_v10 = vpop.eup %1924  ;;  %v699_v0 = vpack.c.bf16 %v675_v17, %v667_v47  ;;  %v676_v3 = vmul.f32 %v1923_v29, %v2354_v63  ;;  %1737 = vmatprep.subr.bf16.mxu1 %v1811_v50 }
 0x257   :  { %v701_v6 = vpack.c.bf16 %v677_v2, %v669_v59  ;;  %v678_v48 = vmul.f32 %v1925_v10, %v2364_v15  ;;  %v1927_v63 = vpop.eup %1926 }
 0x258   :  { %v700_v26 = vpack.c.bf16 %v676_v3, %v668_v11  ;;  %1710 = vmatpush3.bf16.msra.mxu0 %v1812_v18  ;;  %v1929_v55 = vpop.eup %1928  ;;  %v588_v24 = vadd.f32 1.0, %v1927_v63 }
 0x259   :  { %v702_v16 = vpack.c.bf16 %v678_v48, %v670_v4  ;;  %1738 = vmatpush3.bf16.msra.mxu1 %v1813_v45  ;;  %1711 = vmatprep.subr.bf16.mxu0 %v1814_v57  ;;  %v1931_v15 = vpop.eup %1930  ;;  %v590_v23 = vadd.f32 1.0, %v1929_v55 }
 0x25a   :  { %1360 = vmatprep.mubr.bf16.mxu0 %v700_v26  ;;  %1739 = vmatprep.subr.bf16.mxu1 %v1815_v62  ;;  %v1933_v27 = vpop.eup %1932  ;;  %1942 = vrcp.f32 %v588_v24  ;;  %v595_v31 = vadd.f32 1.0, %v1931_v15 }
 0x25b   :  { %1409 = vmatprep.mubr.bf16.mxu1 %v702_v16  ;;  %v1935_v58 = vpop.eup %1934  ;;  %1944 = vrcp.f32 %v590_v23  ;;  %v597_v56 = vadd.f32 1.0, %v1933_v27 }
 0x25c   :  { %1712 = vmatpush3.bf16.msra.mxu0 %v1816_v9  ;;  %v1937_v7 = vpop.eup %1936  ;;  %1946 = vrcp.f32 %v595_v31  ;;  %v596_v32 = vadd.f32 1.0, %v1935_v58 }
 0x25d   :  { %1740 = vmatpush3.bf16.msra.mxu1 %v1817_v52  ;;  %1948 = vrcp.f32 %v597_v56  ;;  %v598_v34 = vadd.f32 1.0, %v1937_v7  ;;  %v1939_v33 = vpop.eup %1938 }
 0x25e   :  { %1950 = vrcp.f32 %v596_v32  ;;  %v1941_v1 = vpop.eup %1940  ;;  %v683_v37 = vmul.f32 %v1939_v33, %v2372_v8 }
 0x25f   :  { %1361 = vmatmul.mubr.bf16.vlgmr.msra.gmra.mrb[24].mxu0 %v699_v0  ;;  %1952 = vrcp.f32 %v598_v34  ;;  %v685_v49 = vmul.f32 %v1941_v1, %v2377_v42 }
 0x260   :  { %1410 = vmatmul.mubr.bf16.vlgmr.msra.gmra.mrb[24].mxu1 %v701_v6 }
 0x264   :  { %v1943_v22 = vpop.eup %1942 }
 0x265   :  { %v1945_v35 = vpop.eup %1944  ;;  %v684_v40 = vmul.f32 %v1943_v22, %v2438_v28  ;;  %v1574_v28 = vld [vmem:[%s2605_s6] ss:$0 sm:$0xff] }
 0x266   :  { %v1947_v43 = vpop.eup %1946  ;;  %v686_v39 = vmul.f32 %v1945_v35, %v2445_v61 }
 0x267   :  { %v1949_v44 = vpop.eup %1948  ;;  %v691_v20 = vmul.f32 %v1947_v43, %v2455_v5 }
 0x268   :  { %v1951_v14 = vpop.eup %1950  ;;  %v693_v12 = vmul.f32 %v1949_v44, %v2464_v36 }
 0x269   :  { %v1953_v13 = vpop.eup %1952  ;;  %v692_v25 = vmul.f32 %v1951_v14, %v2468_v46  ;;  %v707_v54 = vpack.c.bf16 %v691_v20, %v683_v37  ;;  %v1962_v20 = vld [vmem:[%s2599_s0] sm:$0xff] }
 0x26a   :  { %v694_v41 = vmul.f32 %v1953_v13, %v2479_v30  ;;  %v709_v38 = vpack.c.bf16 %v693_v12, %v685_v49  ;;  %v1963_v12 = vld [vmem:[%s2599_s0 + $0x8] sm:$0xff] }
 0x26b   :  { %v708_v60 = vpack.c.bf16 %v692_v25, %v684_v40 }
 0x26c   :  { %v710_v8 = vpack.c.bf16 %v694_v41, %v686_v39 }
 0x26d   :  { %1368 = vmatprep.mubr.bf16.mxu0 %v708_v60 }
 0x26e   :  { %1417 = vmatprep.mubr.bf16.mxu1 %v710_v8  ;;  %1369 = vmatmul.mubr.bf16.gmra.mrb[28].mxu0 %v707_v54 }
 0x26f   :  { %1418 = vmatmul.mubr.bf16.gmra.mrb[28].mxu1 %v709_v38 }
 0x311   :  { %v1657_v42 = vpop.f32.mrb[16].mxu0 }
 0x312   :  { %v1685_v5 = vpop.f32.mrb[16].mxu1  ;;  %v1658_v36 = vpop.f32.mrb[17].mxu0 }
 0x313   :  { %v1659_v46 = vadd.f32 %v1658_v36, %v1657_v42  ;;  %v1686_v50 = vpop.f32.mrb[17].mxu1  ;;  %v1660_v53 = vpop.f32.mrb[18].mxu0 }
 0x314   :  { %v1687_v61 = vadd.f32 %v1686_v50, %v1685_v5  ;;  %v1688_v21 = vpop.f32.mrb[18].mxu1  ;;  %v1661_v30 = vpop.f32.mrb[19].mxu0 }
 0x315   :  { %v1265_v47 = vadd.f32 %v1659_v46, %v1574_v28  ;;  %v1662_v17 = vadd.f32 %v1661_v30, %v1660_v53  ;;  %v1689_v18 = vpop.f32.mrb[19].mxu1 }
 0x316   :  { %v1690_v29 = vadd.f32 %v1689_v18, %v1688_v21 }
 0x317   :  { %v1314_v59 = vadd.f32 %v1687_v61, %v1265_v47  ;;  %v1268_v2 = vadd.f32 %v1662_v17, %v1574_v28  ;;  %v1964_v17 = vld [vmem:[%s2599_s0 + $0x10] sm:$0xff] }
 0x319   :  { %v1317_v45 = vadd.f32 %v1690_v29, %v1268_v2 }
 0x326   :  { %v1663_v57 = vpop.f32.mrb[20].mxu0 }
 0x327   :  { %v1691_v10 = vpop.f32.mrb[20].mxu1  ;;  %v1664_v11 = vpop.f32.mrb[21].mxu0 }
 0x328   :  { %v1665_v0 = vadd.f32 %v1664_v11, %v1663_v57  ;;  %v1692_v3 = vpop.f32.mrb[21].mxu1  ;;  %v1666_v51 = vpop.f32.mrb[22].mxu0 }
 0x329   :  { %v1693_v62 = vadd.f32 %v1692_v3, %v1691_v10  ;;  %v1694_v4 = vpop.f32.mrb[22].mxu1  ;;  %v1667_v6 = vpop.f32.mrb[23].mxu0 }
 0x32a   :  { %v1273_v48 = vadd.f32 %v1665_v0, %v1574_v28  ;;  %v1668_v19 = vadd.f32 %v1667_v6, %v1666_v51  ;;  %v1695_v26 = vpop.f32.mrb[23].mxu1 }
 0x32b   :  { %v1696_v9 = vadd.f32 %v1695_v26, %v1694_v4 }
 0x32c   :  { %v1322_v63 = vadd.f32 %v1693_v62, %v1273_v48  ;;  %v1276_v16 = vadd.f32 %v1668_v19, %v1574_v28 }
 0x32e   :  { %v1325_v52 = vadd.f32 %v1696_v9, %v1276_v16 }
 0x332   :  { %v1713_v55 = vpop.f32.mrb[24].mxu0 }
 0x333   :  { %v1741_v24 = vpop.f32.mrb[24].mxu1  ;;  %v1714_v15 = vpop.f32.mrb[25].mxu0 }
 0x334   :  { %v1715_v23 = vadd.f32 %v1714_v15, %v1713_v55  ;;  %v1742_v27 = vpop.f32.mrb[25].mxu1  ;;  %v1716_v31 = vpop.f32.mrb[26].mxu0 }
 0x335   :  { %v1743_v58 = vadd.f32 %v1742_v27, %v1741_v24  ;;  %v1744_v56 = vpop.f32.mrb[26].mxu1  ;;  %v1717_v7 = vpop.f32.mrb[27].mxu0 }
 0x336   :  { %v1363_v32 = vadd.f32 %v1715_v23, %v1314_v59  ;;  %v1718_v34 = vadd.f32 %v1717_v7, %v1716_v31  ;;  %v1745_v33 = vpop.f32.mrb[27].mxu1  ;;  %v1965_v59 = vld [vmem:[%s2599_s0 + $0x18] sm:$0xff] }
 0x337   :  { %v1746_v1 = vadd.f32 %v1745_v33, %v1744_v56  ;;  %v1639_v33 = vld [vmem:[%s2606_s7] ss:$0 sm:$0xff] }
 0x338   :  { %v1412_v22 = vadd.f32 %v1743_v58, %v1363_v32  ;;  %v1366_v35 = vadd.f32 %v1718_v34, %v1317_v45 }
 0x33a   :  { %v1426_v43 = vmul.f32 0.5, %v1412_v22  ;;  %v1415_v44 = vadd.f32 %v1746_v1, %v1366_v35  ;;  %v1640_v35 = vld [vmem:[%s2607_s8] ss:$0 sm:$0xff] }
 0x33c   :  { %v1427_v37 = vmul.f32 0.5, %v1415_v44  ;;  %v1430_v14 = vadd.f32 %v1962_v20, %v1426_v43 }
 0x33e   :  { %v1436_v49 = vsel %vm39_vm0, %v1430_v14, 0.0  ;;  %v1431_v13 = vadd.f32 %v1963_v12, %v1427_v37 }
 0x33f   :  { %1437 = vadd.xlane.f32.xlu0 %v1436_v49 }
 0x340   :  { %v1439_v40 = vsel %vm39_vm0, %v1431_v13, 0.0 }
 0x341   :  { %1440 = vadd.xlane.f32.xlu1 %v1439_v40  ;;  %v1719_v25 = vpop.f32.mrb[28].mxu0 }
 0x342   :  { %v1747_v54 = vpop.f32.mrb[28].mxu1  ;;  %v1720_v39 = vpop.f32.mrb[29].mxu0 }
 0x343   :  { %v1721_v41 = vadd.f32 %v1720_v39, %v1719_v25  ;;  %v1748_v38 = vpop.f32.mrb[29].mxu1  ;;  %v1722_v60 = vpop.f32.mrb[30].mxu0 }
 0x344   :  { %v1749_v8 = vadd.f32 %v1748_v38, %v1747_v54  ;;  %v1750_v42 = vpop.f32.mrb[30].mxu1  ;;  %v1723_v5 = vpop.f32.mrb[31].mxu0 }
 0x345   :  { %v1371_v28 = vadd.f32 %v1721_v41, %v1322_v63  ;;  %v1724_v36 = vadd.f32 %v1723_v5, %v1722_v60  ;;  %v1751_v46 = vpop.f32.mrb[31].mxu1 }
 0x346   :  { %v1752_v50 = vadd.f32 %v1751_v46, %v1750_v42 }
 0x347   :  { %v1420_v53 = vadd.f32 %v1749_v8, %v1371_v28  ;;  %v1374_v61 = vadd.f32 %v1724_v36, %v1325_v52 }
 0x349   :  { %v1428_v21 = vmul.f32 0.5, %v1420_v53  ;;  %v1423_v30 = vadd.f32 %v1752_v50, %v1374_v61 }
 0x34b   :  { %v1429_v47 = vmul.f32 0.5, %v1423_v30  ;;  %v1432_v18 = vadd.f32 %v1964_v17, %v1428_v21 }
 0x34d   :  { %v1442_v29 = vsel %vm39_vm0, %v1432_v18, 0.0  ;;  %v1433_v2 = vadd.f32 %v1965_v59, %v1429_v47 }
 0x34e   :  { %1443 = vadd.xlane.f32.xlu0 %v1442_v29 }
 0x34f   :  { %v1445_v45 = vsel %vm39_vm0, %v1433_v2, 0.0 }
 0x350   :  { %1446 = vadd.xlane.f32.xlu1 %v1445_v45 }
 0x3cc   :  { %v1438_v57 = vpop.xlane.xlu0 %1437 }
 0x3cd   :  { %v1448_v10 = vmul.f32 0.03125, %v1438_v57 }
 0x3ce   :  { %v1441_v11 = vpop.xlane.xlu1 %1440 }
 0x3cf   :  { %v1452_v0 = vsub.f32 %v1430_v14, %v1448_v10  ;;  %v1449_v3 = vmul.f32 0.03125, %v1441_v11 }
 0x3d1   :  { %v1453_v51 = vsub.f32 %v1431_v13, %v1449_v3  ;;  %v1456_v62 = vmul.f32 %v1452_v0, %v1452_v0 }
 0x3d3   :  { %v1460_v4 = vsel %vm39_vm0, %v1456_v62, 0.0  ;;  %v1457_v6 = vmul.f32 %v1453_v51, %v1453_v51 }
 0x3d4   :  { %1461 = vadd.xlane.f32.xlu0 %v1460_v4 }
 0x3d5   :  { %v1463_v48 = vsel %vm39_vm0, %v1457_v6, 0.0 }
 0x3d6   :  { %1464 = vadd.xlane.f32.xlu1 %v1463_v48 }
 0x3db   :  { %v1444_v19 = vpop.xlane.xlu0 %1443 }
 0x3dc   :  { %v1450_v26 = vmul.f32 0.03125, %v1444_v19 }
 0x3dd   :  { %v1447_v9 = vpop.xlane.xlu1 %1446 }
 0x3de   :  { %v1454_v63 = vsub.f32 %v1432_v18, %v1450_v26  ;;  %v1451_v16 = vmul.f32 0.03125, %v1447_v9 }
 0x3e0   :  { %v1455_v52 = vsub.f32 %v1433_v2, %v1451_v16  ;;  %v1458_v55 = vmul.f32 %v1454_v63, %v1454_v63 }
 0x3e2   :  { %v1466_v24 = vsel %vm39_vm0, %v1458_v55, 0.0  ;;  %v1459_v15 = vmul.f32 %v1455_v52, %v1455_v52 }
 0x3e3   :  { %1467 = vadd.xlane.f32.xlu0 %v1466_v24 }
 0x3e4   :  { %v1469_v23 = vsel %vm39_vm0, %v1459_v15, 0.0 }
 0x3e5   :  { %1470 = vadd.xlane.f32.xlu1 %v1469_v23 }
 0x461   :  { %v1462_v27 = vpop.xlane.xlu0 %1461 }
 0x462   :  { %v1472_v31 = vmul.f32 0.03125, %v1462_v27 }
 0x463   :  { %v1465_v58 = vpop.xlane.xlu1 %1464 }
 0x464   :  { %v1476_v56 = vadd.f32 1e-05, %v1472_v31  ;;  %v1473_v7 = vmul.f32 0.03125, %v1465_v58 }
 0x466   :  { %1954 = vrsqrt.f32 %v1476_v56  ;;  %v1477_v32 = vadd.f32 1e-05, %v1473_v7 }
 0x468   :  { %1956 = vrsqrt.f32 %v1477_v32 }
 0x470   :  { %v1955_v34 = vpop.eup %1954  ;;  %v1468_v43 = vpop.xlane.xlu0 %1467 }
 0x471   :  { %v1484_v1 = vmul.f32 %v1955_v34, %v1452_v0  ;;  %v1474_v20 = vmul.f32 0.03125, %v1468_v43 }
 0x472   :  { %v1957_v22 = vpop.eup %1956  ;;  %v1471_v14 = vpop.xlane.xlu1 %1470 }
 0x473   :  { %v1494_v44 = vmul.f32 %v1639_v33, %v1484_v1  ;;  %v1485_v37 = vmul.f32 %v1957_v22, %v1453_v51  ;;  %v1478_v13 = vadd.f32 1e-05, %v1474_v20  ;;  %v1475_v40 = vmul.f32 0.03125, %v1471_v14 }
 0x475   :  { %v1504_v49 = vadd.f32 %v1640_v35, %v1494_v44  ;;  %v1495_v12 = vmul.f32 %v1639_v33, %v1485_v37  ;;  %1958 = vrsqrt.f32 %v1478_v13  ;;  %v1479_v54 = vadd.f32 1e-05, %v1475_v40 }
 0x477   :  { %1508 = vst.msk [vmem:[%s2608_s9] sm:$0xff] %vm39_vm0, %v1504_v49  ;;  %v1505_v25 = vadd.f32 %v1640_v35, %v1495_v12  ;;  %1960 = vrsqrt.f32 %v1479_v54 }
 0x479   :  { %1509 = vst.msk [vmem:[%s2608_s9 + $0x8] sm:$0xff] %vm39_vm0, %v1505_v25 }
 0x47f   :  { %v1959_v39 = vpop.eup %1958 }
 0x480   :  { %v1486_v41 = vmul.f32 %v1959_v39, %v1454_v63 }
 0x481   :  { %v1961_v38 = vpop.eup %1960 }
 0x482   :  { %v1496_v60 = vmul.f32 %v1639_v33, %v1486_v41  ;;  %v1487_v8 = vmul.f32 %v1961_v38, %v1455_v52 }
 0x484   :  { %v1506_v42 = vadd.f32 %v1640_v35, %v1496_v60  ;;  %v1497_v5 = vmul.f32 %v1639_v33, %v1487_v8 }
 0x486   :  { %1510 = vst.msk [vmem:[%s2608_s9 + $0x10] sm:$0xff] %vm39_vm0, %v1506_v42  ;;  %v1507_v28 = vadd.f32 %v1640_v35, %v1497_v5 }
 0x488   :  { %1511 = vst.msk [vmem:[%s2608_s9 + $0x18] sm:$0xff] %vm39_vm0, %v1507_v28 }

// kernel: _lambda_.24
= control target key start
LH: loop header
LB: loop body
LE: loop exit
PB: predicated region body
PF: predicated region fallthrough
CT: control target
= control target key end

     0   :  { %vm366_vm0 = vcmask 261120   ;;  %s615_s1 = inlined_call_operand.vmem [shape: bf16[512,32], index: 1, kind: input, shape index: {}]   ;;  %s616_s0 = inlined_call_operand.vmem [shape: f32[8,512], index: 0, kind: input, shape index: {}]   ;;  %s617_s2 = inlined_call_operand.vmem [shape: f32[1,32], index: 2, kind: input, shape index: {}]   ;;  %s618_s3 = inlined_call_operand.vmem [shape: f32[8,32], index: 3, kind: output, shape index: {}]  }
   0x1   :  { %v449_v0 = vld [vmem:[%s615_s1 + $0x40] sm:$0xff]   ;;  %v453_v4 = vld [vmem:[%s615_s1 + $0x48] sm:$0xff]   ;;  %v457_v8 = vld [vmem:[%s615_s1 + $0x50] sm:$0xff]  }
   0x2   :  { %v450_v1 = vld [vmem:[%s615_s1 + $0xc0] sm:$0xff]   ;;  %405 = vmatprep.subr.bf16.mxu0 %v449_v0  ;;  %v454_v5 = vld [vmem:[%s615_s1 + $0xc8] sm:$0xff]   ;;  %v458_v9 = vld [vmem:[%s615_s1 + $0xd0] sm:$0xff]  }
   0x3   :  { %v451_v2 = vld [vmem:[%s615_s1] sm:$0xff]   ;;  %427 = vmatprep.subr.bf16.mxu1 %v450_v1  ;;  %v455_v6 = vld [vmem:[%s615_s1 + $0x8] sm:$0xff]   ;;  %v459_v10 = vld [vmem:[%s615_s1 + $0x10] sm:$0xff]  }
   0x4   :  { %v452_v3 = vld [vmem:[%s615_s1 + $0x80] sm:$0xff]   ;;  %406 = vmatpush3.bf16.msra.mxu0 %v451_v2  ;;  %v456_v7 = vld [vmem:[%s615_s1 + $0x88] sm:$0xff]   ;;  %v460_v11 = vld [vmem:[%s615_s1 + $0x90] sm:$0xff]  }
   0x5   :  { %428 = vmatpush3.bf16.msra.mxu1 %v452_v3  ;;  %407 = vmatprep.subr.bf16.mxu0 %v453_v4  ;;  %v461_v12 = vld [vmem:[%s615_s1 + $0x58] sm:$0xff]   ;;  %v465_v16 = vld [vmem:[%s615_s1 + $0x60] sm:$0xff]   ;;  %v469_v20 = vld [vmem:[%s615_s1 + $0x68] sm:$0xff]  }
   0x6   :  { %429 = vmatprep.subr.bf16.mxu1 %v454_v5  ;;  %v462_v13 = vld [vmem:[%s615_s1 + $0xd8] sm:$0xff]   ;;  %v466_v17 = vld [vmem:[%s615_s1 + $0xe0] sm:$0xff]   ;;  %v470_v21 = vld [vmem:[%s615_s1 + $0xe8] sm:$0xff]  }
   0x7   :  { %v463_v14 = vld [vmem:[%s615_s1 + $0x18] sm:$0xff]   ;;  %v467_v18 = vld [vmem:[%s615_s1 + $0x20] sm:$0xff]   ;;  %v471_v22 = vld [vmem:[%s615_s1 + $0x28] sm:$0xff]  }
   0x8   :  { %408 = vmatpush3.bf16.msra.mxu0 %v455_v6  ;;  %v464_v15 = vld [vmem:[%s615_s1 + $0x98] sm:$0xff]   ;;  %v468_v19 = vld [vmem:[%s615_s1 + $0xa0] sm:$0xff]   ;;  %v472_v23 = vld [vmem:[%s615_s1 + $0xa8] sm:$0xff]  }
   0x9   :  { %430 = vmatpush3.bf16.msra.mxu1 %v456_v7  ;;  %409 = vmatprep.subr.bf16.mxu0 %v457_v8  ;;  %v473_v24 = vld [vmem:[%s615_s1 + $0x70] sm:$0xff]   ;;  %v477_v28 = vld [vmem:[%s615_s1 + $0x78] sm:$0xff]   ;;  %v16_v32 = vld [vmem:[%s616_s0 + $0x8] sm:$0xff] }
   0xa   :  { %431 = vmatprep.subr.bf16.mxu1 %v458_v9  ;;  %v474_v25 = vld [vmem:[%s615_s1 + $0xf0] sm:$0xff]   ;;  %v478_v29 = vld [vmem:[%s615_s1 + $0xf8] sm:$0xff]   ;;  %v15_v34 = vld [vmem:[%s616_s0] sm:$0xff]  ;;  %v20_v35 = vpack.c.bf16 %v16_v32, %v16_v32 }
   0xb   :  { %v475_v26 = vld [vmem:[%s615_s1 + $0x30] sm:$0xff]   ;;  %v479_v30 = vld [vmem:[%s615_s1 + $0x38] sm:$0xff]   ;;  %v19_v37 = vpack.c.bf16 %v15_v34, %v15_v34  ;;  %v372_v42 = vld [vmem:[%s617_s2] ss:$0 sm:$0xff] }
   0xc   :  { %410 = vmatpush3.bf16.msra.mxu0 %v459_v10  ;;  %v476_v27 = vld [vmem:[%s615_s1 + $0xb0] sm:$0xff]   ;;  %v480_v31 = vld [vmem:[%s615_s1 + $0xb8] sm:$0xff]   ;;  %318 = vmatprep.mubr.bf16.mxu0 %v20_v35 }
   0xd   :  { %432 = vmatpush3.bf16.msra.mxu1 %v460_v11  ;;  %411 = vmatprep.subr.bf16.mxu0 %v461_v12  ;;  %v18_v33 = vld [vmem:[%s616_s0 + $0x18] sm:$0xff]  ;;  %v17_v38 = vld [vmem:[%s616_s0 + $0x10] sm:$0xff] }
   0xe   :  { %433 = vmatprep.subr.bf16.mxu1 %v462_v13  ;;  %v22_v36 = vpack.c.bf16 %v18_v33, %v18_v33  ;;  %v21_v39 = vpack.c.bf16 %v17_v38, %v17_v38 }
  0x10   :  { %412 = vmatpush3.bf16.msra.mxu0 %v463_v14  ;;  %358 = vmatprep.mubr.bf16.mxu1 %v22_v36 }
  0x11   :  { %434 = vmatpush3.bf16.msra.mxu1 %v464_v15  ;;  %413 = vmatprep.subr.bf16.mxu0 %v465_v16 }
  0x12   :  { %435 = vmatprep.subr.bf16.mxu1 %v466_v17 }
  0x14   :  { %414 = vmatpush3.bf16.msra.mxu0 %v467_v18 }
  0x15   :  { %436 = vmatpush3.bf16.msra.mxu1 %v468_v19  ;;  %415 = vmatprep.subr.bf16.mxu0 %v469_v20 }
  0x16   :  { %437 = vmatprep.subr.bf16.mxu1 %v470_v21 }
  0x18   :  { %416 = vmatpush3.bf16.msra.mxu0 %v471_v22 }
  0x19   :  { %438 = vmatpush3.bf16.msra.mxu1 %v472_v23  ;;  %417 = vmatprep.subr.bf16.mxu0 %v473_v24 }
  0x1a   :  { %439 = vmatprep.subr.bf16.mxu1 %v474_v25 }
  0x1c   :  { %418 = vmatpush3.bf16.msra.mxu0 %v475_v26 }
  0x1d   :  { %440 = vmatpush3.bf16.msra.mxu1 %v476_v27  ;;  %419 = vmatprep.subr.bf16.mxu0 %v477_v28 }
  0x1e   :  { %441 = vmatprep.subr.bf16.mxu1 %v478_v29 }
  0x20   :  { %420 = vmatpush3.bf16.msra.mxu0 %v479_v30 }
  0x21   :  { %442 = vmatpush3.bf16.msra.mxu1 %v480_v31 }
  0x23   :  { %319 = vmatmul.mubr.bf16.vlgmr.msra.gmra.mrb[0].mxu0 %v19_v37 }
  0x24   :  { %359 = vmatmul.mubr.bf16.vlgmr.msra.gmra.mrb[0].mxu1 %v21_v39 }
  0xf6   :  { %v421_v40 = vpop.f32.mrb[0].mxu0 }
  0xf7   :  { %v443_v41 = vpop.f32.mrb[0].mxu1  ;;  %v422_v43 = vpop.f32.mrb[1].mxu0 }
  0xf8   :  { %v444_v44 = vpop.f32.mrb[1].mxu1  ;;  %v423_v45 = vadd.f32 %v422_v43, %v421_v40  ;;  %v424_v47 = vpop.f32.mrb[2].mxu0 }
  0xf9   :  { %v445_v46 = vadd.f32 %v444_v44, %v443_v41  ;;  %v446_v48 = vpop.f32.mrb[2].mxu1  ;;  %v425_v49 = vpop.f32.mrb[3].mxu0 }
  0xfa   :  { %v447_v50 = vpop.f32.mrb[3].mxu1  ;;  %v321_v51 = vadd.f32 %v423_v45, %v372_v42 }
  0xfc   :  { %v361_v52 = vadd.f32 %v445_v46, %v321_v51 }
  0xfe   :  { %367 = vst.msk [vmem:[%s618_s3] sm:$0xff] %vm366_vm0, %v361_v52 }

// kernel: _lambda_.29
= control target key start
LH: loop header
LB: loop body
LE: loop exit
PB: predicated region body
PF: predicated region fallthrough
CT: control target
= control target key end

     0   :  { %vm45_vm0 = vcmask 261120   ;;  %s224_s0 = inlined_call_operand.vmem [shape: f32[32,32], index: 0, kind: input, shape index: {}]   ;;  %s225_s1 = inlined_call_operand.vmem [shape: bf16[32,64], index: 1, kind: input, shape index: {}]   ;;  %s226_s2 = inlined_call_operand.vmem [shape: f32[1,64], index: 2, kind: input, shape index: {}]   ;;  %s227_s3 = inlined_call_operand.hbm [shape: f32[32,64], index: 3, kind: output, shape index: {}]  }
   0x1   :  { %v142_v0 = vld [vmem:[%s225_s1] sm:$0xff]   ;;  %v143_v1 = vld [vmem:[%s225_s1 + $0x8] sm:$0xff]   ;;  %v18_v5 = vld [vmem:[%s224_s0 + $0x10] sm:$0xff] }
   0x2   :  { %131 = vmatprep.subr.bf16.mxu0 %v142_v0  ;;  %v16_v2 = vld [vmem:[%s224_s0] sm:$0xff]  ;;  %v17_v3 = vld [vmem:[%s224_s0 + $0x8] sm:$0xff]  ;;  %v19_v6 = vld [vmem:[%s224_s0 + $0x18] sm:$0xff] }
   0x3   :  { %132 = vmatpush3.bf16.msra.mxu0 %v142_v0  ;;  %v20_v4 = vpack.c.bf16 %v17_v3, %v16_v2 }
   0x4   :  { %8 = vsyncpa [#allocation3], 0  ;;  %133 = vmatprep.subr.bf16.mxu0 %v143_v1  ;;  %v21_v7 = vpack.c.bf16 %v19_v6, %v18_v5  ;;  %v122_v8 = vld [vmem:[%s226_s2] ss:$0 sm:$0xff]  ;;  %vm101_vm1 = vcmask 523264   ;;  %s168_s25 = smov [#allocation2]  }
   0x5   :  { %135 = vmatprep.mubr.msk.bf16.mxu0 %vm45_vm0, %v20_v4  ;;  %s111_s26 = sshll.u32 %s168_s25, 4  ;;  %s112_s26 = int_to_ptr.vmem [resolvable:$true] %s111_s26 }
   0x6   :  { %s144_s0 = scalar_lea.vmem %s112_s26, 512  ;;  %p149_p1 = scmp.lt.s32.totalorder %s112_s26, %s112_s26 }
   0x7   :  { %134 = vmatpush3.bf16.msra.mxu0 %v143_v1  ;;  %p145_p0 = scmp.ne.s32.totalorder %s112_s26, %s144_s0  ;;  %p150_p2 = scmp.lt.s32.totalorder %s144_s0, %s144_s0 }
   0x9   :  { %p151_p3 = por %p150_p2, %p149_p1 }
   0xa   :  { %136 = vmatmul.mubr.msk.bf16.vlgmr.msra.gmra.mrb[0].mxu0 %vm45_vm0, %v21_v7 }
   0xb   :  { %p152_p4 = pnand %p151_p3, %p145_p0 }
  0xdd   :  { %v137_v9 = vpop.f32.mrb[0].mxu0 }
  0xde   :  { %v95_v10 = vadd.f32 %v137_v9, %v122_v8  ;;  %v86_v11 = vpop.f32.mrb[1].mxu0 }
  0xdf   :  { %v87_v12 = vadd.f32 %v122_v8, %v86_v11  ;;  %v138_v13 = vpop.f32.mrb[2].mxu0 }
  0xe0   :  { %104 = vst.msk [vmem:[#allocation2 + $0x10] sm:$0xff] %vm101_vm1, %v95_v10  ;;  %v98_v14 = vadd.f32 %v138_v13, %v122_v8  ;;  %v89_v15 = vpop.f32.mrb[3].mxu0 }
  0xe1   :  { %102 = vst.msk [vmem:[#allocation2] sm:$0xff] %vm101_vm1, %v87_v12  ;;  %v90_v16 = vadd.f32 %v122_v8, %v89_v15 }
  0xe2   :  { %105 = vst.msk [vmem:[#allocation2 + $0x18] sm:$0xff] %vm101_vm1, %v98_v14 }
  0xe3   :  { %103 = vst.msk [vmem:[#allocation2 + $0x8] sm:$0xff] %vm101_vm1, %v90_v16 }
  0xe4   :  { %155 = shalt.err (!%p152_p4)
}
  0xe5   :  { %s156_s28 = scalar_lea.hbm %s227_s3, 512 }
  0xe6   :  { %p157_p5 = scmp.ne.s32.totalorder %s227_s3, %s156_s28  ;;  %p160_p6 = scmp.lt.u32.totalorder %s156_s28, %s227_s3 }
  0xe8   :  { %p162_p7 = pnand %p160_p6, %p157_p5 }
  0xea   :  { %165 = shalt.err (!%p162_p7)
}
  0xeb   :  { %s169_s6 = smov 128   ;;  %s170_s7 = smov 8  }
  0xec   :  { %117 = dma.vmem_to_hbm [thread:$0]  %s112_s26, 512, %s227_s3, [#allocation3], %s169_s6, %s169_s6, %s170_s7  }
  0xed   :  { %166 = dma.done.wait [#allocation3], 512  }
  0xee   :  { %167 = vsyncadd [#allocation3], 4294966784 }
  0xef   :  { %121 = vsyncpa [#allocation3], 1 }

</bundles_post_ra>
